<compile_context>
chip_gen: v7x
topology: tpu7x:2x2x1
jax: 0.10.0
libtpu: 0.0.40
codegen_flags: <defaults>
</compile_context>

<pallas_src>
import functools
import math

import jax
import jax.numpy as jnp
from jax import lax
from jax.experimental import pallas as pl
from jax.experimental.pallas import tpu as pltpu

_NEG_INF = -1e30
_OUT_LANES = 128          # lane-dense partial-output width (unmasked stores)
_EPS2 = 1e-24             # (F.normalize eps = 1e-12) ** 2


def _arcface_kernel(emb_ref, wt_ref, lab_ref,
                    m_out_ref, l_out_ref, t_out_ref,
                    emb_n_ref, m_ref, l_ref, t_ref, *,
                    scale, cos_m, sin_m, split_stride):
    si = pl.program_id(0)                 # class split   ("parallel")
    ci = pl.program_id(2)                 # class tile    ("arbitrary" reduction)
    n_c = pl.num_programs(2)
    block_c = wt_ref.shape[1]

    @pl.when(ci == 0)
    def _init():
        # L2-normalize the embedding tile once per (split, batch tile); keep it
        # resident in VMEM in the MXU dtype and reuse it for every weight tile.
        e = emb_ref[...].astype(jnp.float32)                       # (tB, E)
        ss = jnp.sum(e * e, axis=1, keepdims=True)                 # (tB, 1)
        emb_n_ref[...] = (e * lax.rsqrt(jnp.maximum(ss, _EPS2))).astype(emb_n_ref.dtype)
        m_ref[...] = jnp.full(m_ref.shape, _NEG_INF, jnp.float32)
        l_ref[...] = jnp.zeros_like(l_ref)
        t_ref[...] = jnp.zeros_like(t_ref)

    # cosine = emb_n @ w_n  (weights are pre-normalized bf16 in the wrapper).
    cosine = jnp.dot(emb_n_ref[...], wt_ref[...],
                     preferred_element_type=jnp.float32)           # (tB, tC)

    tile_start = si * split_stride + ci * block_c
    lab = lab_ref[...]                                             # (tB, 1) int32
    col = lax.broadcasted_iota(jnp.int32, cosine.shape, 1) + tile_start
    one_hot = col == lab                                           # (tB, tC)
    # Target cosine per row (exact: single nonzero term in the row sum).
    cos_t = jnp.sum(jnp.where(one_hot, cosine, 0.0), axis=1, keepdims=True)
    has_t = jnp.logical_and(lab >= tile_start, lab < tile_start + block_c)

    # Online (streaming) logsumexp over plain scaled cosines.
    m_prev = m_ref[...]
    m_new = jnp.maximum(m_prev, jnp.max(cosine, axis=1, keepdims=True) * scale)
    alpha = jnp.exp(m_prev - m_new)
    sum_exp = jnp.sum(jnp.exp(cosine * scale - m_new), axis=1, keepdims=True)

    # ArcFace margin on the (tB, 1) target vector only:
    #   cos(theta + m) = c*cos(m) - sqrt(1 - c^2)*sin(m)
    cc = jnp.clip(cos_t, -1.0 + 1e-7, 1.0 - 1e-7)
    marg = (cc * cos_m - jnp.sqrt(jnp.maximum(1.0 - cc * cc, 0.0)) * sin_m) * scale
    corr = jnp.where(has_t,
                     jnp.exp(marg - m_new) - jnp.exp(cos_t * scale - m_new),
                     0.0)

    l_ref[...] = alpha * l_ref[...] + sum_exp + corr
    m_ref[...] = m_new
    t_ref[...] = t_ref[...] + jnp.where(has_t, marg, 0.0)

    @pl.when(ci == n_c - 1)
    def _finalize():
        # Lane-dense, unmasked stores of the per-row LSE partials.
        shape = m_out_ref.shape
        m_out_ref[...] = jnp.broadcast_to(m_ref[...], shape)
        l_out_ref[...] = jnp.broadcast_to(l_ref[...], shape)
        t_out_ref[...] = jnp.broadcast_to(t_ref[...], shape)


def arcface_loss(embeddings, weight, labels, scale=30.0, margin=0.5, *,
                 block_b=None, block_c=None, class_splits=None,
                 mxu_dtype=jnp.bfloat16,
                 vmem_limit_bytes=32 * 1024 * 1024):
    """embeddings: (B, E) f32, weight: (C, E) f32, labels: (B,) int -> scalar f32."""
    B, E = embeddings.shape
    C, E2 = weight.shape
    assert E == E2

    # ---- tiling heuristics -------------------------------------------------
    if block_b is None:
        # <=256 rows (fills v6e/v7x's 256-wide MXU) with minimal row padding.
        n_bt = pl.cdiv(B, 256)
        block_b = pl.cdiv(pl.cdiv(B, n_bt), 8) * 8
    assert block_b % 8 == 0

    itemsize = jnp.dtype(mxu_dtype).itemsize
    if block_c is None:
        # ~8 MiB per weight buffer (double-buffered -> ~16 MiB), which stays well
        # inside the scoped-VMEM budget on every generation (v7x: 64 MiB physical).
        budget = 8 * 1024 * 1024
        block_c = (budget // (itemsize * E)) // 128 * 128
        block_c = max(128, min(block_c, 8192))
        block_c = min(block_c, pl.cdiv(C, 128) * 128)
    assert block_c % 128 == 0

    n_b_tiles = pl.cdiv(B, block_b)
    B_pad = n_b_tiles * block_b
    n_c_tiles = pl.cdiv(C, block_c)
    if class_splits is None:
        # Expose >=2 parallel grid entries when there is a single batch tile so the
        # second TensorCore (v7x megacore) has work; harmless on 1-TC chips.
        class_splits = 2 if (n_b_tiles == 1 and n_c_tiles >= 2) else 1
    n_c_tiles = pl.cdiv(n_c_tiles, class_splits) * class_splits
    n_cs = n_c_tiles // class_splits
    C_pad = n_c_tiles * block_c
    split_stride = n_cs * block_c

    # ---- operand prep (tiny XLA ops; cache/hoist for a frozen classifier) ----
    labels = labels.astype(jnp.int32)
    if B_pad != B:
        emb_p = jnp.zeros((B_pad, E), embeddings.dtype).at[:B].set(embeddings)
        lab_p = jnp.zeros((B_pad,), jnp.int32).at[:B].set(labels)
    else:
        emb_p, lab_p = embeddings, labels
    lab_p = lab_p.reshape(B_pad, 1)

    # Pre-normalize class weights once, stream as (E, C_pad) in the MXU dtype.
    w32 = weight.astype(jnp.float32)
    w_n = w32 * lax.rsqrt(jnp.maximum(jnp.sum(w32 * w32, axis=1, keepdims=True), _EPS2))
    w_t = w_n.T.astype(mxu_dtype)                       # (E, C): lane-dense in C
    if C_pad != C:
        w_p = jnp.zeros((E, C_pad), mxu_dtype).at[:, :C].set(w_t)
    else:
        w_p = w_t

    kernel = functools.partial(
        _arcface_kernel,
        scale=float(scale),
        cos_m=float(math.cos(margin)), sin_m=float(math.sin(margin)),
        split_stride=split_stride)

    cost = pl.CostEstimate(
        flops=int(2 * B_pad * E * C_pad),
        transcendentals=int(B_pad * C_pad),
        bytes_accessed=int(n_b_tiles * C_pad * E * itemsize
                           + class_splits * B_pad * E * 4
                           + 3 * class_splits * B_pad * _OUT_LANES * 4))

    out_sds = jax.ShapeDtypeStruct((class_splits * B_pad, _OUT_LANES), jnp.float32)
    m_o, l_o, t_o = pl.pallas_call(
        kernel,
        out_shape=(out_sds, out_sds, out_sds),
        grid_spec=pltpu.PrefetchScalarGridSpec(
            num_scalar_prefetch=0,
            grid=(class_splits, n_b_tiles, n_cs),
            in_specs=[
                pl.BlockSpec((block_b, E), lambda s, b, c: (b, 0)),              # embeddings
                pl.BlockSpec((E, block_c),
                             lambda s, b, c, n=n_cs: (0, s * n + c)),            # weight (E,C) stream
                pl.BlockSpec((block_b, 1), lambda s, b, c: (b, 0)),              # labels
            ],
            out_specs=[
                pl.BlockSpec((block_b, _OUT_LANES),
                             lambda s, b, c, nb=n_b_tiles: (s * nb + b, 0)),     # m partial
                pl.BlockSpec((block_b, _OUT_LANES),
                             lambda s, b, c, nb=n_b_tiles: (s * nb + b, 0)),     # l partial
                pl.BlockSpec((block_b, _OUT_LANES),
                             lambda s, b, c, nb=n_b_tiles: (s * nb + b, 0)),     # t partial
            ],
            scratch_shapes=[
                pltpu.VMEM((block_b, E), mxu_dtype),       # normalized embeddings (hoisted)
                pltpu.VMEM((block_b, 1), jnp.float32),     # running max
                pltpu.VMEM((block_b, 1), jnp.float32),     # running sum-exp
                pltpu.VMEM((block_b, 1), jnp.float32),     # target logit
            ],
        ),
        compiler_params=pltpu.CompilerParams(
            dimension_semantics=("parallel", "parallel", "arbitrary"),
            vmem_limit_bytes=vmem_limit_bytes,
        ),
        cost_estimate=cost,
    )(emb_p, w_p, lab_p)

    # Combine per-split streaming-LSE partials (exact) and correct for the
    # zero-padded class columns, whose combined contribution is (C_pad-C)*exp(-m).
    m_p = m_o[:, 0].reshape(class_splits, B_pad)
    l_p = l_o[:, 0].reshape(class_splits, B_pad)
    t_p = t_o[:, 0].reshape(class_splits, B_pad)
    m_g = jnp.max(m_p, axis=0)
    l_g = jnp.sum(l_p * jnp.exp(m_p - m_g[None, :]), axis=0)
    if C_pad != C:
        l_g = l_g - float(C_pad - C) * jnp.exp(-m_g)
    t_g = jnp.sum(t_p, axis=0)
    row_loss = m_g + jnp.log(l_g) - t_g
    return jnp.sum(row_loss[:B]) / B


def arcface_loss_f32_ref(embeddings, weight, labels, scale=30.0, margin=0.5):
    """Plain-JAX f32 reference mirroring the PyTorch forward (arccos / cos)."""
    eps = 1e-12
    emb_n = embeddings / jnp.maximum(
        jnp.linalg.norm(embeddings, axis=1, keepdims=True), eps)
    w_n = weight / jnp.maximum(jnp.linalg.norm(weight, axis=1, keepdims=True), eps)
    cosine = jnp.dot(emb_n, w_n.T, precision=jax.lax.Precision.HIGHEST)
    theta = jnp.arccos(jnp.clip(cosine, -1.0 + 1e-7, 1.0 - 1e-7))
    marginal = jnp.cos(theta + margin)
    one_hot = jax.nn.one_hot(labels, weight.shape[0], dtype=jnp.bool_)
    logits = jnp.where(one_hot, marginal, cosine) * scale
    logp = jax.nn.log_softmax(logits, axis=1)
    return -jnp.mean(jnp.take_along_axis(logp, labels[:, None], axis=1))


def arcface_loss_matched_ref(embeddings, weight, labels, scale=30.0, margin=0.5,
                             mxu_dtype=jnp.bfloat16):
    """Plain-JAX reference matching the kernel's bf16-MXU / f32-accumulate precision."""
    emb_n = (embeddings * lax.rsqrt(jnp.maximum(
        jnp.sum(embeddings * embeddings, axis=1, keepdims=True), _EPS2))).astype(mxu_dtype)
    w_n = (weight * lax.rsqrt(jnp.maximum(
        jnp.sum(weight * weight, axis=1, keepdims=True), _EPS2))).astype(mxu_dtype)
    cosine = jnp.dot(emb_n, w_n.T, preferred_element_type=jnp.float32)
    cc = jnp.clip(cosine, -1.0 + 1e-7, 1.0 - 1e-7)
    marginal = cc * math.cos(margin) - jnp.sqrt(
        jnp.maximum(1.0 - cc * cc, 0.0)) * math.sin(margin)
    one_hot = jax.nn.one_hot(labels, weight.shape[0], dtype=jnp.bool_)
    logits = jnp.where(one_hot, marginal, cosine) * scale
    logp = jax.nn.log_softmax(logits, axis=1)
    return -jnp.mean(jnp.take_along_axis(logp, labels[:, None], axis=1))


if __name__ == "__main__":
    # Small shapes consistent with an ArcFace head on Swin embeddings:
    # batch=16, embedding dim=256, 200 classes (exercises the class split,
    # padded batch rows and padded class columns when block_c=128).
    B, E, C = 16, 256, 200
    scale, margin = 30.0, 0.5

    key = jax.random.PRNGKey(0)
    k_emb, k_w, k_lab = jax.random.split(key, 3)
    embeddings = jax.random.normal(k_emb, (B, E), dtype=jnp.float32)
    bound = math.sqrt(6.0 / (E + C))                    # xavier_uniform_
    weight = jax.random.uniform(k_w, (C, E), dtype=jnp.float32,
                                minval=-bound, maxval=bound)
    labels = jax.random.randint(k_lab, (B,), 0, C, dtype=jnp.int32)

    ref_f32 = arcface_loss_f32_ref(embeddings, weight, labels, scale, margin)
    ref_matched = arcface_loss_matched_ref(embeddings, weight, labels, scale, margin)

    # 1) bf16-MXU path, 2 streamed class tiles -> class split of 2 (megacore),
    #    padded batch rows (16 -> 128) and padded class columns (200 -> 256).
    loss_bf16 = jax.block_until_ready(
        arcface_loss(embeddings, weight, labels, scale, margin,
                     block_b=128, block_c=128))
    assert jnp.isfinite(loss_bf16), "kernel produced non-finite loss"
    assert jnp.allclose(loss_bf16, ref_matched, rtol=2e-3, atol=2e-3), (loss_bf16, ref_matched)

    # 2) default heuristics (tight batch tile, single class tile, no split).
    loss_auto = jax.block_until_ready(
        arcface_loss(embeddings, weight, labels, scale, margin))
    assert jnp.allclose(loss_auto, ref_matched, rtol=2e-3, atol=2e-3), (loss_auto, ref_matched)

    # 3) f32-MXU path: tight match against the arccos/cos f32 reference.
    loss_f32 = jax.block_until_ready(
        arcface_loss(embeddings, weight, labels, scale, margin,
                     block_b=128, block_c=128, mxu_dtype=jnp.float32))
    assert jnp.isfinite(loss_f32), "kernel produced non-finite loss"
    assert jnp.allclose(loss_f32, ref_f32, rtol=1e-3, atol=1e-3), (loss_f32, ref_f32)

    print("KERNEL_OK")
</pallas_src>

<mosaic_0001>
module attributes {stable_mosaic.version = 11 : i64} {
  func.func @_arcface_kernel(%arg0: i32, %arg1: i32, %arg2: i32, %arg3: memref<128x256xf32, #tpu.memory_space<vmem>>, %arg4: memref<256x128xbf16, #tpu.memory_space<vmem>>, %arg5: memref<128x1xi32, #tpu.memory_space<vmem>>, %arg6: memref<128x128xf32, #tpu.memory_space<vmem>>, %arg7: memref<128x128xf32, #tpu.memory_space<vmem>>, %arg8: memref<128x128xf32, #tpu.memory_space<vmem>>, %arg9: memref<128x256xbf16, #tpu.memory_space<vmem>>, %arg10: memref<128x1xf32, #tpu.memory_space<vmem>>, %arg11: memref<128x1xf32, #tpu.memory_space<vmem>>, %arg12: memref<128x1xf32, #tpu.memory_space<vmem>>) attributes {dimension_semantics = [#tpu.dimension_semantics<parallel>, #tpu.dimension_semantics<parallel>, #tpu.dimension_semantics<arbitrary>], iteration_bounds = array<i64: 2, 1, 1>, scalar_prefetch = 0 : i64, scratch_operands = 4 : i64, tpu.core_type = #tpu.core_type<tc>, window_params = [{transform_indices = @transform_0, window_bounds = array<i64: 128, 256>}, {transform_indices = @transform_1, window_bounds = array<i64: 256, 128>}, {transform_indices = @transform_2, window_bounds = array<i64: 128, 1>}, {transform_indices = @transform_3, window_bounds = array<i64: 128, 128>}, {transform_indices = @transform_4, window_bounds = array<i64: 128, 128>}, {transform_indices = @transform_5, window_bounds = array<i64: 128, 128>}]} {
    %c0_i32 = arith.constant 0 : i32
    %0 = arith.cmpi eq, %arg2, %c0_i32 : i32
    %1 = arith.extui %0 : i1 to i32
    %c0_i32_0 = arith.constant 0 : i32
    %2 = arith.cmpi ne, %1, %c0_i32_0 : i32
    scf.if %2 {
      %c0_38 = arith.constant 0 : index
      %c0_39 = arith.constant 0 : index
      %80 = vector.load %arg3[%c0_38, %c0_39] : memref<128x256xf32, #tpu.memory_space<vmem>>, vector<128x256xf32>
      %81 = arith.mulf %80, %80 : vector<128x256xf32>
      %cst_40 = arith.constant dense<0.000000e+00> : vector<128xf32>
      %82 = vector.multi_reduction <add>, %81, %cst_40 [1] : vector<128x256xf32> to vector<128xf32>
      %83 = vector.shape_cast %82 : vector<128xf32> to vector<128x1xf32>
      %cst_41 = arith.constant 1.000000e-24 : f32
      %84 = vector.broadcast %cst_41 : f32 to vector<128x1xf32>
      %85 = arith.maximumf %83, %84 : vector<128x1xf32>
      %86 = math.rsqrt %85 : vector<128x1xf32>
      %87 = vector.broadcast %86 : vector<128x1xf32> to vector<128x256xf32>
      %88 = arith.mulf %80, %87 : vector<128x256xf32>
      %89 = arith.truncf %88 : vector<128x256xf32> to vector<128x256xbf16>
      %c0_42 = arith.constant 0 : index
      %c0_43 = arith.constant 0 : index
      %90 = vector.load %arg9[%c0_42, %c0_43] : memref<128x256xbf16, #tpu.memory_space<vmem>>, vector<128x256xbf16>
      tpu.vector_store %arg9[%c0_42, %c0_43], %89 {strides = array<i32>} : memref<128x256xbf16, #tpu.memory_space<vmem>>, vector<128x256xbf16>,
      %cst_44 = arith.constant -1.000000e+30 : f32
      %91 = vector.broadcast %cst_44 : f32 to vector<128x1xf32>
      %c0_45 = arith.constant 0 : index
      %c0_46 = arith.constant 0 : index
      %92 = vector.load %arg10[%c0_45, %c0_46] : memref<128x1xf32, #tpu.memory_space<vmem>>, vector<128x1xf32>
      tpu.vector_store %arg10[%c0_45, %c0_46], %91 {strides = array<i32>} : memref<128x1xf32, #tpu.memory_space<vmem>>, vector<128x1xf32>,
      %cst_47 = arith.constant 0.000000e+00 : f32
      %93 = vector.broadcast %cst_47 : f32 to vector<128x1xf32>
      %c0_48 = arith.constant 0 : index
      %c0_49 = arith.constant 0 : index
      %94 = vector.load %arg11[%c0_48, %c0_49] : memref<128x1xf32, #tpu.memory_space<vmem>>, vector<128x1xf32>
      tpu.vector_store %arg11[%c0_48, %c0_49], %93 {strides = array<i32>} : memref<128x1xf32, #tpu.memory_space<vmem>>, vector<128x1xf32>,
      %cst_50 = arith.constant 0.000000e+00 : f32
      %95 = vector.broadcast %cst_50 : f32 to vector<128x1xf32>
      %c0_51 = arith.constant 0 : index
      %c0_52 = arith.constant 0 : index
      %96 = vector.load %arg12[%c0_51, %c0_52] : memref<128x1xf32, #tpu.memory_space<vmem>>, vector<128x1xf32>
      tpu.vector_store %arg12[%c0_51, %c0_52], %95 {strides = array<i32>} : memref<128x1xf32, #tpu.memory_space<vmem>>, vector<128x1xf32>,
    } else {
    }
    %c0 = arith.constant 0 : index
    %c0_1 = arith.constant 0 : index
    %3 = vector.load %arg9[%c0, %c0_1] : memref<128x256xbf16, #tpu.memory_space<vmem>>, vector<128x256xbf16>
    %c0_2 = arith.constant 0 : index
    %c0_3 = arith.constant 0 : index
    %4 = vector.load %arg4[%c0_2, %c0_3] : memref<256x128xbf16, #tpu.memory_space<vmem>>, vector<256x128xbf16>
    %cst = arith.constant dense<0.000000e+00> : vector<128x128xf32>
    %5 = tpu.matmul %3, %4, %cst {dimension_numbers = #tpu.dot_dimension_numbers<[1], [0], [0], [1], [0, 0, 1, 1], [], []>} : vector<128x256xbf16>, vector<256x128xbf16>, vector<128x128xf32> -> vector<128x128xf32>
    %c128_i32 = arith.constant 128 : i32
    %6 = arith.muli %arg0, %c128_i32 : i32
    %c128_i32_4 = arith.constant 128 : i32
    %7 = arith.muli %arg2, %c128_i32_4 : i32
    %8 = arith.addi %6, %7 : i32
    %c0_5 = arith.constant 0 : index
    %c0_6 = arith.constant 0 : index
    %9 = vector.load %arg5[%c0_5, %c0_6] : memref<128x1xi32, #tpu.memory_space<vmem>>, vector<128x1xi32>
    %10 = tpu.iota {dimensions = array<i32: 1>} : vector<128x128xi32>
    %11 = vector.broadcast %8 : i32 to vector<128x128xi32>
    %12 = arith.addi %10, %11 : vector<128x128xi32>
    %13 = vector.broadcast %9 : vector<128x1xi32> to vector<128x128xi32>
    %14 = arith.cmpi eq, %12, %13 : vector<128x128xi32>
    %cst_7 = arith.constant 0.000000e+00 : f32
    %15 = vector.broadcast %cst_7 : f32 to vector<128x128xf32>
    %16 = arith.select %14, %5, %15 : vector<128x128xi1>, vector<128x128xf32>
    %cst_8 = arith.constant dense<0.000000e+00> : vector<128xf32>
    %17 = vector.multi_reduction <add>, %16, %cst_8 [1] : vector<128x128xf32> to vector<128xf32>
    %18 = vector.shape_cast %17 : vector<128xf32> to vector<128x1xf32>
    %19 = vector.broadcast %8 : i32 to vector<128x1xi32>
    %20 = arith.cmpi sge, %9, %19 : vector<128x1xi32>
    %c128_i32_9 = arith.constant 128 : i32
    %21 = arith.addi %8, %c128_i32_9 : i32
    %22 = vector.broadcast %21 : i32 to vector<128x1xi32>
    %23 = arith.cmpi slt, %9, %22 : vector<128x1xi32>
    %24 = arith.andi %20, %23 : vector<128x1xi1>
    %c0_10 = arith.constant 0 : index
    %c0_11 = arith.constant 0 : index
    %25 = vector.load %arg10[%c0_10, %c0_11] : memref<128x1xf32, #tpu.memory_space<vmem>>, vector<128x1xf32>
    %cst_12 = arith.constant dense<0xFF800000> : vector<128xf32>
    %26 = vector.multi_reduction <maximumf>, %5, %cst_12 [1] : vector<128x128xf32> to vector<128xf32>
    %27 = vector.shape_cast %26 : vector<128xf32> to vector<128x1xf32>
    %cst_13 = arith.constant 3.000000e+01 : f32
    %28 = vector.broadcast %cst_13 : f32 to vector<128x1xf32>
    %29 = arith.mulf %27, %28 : vector<128x1xf32>
    %30 = arith.maximumf %25, %29 : vector<128x1xf32>
    %31 = arith.subf %25, %30 : vector<128x1xf32>
    %32 = math.exp %31 : vector<128x1xf32>
    %cst_14 = arith.constant 3.000000e+01 : f32
    %33 = vector.broadcast %cst_14 : f32 to vector<128x128xf32>
    %34 = arith.mulf %5, %33 : vector<128x128xf32>
    %35 = vector.broadcast %30 : vector<128x1xf32> to vector<128x128xf32>
    %36 = arith.subf %34, %35 : vector<128x128xf32>
    %37 = math.exp %36 : vector<128x128xf32>
    %cst_15 = arith.constant dense<0.000000e+00> : vector<128xf32>
    %38 = vector.multi_reduction <add>, %37, %cst_15 [1] : vector<128x128xf32> to vector<128xf32>
    %39 = vector.shape_cast %38 : vector<128xf32> to vector<128x1xf32>
    %cst_16 = arith.constant -0.99999988 : f32
    %cst_17 = arith.constant 0.99999988 : f32
    %40 = vector.broadcast %cst_16 : f32 to vector<128x1xf32>
    %41 = arith.maximumf %40, %18 : vector<128x1xf32>
    %42 = vector.broadcast %cst_17 : f32 to vector<128x1xf32>
    %43 = arith.minimumf %42, %41 : vector<128x1xf32>
    %cst_18 = arith.constant 0.87758255 : f32
    %44 = vector.broadcast %cst_18 : f32 to vector<128x1xf32>
    %45 = arith.mulf %43, %44 : vector<128x1xf32>
    %46 = arith.mulf %43, %43 : vector<128x1xf32>
    %cst_19 = arith.constant 1.000000e+00 : f32
    %47 = vector.broadcast %cst_19 : f32 to vector<128x1xf32>
    %48 = arith.subf %47, %46 : vector<128x1xf32>
    %cst_20 = arith.constant 0.000000e+00 : f32
    %49 = vector.broadcast %cst_20 : f32 to vector<128x1xf32>
    %50 = arith.maximumf %48, %49 : vector<128x1xf32>
    %51 = math.sqrt %50 : vector<128x1xf32>
    %cst_21 = arith.constant 0.47942555 : f32
    %52 = vector.broadcast %cst_21 : f32 to vector<128x1xf32>
    %53 = arith.mulf %51, %52 : vector<128x1xf32>
    %54 = arith.subf %45, %53 : vector<128x1xf32>
    %cst_22 = arith.constant 3.000000e+01 : f32
    %55 = vector.broadcast %cst_22 : f32 to vector<128x1xf32>
    %56 = arith.mulf %54, %55 : vector<128x1xf32>
    %57 = arith.subf %56, %30 : vector<128x1xf32>
    %58 = math.exp %57 : vector<128x1xf32>
    %cst_23 = arith.constant 3.000000e+01 : f32
    %59 = vector.broadcast %cst_23 : f32 to vector<128x1xf32>
    %60 = arith.mulf %18, %59 : vector<128x1xf32>
    %61 = arith.subf %60, %30 : vector<128x1xf32>
    %62 = math.exp %61 : vector<128x1xf32>
    %63 = arith.subf %58, %62 : vector<128x1xf32>
    %cst_24 = arith.constant 0.000000e+00 : f32
    %64 = vector.broadcast %cst_24 : f32 to vector<128x1xf32>
    %65 = arith.select %24, %63, %64 : vector<128x1xi1>, vector<128x1xf32>
    %c0_25 = arith.constant 0 : index
    %c0_26 = arith.constant 0 : index
    %66 = vector.load %arg11[%c0_25, %c0_26] : memref<128x1xf32, #tpu.memory_space<vmem>>, vector<128x1xf32>
    %67 = arith.mulf %32, %66 : vector<128x1xf32>
    %68 = arith.addf %67, %39 : vector<128x1xf32>
    %69 = arith.addf %68, %65 : vector<128x1xf32>
    %c0_27 = arith.constant 0 : index
    %c0_28 = arith.constant 0 : index
    %70 = vector.load %arg11[%c0_27, %c0_28] : memref<128x1xf32, #tpu.memory_space<vmem>>, vector<128x1xf32>
    tpu.vector_store %arg11[%c0_27, %c0_28], %69 {strides = array<i32>} : memref<128x1xf32, #tpu.memory_space<vmem>>, vector<128x1xf32>,
    %c0_29 = arith.constant 0 : index
    %c0_30 = arith.constant 0 : index
    %71 = vector.load %arg10[%c0_29, %c0_30] : memref<128x1xf32, #tpu.memory_space<vmem>>, vector<128x1xf32>
    tpu.vector_store %arg10[%c0_29, %c0_30], %30 {strides = array<i32>} : memref<128x1xf32, #tpu.memory_space<vmem>>, vector<128x1xf32>,
    %c0_31 = arith.constant 0 : index
    %c0_32 = arith.constant 0 : index
    %72 = vector.load %arg12[%c0_31, %c0_32] : memref<128x1xf32, #tpu.memory_space<vmem>>, vector<128x1xf32>
    %cst_33 = arith.constant 0.000000e+00 : f32
    %73 = vector.broadcast %cst_33 : f32 to vector<128x1xf32>
    %74 = arith.select %24, %56, %73 : vector<128x1xi1>, vector<128x1xf32>
    %75 = arith.addf %72, %74 : vector<128x1xf32>
    %c0_34 = arith.constant 0 : index
    %c0_35 = arith.constant 0 : index
    %76 = vector.load %arg12[%c0_34, %c0_35] : memref<128x1xf32, #tpu.memory_space<vmem>>, vector<128x1xf32>
    tpu.vector_store %arg12[%c0_34, %c0_35], %75 {strides = array<i32>} : memref<128x1xf32, #tpu.memory_space<vmem>>, vector<128x1xf32>,
    %c0_i32_36 = arith.constant 0 : i32
    %77 = arith.cmpi eq, %arg2, %c0_i32_36 : i32
    %78 = arith.extui %77 : i1 to i32
    %c0_i32_37 = arith.constant 0 : i32
    %79 = arith.cmpi ne, %78, %c0_i32_37 : i32
    scf.if %79 {
      %c0_38 = arith.constant 0 : index
      %c0_39 = arith.constant 0 : index
      %80 = vector.load %arg10[%c0_38, %c0_39] : memref<128x1xf32, #tpu.memory_space<vmem>>, vector<128x1xf32>
      %81 = vector.shape_cast %80 : vector<128x1xf32> to vector<128x1xf32>
      %82 = vector.broadcast %81 : vector<128x1xf32> to vector<128x128xf32>
      %c0_40 = arith.constant 0 : index
      %c0_41 = arith.constant 0 : index
      %83 = vector.load %arg6[%c0_40, %c0_41] : memref<128x128xf32, #tpu.memory_space<vmem>>, vector<128x128xf32>
      tpu.vector_store %arg6[%c0_40, %c0_41], %82 {strides = array<i32>} : memref<128x128xf32, #tpu.memory_space<vmem>>, vector<128x128xf32>,
      %c0_42 = arith.constant 0 : index
      %c0_43 = arith.constant 0 : index
      %84 = vector.load %arg11[%c0_42, %c0_43] : memref<128x1xf32, #tpu.memory_space<vmem>>, vector<128x1xf32>
      %85 = vector.shape_cast %84 : vector<128x1xf32> to vector<128x1xf32>
      %86 = vector.broadcast %85 : vector<128x1xf32> to vector<128x128xf32>
      %c0_44 = arith.constant 0 : index
      %c0_45 = arith.constant 0 : index
      %87 = vector.load %arg7[%c0_44, %c0_45] : memref<128x128xf32, #tpu.memory_space<vmem>>, vector<128x128xf32>
      tpu.vector_store %arg7[%c0_44, %c0_45], %86 {strides = array<i32>} : memref<128x128xf32, #tpu.memory_space<vmem>>, vector<128x128xf32>,
      %c0_46 = arith.constant 0 : index
      %c0_47 = arith.constant 0 : index
      %88 = vector.load %arg12[%c0_46, %c0_47] : memref<128x1xf32, #tpu.memory_space<vmem>>, vector<128x1xf32>
      %89 = vector.shape_cast %88 : vector<128x1xf32> to vector<128x1xf32>
      %90 = vector.broadcast %89 : vector<128x1xf32> to vector<128x128xf32>
      %c0_48 = arith.constant 0 : index
      %c0_49 = arith.constant 0 : index
      %91 = vector.load %arg8[%c0_48, %c0_49] : memref<128x128xf32, #tpu.memory_space<vmem>>, vector<128x128xf32>
      tpu.vector_store %arg8[%c0_48, %c0_49], %90 {strides = array<i32>} : memref<128x128xf32, #tpu.memory_space<vmem>>, vector<128x128xf32>,
    } else {
    }
    return
  }
  func.func @transform_0(%arg0: i32, %arg1: i32, %arg2: i32) -> (i32, i32) {
    %c0_i32 = arith.constant 0 : i32
    %c0_i32_0 = arith.constant 0 : i32
    return %arg1, %c0_i32 : i32, i32
  }
  func.func @transform_1(%arg0: i32, %arg1: i32, %arg2: i32) -> (i32, i32) {
    %c1_i32 = arith.constant 1 : i32
    %0 = arith.muli %arg0, %c1_i32 : i32
    %1 = arith.addi %0, %arg2 : i32
    %c0_i32 = arith.constant 0 : i32
    %c0_i32_0 = arith.constant 0 : i32
    return %c0_i32, %1 : i32, i32
  }
  func.func @transform_2(%arg0: i32, %arg1: i32, %arg2: i32) -> (i32, i32) {
    %c0_i32 = arith.constant 0 : i32
    %c0_i32_0 = arith.constant 0 : i32
    return %arg1, %c0_i32 : i32, i32
  }
  func.func @transform_3(%arg0: i32, %arg1: i32, %arg2: i32) -> (i32, i32) {
    %c1_i32 = arith.constant 1 : i32
    %0 = arith.muli %arg0, %c1_i32 : i32
    %1 = arith.addi %0, %arg1 : i32
    %c0_i32 = arith.constant 0 : i32
    %c0_i32_0 = arith.constant 0 : i32
    return %1, %c0_i32 : i32, i32
  }
  func.func @transform_4(%arg0: i32, %arg1: i32, %arg2: i32) -> (i32, i32) {
    %c1_i32 = arith.constant 1 : i32
    %0 = arith.muli %arg0, %c1_i32 : i32
    %1 = arith.addi %0, %arg1 : i32
    %c0_i32 = arith.constant 0 : i32
    %c0_i32_0 = arith.constant 0 : i32
    return %1, %c0_i32 : i32, i32
  }
  func.func @transform_5(%arg0: i32, %arg1: i32, %arg2: i32) -> (i32, i32) {
    %c1_i32 = arith.constant 1 : i32
    %0 = arith.muli %arg0, %c1_i32 : i32
    %1 = arith.addi %0, %arg1 : i32
    %c0_i32 = arith.constant 0 : i32
    %c0_i32_0 = arith.constant 0 : i32
    return %1, %c0_i32 : i32, i32
  }
}

</mosaic_0001>

<bundles_post_ra>
// kernel: tpu_custom_call.1
= control target key start
LH: loop header
LB: loop body
LE: loop exit
PB: predicated region body
PF: predicated region fallthrough
CT: control target
= control target key end

     0   :  { %11 = vsyncpa [#allocation7], 0  ;;  %s4861_s0 = inlined_call_operand.hbm [shape: f32[128,256], index: 0, kind: input, shape index: {}]   ;;  %s4862_s1 = inlined_call_operand.hbm [shape: bf16[256,256], index: 1, kind: input, shape index: {}]   ;;  %s4863_s2 = inlined_call_operand.vmem [shape: s32[128,1], index: 2, kind: input, shape index: {}]   ;;  %s4864_s3 = inlined_call_operand.hbm [shape: f32[256,128], index: 3, kind: output, shape index: {0}]   ;;  %s4865_s4 = inlined_call_operand.hbm [shape: f32[256,128], index: 4, kind: output, shape index: {1}]   ;;  %s4866_s5 = inlined_call_operand.hbm [shape: f32[256,128], index: 5, kind: output, shape index: {2}]  }
   0x1   :  { %12 = vsyncpa [#allocation10], 0 }
   0x2   :  { %14 = vsyncpa [#allocation10 + $0x1], 0 }
   0x3   :  { %15 = vsyncpa [#allocation8], 0 }
   0x4   :  { %17 = vsyncpa [#allocation8 + $0x1], 0 }
   0x5   :  { %18 = vsyncpa [#allocation13], 0 }
   0x6   :  { %20 = vsyncpa [#allocation13 + $0x1], 0  ;;  %s3167_s18 = smov 0   ;;  %s3169_s19 = smov 0  }
   0x7   :  { %s3171_s20 = smov 0   ;;  %s3173_s21 = smov 0  }
   0x8   :  { %s3175_s22 = smov 0   ;;  %s3177_s23 = smov 0  }
   0x9 LB: > { %4933 = sst [smem:[#allocation19_spill]] %s3120_s23  ;;  %s3198_s24 = sadd.s32 4294967295, %s3120_s23   ;;  %s3120_s23 = sphi %s3177_s23, %s26_s23   ;;  %s3116_s22 = sphi %s3175_s22, %s5163_s22   ;;  %s3112_s21 = sphi %s3173_s21, %s5162_s21   ;;  %s3108_s20 = sphi %s3171_s20, %s5161_s20   ;;  %s3104_s19 = sphi %s3169_s19, %s5160_s19   ;;  %s3100_s18 = sphi %s3167_s18, %s5159_s18  }
   0xa   : > { %s4872_s25 = sadd.s32 4294967294, %s3120_s23   ;;  %p87_p0 = scmp.ne.s32.totalorder %s3108_s20, %s3104_s19 }
   0xb   : > { %p88_p1 = scmp.eq.s32.totalorder %s3120_s23, 0  ;;  %p93_p2 = scmp.ne.s32.totalorder %s3104_s19, %s3100_s18 }
   0xc   : > { %p4867_p3 = scmp.eq.s32.totalorder %s3198_s24, 0  ;;  %p145_p5 = scmp.eq.s32.totalorder %s3198_s24, 1 }
   0xd   : > { %p3207_p4 = por %p88_p1, %p87_p0  ;;  %p151_p7 = scmp.eq.s32.totalorder %s4872_s25, 1 }
   0xe   : > { %p3214_p6 = por %p4867_p3, %p93_p2  ;;  %p3220_p8 = por %p145_p5, %p87_p0 }
   0xf   : > { %p2473_p9 = scmp.ge.s32.totalorder %s3120_s23, 1  ;;  %p3225_p10 = por %p151_p7, %p93_p2 }
  0x10   : > { %s4935_s27 = scalar_select %p3214_p6, 1, 0 }
  0x11   : > { %s4936_s28 = scalar_select %p3220_p8, 1, 0 }
  0x12   : > { %s4937_s29 = scalar_select %p3225_p10, 1, 0 }
  0x13   : > { %p214_p11 = scmp.lt.s32.totalorder %s3120_s23, 3  ;;  %s3122_s6 = smov [#allocation6]  }
  0x14   : > { %s230_s7 = sshll.u32 %s3122_s6, 4  ;;  %p2643_p1 = scmp.lt.s32.totalorder %s3120_s23, 2  ;;  %s3234_s7 = int_to_ptr.vmem [resolvable:$true] %s230_s7 }
  0x15   : > { %p3230_p12 = pnand %p2473_p9, %p214_p11  ;;  %s45_s10 = sadd.s32 1, %s3116_s22 }
  0x16   : > { %p3248_p2 = pnand %p2643_p1, %p3207_p4  ;;  %s2916_s13 = scalar_lea.hbm %s4861_s0, 4096 }
  0x17   : > { %s4938_s30 = scalar_select %p3230_p12, 1, 0 }
  0x18   : > { %p2624_p13 = pneg %p3230_p12  ;;  %p2917_p7 = scmp.ne.s32.totalorder %s4861_s0, %s2916_s13 }
  0x19   : > { %s4940_s9 = scalar_select %p3248_p2, 1, 0 }
  0x1a   : > { %p3242_p5 = pnand %p2624_p13, %p4867_p3  ;;  %p2923_p4 = scmp.lt.u32.totalorder %s2916_s13, %s4861_s0 }
  0x1c   : > { %p2918_p9 = pneg %p3242_p5 }
  0x1e   : > { %p2919_p11 = pnand %p2918_p9, %p2917_p7 }
  0x20   : > { %p2920_p13 = pneg %p2919_p11 }
  0x22   : > { %p2925_p1 = pnand %p2923_p4, %p2920_p13 }
  0x24   : > { %2928 = shalt.err (!%p2925_p1)
}
  0x25   : > { %s2929_s26 = scalar_lea.vmem %s3234_s7, 4096  ;;  %p2937_p8 = scmp.lt.s32.totalorder %s3234_s7, %s3234_s7 }
  0x26   : > { %p2930_p0 = scmp.ne.s32.totalorder %s3234_s7, %s2929_s26  ;;  %p2938_p6 = scmp.lt.s32.totalorder %s2929_s26, %s2929_s26 }
  0x28   : > { %p2932_p3 = pnand %p2930_p0, %p2918_p9  ;;  %p2939_p12 = por %p2938_p6, %p2937_p8 }
  0x2a   : > { %p2933_p10 = pneg %p2932_p3 }
  0x2c   : > { %p2940_p2 = pnand %p2939_p12, %p2933_p10 }
  0x2e   : > { %2943 = shalt.err (!%p2940_p2)
}
  0x2f   : > { %s3123_s6 = smov 256   ;;  %s3124_s11 = smov 16  }
  0x30   : > { %2627 = dma.hbm_to_vmem [thread:$0]  (!%p3242_p5), %s4861_s0, 4096, %s3234_s7, [#allocation7], %s3123_s6, %s3123_s6, %s3124_s11  }
  0x31   : > { %p47_p3 = scmp.ge.s32.totalorder %s45_s10, 2  ;;  %s80_s14 = sadd.s32 1, %s3108_s20 }
  0x32   : > { %s253_s15 = sand.u32 1, %s3108_s20   ;;  %s2478_s26 = sshll.u32 %s3116_s22, 6 }
  0x33   : > { %s5165_s10 = smov (%p47_p3, %s45_s10), 0  ;;  %s2477_s16 = sshll.u32 %s253_s15, 7 }
  0x34   : > { %s77_s17 = ssub.s32 %s3116_s22, %s5165_s10  ;;  %s3284_s8 = scalar_lea.hbm %s4862_s1, %s2478_s26 }
  0x35   : > { %p78_p6 = scmp.eq.s32.totalorder %s77_s17, 0  ;;  %s257_s7 = scalar_lea.vmem [#allocation9], %s2477_s16 }
  0x36   : > { %s264_s6 = sshll.u32 %s257_s7, 4  ;;  %s3291_s12 = scalar_lea.sflag [#allocation10], %s253_s15  ;;  %s3289_s6 = int_to_ptr.vmem [resolvable:$true] %s264_s6 }
  0x37   : > { %s3287_s11 = scalar_select %p78_p6, %s3108_s20, %s80_s14  }
  0x38   : > { %s2944_s13 = scalar_lea.hbm %s3284_s8, 2048  ;;  %p4941_p10 = scmp.ne.s32.totalorder %s4940_s9, 0 }
  0x39   : > { %p2945_p8 = scmp.ne.s32.totalorder %s3284_s8, %s2944_s13  ;;  %s2949_s17 = scalar_lea.hbm %s4862_s1, 4096 }
  0x3a   : > { %p2946_p12 = pneg %p4941_p10  ;;  %p2950_p2 = scmp.lt.u32.totalorder %s3284_s8, %s4862_s1 }
  0x3b   : > { %p2951_p7 = scmp.lt.u32.totalorder %s2949_s17, %s2944_s13  ;;  %p2953_p11 = scmp.lt.u32.totalorder %s2944_s13, %s3284_s8 }
  0x3c   : > { %p2947_p0 = pnand %p2946_p12, %p2945_p8 }
  0x3d   : > { %p2952_p9 = por %p2951_p7, %p2950_p2 }
  0x3e   : > { %p2948_p5 = pneg %p2947_p0 }
  0x3f   : > { %p2954_p13 = por %p2953_p11, %p2952_p9 }
  0x41   : > { %p2955_p4 = pnand %p2954_p13, %p2948_p5 }
  0x43   : > { %2958 = shalt.err (!%p2955_p4)
}
  0x44   : > { %s2959_s14 = scalar_lea.vmem %s3289_s6, 2048  ;;  %s3125_s15 = smov [#allocation9]  }
  0x45   : > { %p2960_p1 = scmp.ne.s32.totalorder %s3289_s6, %s2959_s14  ;;  %s2964_s7 = sshll.u32 %s3125_s15, 4  ;;  %s2965_s7 = int_to_ptr.vmem [resolvable:$false] %s2964_s7 }
  0x46   : > { %s2966_s23 = scalar_lea.vmem %s2965_s7, 4096  ;;  %p2967_p8 = scmp.lt.s32.totalorder %s3289_s6, %s2965_s7 }
  0x47   : > { %p2962_p3 = pnand %p2960_p1, %p2946_p12  ;;  %p2968_p0 = scmp.lt.s32.totalorder %s2966_s23, %s2959_s14 }
  0x49   : > { %p2963_p6 = pneg %p2962_p3  ;;  %p2969_p2 = por %p2968_p0, %p2967_p8 }
  0x4b   : > { %p2970_p7 = pnand %p2969_p2, %p2963_p6 }
  0x4d   : > { %2973 = shalt.err (!%p2970_p7)
}
  0x4e   : > { %s3126_s13 = smov 128   ;;  %s3127_s25 = smov 64  }
  0x4f   : > { %s3128_s17 = smov 4   ;;  %p4942_p12 = scmp.ne.s32.totalorder %s4938_s30, 0 }
  0x50   : > { %2631 = dma.hbm_to_vmem [thread:$0]  (!%p4941_p10), %s3284_s8, 2048, %s3289_s6, %s3291_s12, %s3126_s13, %s3127_s25, %s3128_s17  }
  0x51   : > { %276 = sbr.rel (%p4942_p12) target bundleno = 1165 (0x48d), region = 32 }
  0x58   : > { %p4943_p5 = scmp.eq.s32.totalorder %s3198_s24, 0 }
  0x5a   : > { %3083 = dma.done.wait (%p4943_p5), [#allocation7], 4096   ;;  %p4944_p9 = pmov %p4943_p5 }
  0x5b   : > { %s3326_s16 = sand.u32 1, %s3104_s19   ;;  %p4945_p10 = scmp.ne.s32.totalorder %s4935_s27, 0 }
  0x5c   : > { %3085 = vsyncadd (%p4944_p9), [#allocation7], 4294963200  ;;  %s3329_s26 = sshll.u32 %s3326_s16, 7  ;;  %s283_s9 = scalar_lea.sflag [#allocation10], %s3326_s16 }
  0x5d   : > { %s3333_s8 = scalar_lea.vmem [#allocation9], %s3329_s26 }
  0x5e   : > { %3087 = dma.done.wait (%p4945_p10), %s283_s9, 2048  }
  0x5f   : > { %3089 = vsyncadd (%p4945_p10), %s283_s9, 4294965248  ;;  %v3339_v0 = vld [vmem:[#allocation6 + $0x80] sm:$0xff]  ;;  %v3341_v1 = vld [vmem:[#allocation6 + $0x88] sm:$0xff]  ;;  %s2501_s27 = sshll.u32 %s3112_s21, 7  ;;  %s4556_s17 = scalar_lea.vmem [#allocation11], %s3329_s26 }
  0x60   : > { %v3343_v2 = vld [vmem:[#allocation6] sm:$0xff]  ;;  %v395_v3 = vmul.f32 %v3339_v0, %v3339_v0  ;;  %v396_v4 = vmul.f32 %v3341_v1, %v3341_v1  ;;  %v3349_v5 = vld [vmem:[#allocation6 + $0x8] sm:$0xff]  ;;  %v3353_v7 = vld [vmem:[#allocation6 + $0x90] sm:$0xff]  ;;  %s996_s12 = sadd.s32 128, %s2501_s27  ;;  %s4591_s9 = scalar_lea.vmem [#allocation14], %s3329_s26 }
  0x61   : > { %v379_v6 = vmul.f32 %v3343_v2, %v3343_v2  ;;  %v3355_v8 = vld [vmem:[#allocation6 + $0x98] sm:$0xff]  ;;  %v380_v9 = vmul.f32 %v3349_v5, %v3349_v5  ;;  %v397_v10 = vmul.f32 %v3353_v7, %v3353_v7  ;;  %v3363_v12 = vld [vmem:[#allocation6 + $0x10] sm:$0xff]  ;;  %v3375_v19 = vld [vmem:[#allocation6 + $0x20] sm:$0xff]  ;;  %s2235_s14 = scalar_lea.sflag [#allocation8], %s3326_s16  ;;  %p5154_p13 = scmp.ne.s32.totalorder %s4936_s28, 0 }
  0x62   : > { %v398_v11 = vmul.f32 %v3355_v8, %v3355_v8  ;;  %v3365_v13 = vld [vmem:[#allocation6 + $0x18] sm:$0xff]  ;;  %v3367_v14 = vld [vmem:[#allocation6 + $0x30] sm:$0xff]  ;;  %v435_v15 = vadd.f32 %v396_v4, %v395_v3  ;;  %v381_v16 = vmul.f32 %v3363_v12, %v3363_v12  ;;  %v3377_v20 = vld [vmem:[#allocation6 + $0x28] sm:$0xff]  ;;  %v383_v26 = vmul.f32 %v3375_v19, %v3375_v19  ;;  %s3132_s15 = smov [#allocation11]  }
  0x63   : > { %v382_v17 = vmul.f32 %v3365_v13, %v3365_v13  ;;  %v3373_v18 = vld [vmem:[#allocation6 + $0x38] sm:$0xff]  ;;  %v411_v21 = vadd.f32 %v380_v9, %v379_v6  ;;  %v385_v23 = vmul.f32 %v3367_v14, %v3367_v14  ;;  %v384_v27 = vmul.f32 %v3377_v20, %v3377_v20  ;;  %v3387_v28 = vld [vmem:[#allocation6 + $0xb0] sm:$0xff]  ;;  %v3391_v30 = vld [vmem:[#allocation6 + $0xa0] sm:$0xff]  ;;  %s2978_s7 = sshll.u32 %s3132_s15, 4  ;;  %s2979_s7 = int_to_ptr.vmem [resolvable:$false] %s2978_s7 }
  0x64   : > { %436 = vadd.xlane.f32.xlu1 %v435_v15  ;;  %v438_v22 = vadd.f32 %v398_v11, %v397_v10  ;;  %v386_v24 = vmul.f32 %v3373_v18, %v3373_v18  ;;  %v3389_v29 = vld [vmem:[#allocation6 + $0xb8] sm:$0xff]  ;;  %v3393_v31 = vld [vmem:[#allocation6 + $0xa8] sm:$0xff]  ;;  %v401_v33 = vmul.f32 %v3387_v28, %v3387_v28  ;;  %v3399_v35 = vld [vmem:[#allocation6 + $0x50] sm:$0xff]  ;;  %v399_v38 = vmul.f32 %v3391_v30, %v3391_v30  ;;  %s2980_s23 = scalar_lea.vmem %s2979_s7, 4096 }
  0x65   : > { %412 = vadd.xlane.f32.xlu0 %v411_v21  ;;  %v414_v25 = vadd.f32 %v382_v17, %v381_v16  ;;  %v402_v34 = vmul.f32 %v3389_v29, %v3389_v29  ;;  %v3401_v36 = vld [vmem:[#allocation6 + $0x58] sm:$0xff]  ;;  %v417_v37 = vadd.f32 %v384_v27, %v383_v26  ;;  %v400_v39 = vmul.f32 %v3393_v31, %v3393_v31  ;;  %v3407_v40 = vld [vmem:[#allocation6 + $0x40] sm:$0xff]  ;;  %v3409_v41 = vld [vmem:[#allocation6 + $0x48] sm:$0xff] }
  0x66   : > { %v420_v32 = vadd.f32 %v386_v24, %v385_v23  ;;  %v2707_v42 = vld [vmem:[%s3333_s8 + $0x40] sm:$0xff]   ;;  %v3412_v43 = vld [vmem:[#allocation6 + $0xd0] sm:$0xff]  ;;  %v3414_v44 = vld [vmem:[#allocation6 + $0xd8] sm:$0xff]  ;;  %v389_v47 = vmul.f32 %v3399_v35, %v3399_v35  ;;  %v390_v48 = vmul.f32 %v3401_v36, %v3401_v36  ;;  %v387_v52 = vmul.f32 %v3407_v40, %v3407_v40 }
  0x67   : > { %v2708_v45 = vld [vmem:[%s3333_s8] sm:$0xff]   ;;  %v444_v46 = vadd.f32 %v402_v34, %v401_v33  ;;  %2532 = vmatprep.subr.bf16.mxu0 %v2707_v42  ;;  %v2709_v50 = vld [vmem:[%s3333_s8 + $0x48] sm:$0xff]   ;;  %v441_v51 = vadd.f32 %v400_v39, %v399_v38  ;;  %v388_v53 = vmul.f32 %v3409_v41, %v3409_v41  ;;  %2596 = vmatprep.subr.bf16.mxu1 %v2707_v42  ;;  %v3431_v56 = vld [vmem:[#allocation6 + $0x70] sm:$0xff] }
  0x68   : > { %439 = vadd.xlane.f32.xlu1 %v438_v22  ;;  %v3421_v49 = vld [vmem:[#allocation6 + $0xc0] sm:$0xff]  ;;  %v3428_v54 = vld [vmem:[#allocation6 + $0xc8] sm:$0xff]  ;;  %2533 = vmatpush3.bf16.msra.mxu0 %v2708_v45  ;;  %v3433_v57 = vld [vmem:[#allocation6 + $0x78] sm:$0xff]  ;;  %v426_v59 = vadd.f32 %v390_v48, %v389_v47  ;;  %v405_v60 = vmul.f32 %v3412_v43, %v3412_v43  ;;  %v406_v61 = vmul.f32 %v3414_v44, %v3414_v44 }
  0x69   : > { %415 = vadd.xlane.f32.xlu0 %v414_v25  ;;  %2604 = vmatpush3.bf16.msra.mxu1 %v2708_v45  ;;  %v2710_v55 = vld [vmem:[%s3333_s8 + $0x8] sm:$0xff]   ;;  %v2711_v58 = vld [vmem:[%s3333_s8 + $0x50] sm:$0xff]   ;;  %v3440_v62 = vld [vmem:[#allocation6 + $0x60] sm:$0xff]  ;;  %v423_v4 = vadd.f32 %v388_v53, %v387_v52  ;;  %v403_v6 = vmul.f32 %v3421_v49, %v3421_v49  ;;  %v404_v9 = vmul.f32 %v3428_v54, %v3428_v54 }
  0x6a   : > { %2534 = vmatprep.subr.bf16.mxu0 %v2709_v50  ;;  %2597 = vmatprep.subr.bf16.mxu1 %v2709_v50  ;;  %v3442_v63 = vld [vmem:[#allocation6 + $0x68] sm:$0xff]  ;;  %v2712_v3 = vld [vmem:[%s3333_s8 + $0x10] sm:$0xff]   ;;  %v3451_v11 = vld [vmem:[#allocation6 + $0xf8] sm:$0xff]  ;;  %v450_v16 = vadd.f32 %v406_v61, %v405_v60  ;;  %v393_v17 = vmul.f32 %v3431_v56, %v3431_v56  ;;  %v394_v21 = vmul.f32 %v3433_v57, %v3433_v57  ;;  %v3487_v60 = vstv %s2501_s27 }
  0x6b   : > { %v3449_v10 = vld [vmem:[#allocation6 + $0xf0] sm:$0xff]  ;;  %v2713_v15 = vld [vmem:[%s3333_s8 + $0x58] sm:$0xff]   ;;  %v3458_v22 = vld [vmem:[#allocation6 + $0xe0] sm:$0xff]  ;;  %v447_v25 = vadd.f32 %v404_v9, %v403_v6  ;;  %v391_v26 = vmul.f32 %v3440_v62, %v3440_v62  ;;  %v392_v27 = vmul.f32 %v3442_v63, %v3442_v63 }
  0x6c   : > { %421 = vadd.xlane.f32.xlu1 %v420_v32  ;;  %2535 = vmatpush3.bf16.msra.mxu0 %v2710_v55  ;;  %v3460_v23 = vld [vmem:[#allocation6 + $0xe8] sm:$0xff]  ;;  %v2714_v24 = vld [vmem:[%s3333_s8 + $0x18] sm:$0xff]   ;;  %v2715_v32 = vld [vmem:[%s3333_s8 + $0x60] sm:$0xff]   ;;  %v432_v33 = vadd.f32 %v394_v21, %v393_v17  ;;  %v409_v34 = vmul.f32 %v3449_v10, %v3449_v10  ;;  %v407_v39 = vmul.f32 %v3458_v22, %v3458_v22  ;;  %v4946_v17 = vmov 0 }
  0x6d   : > { %418 = vadd.xlane.f32.xlu0 %v417_v37  ;;  %2605 = vmatpush3.bf16.msra.mxu1 %v2710_v55  ;;  %v410_v37 = vmul.f32 %v3451_v11, %v3451_v11  ;;  %v429_v38 = vadd.f32 %v392_v27, %v391_v26  ;;  %v408_v42 = vmul.f32 %v3460_v23, %v3460_v23  ;;  %v2716_v45 = vld [vmem:[%s3333_s8 + $0x20] sm:$0xff]   ;;  %v2718_v50 = vld [vmem:[%s3333_s8 + $0x28] sm:$0xff]   ;;  %v2720_v52 = vld [vmem:[%s3333_s8 + $0x30] sm:$0xff]  }
  0x6e   : > { %2536 = vmatprep.subr.bf16.mxu0 %v2711_v58  ;;  %2598 = vmatprep.subr.bf16.mxu1 %v2711_v58  ;;  %v2721_v53 = vld [vmem:[%s3333_s8 + $0x78] sm:$0xff]   ;;  %v849_v58 = vld [vmem:[%s4863_s2 + $0x8] sm:$0xff]  ;;  %v850_v61 = vld [vmem:[%s4863_s2 + $0x10] sm:$0xff] }
  0x6f   : > { %v456_v47 = vadd.f32 %v410_v37, %v409_v34  ;;  %v453_v48 = vadd.f32 %v408_v42, %v407_v39  ;;  %v2722_v55 = vld [vmem:[%s3333_s8 + $0x38] sm:$0xff]   ;;  %vm981_vm0 = vcmp.ge.s32.totalorder %v849_v58, %v3487_v60  ;;  %vm982_vm1 = vcmp.ge.s32.totalorder %v850_v61, %v3487_v60  ;;  %v852_v6 = vld [vmem:[%s4863_s2 + $0x20] sm:$0xff]  ;;  %v853_v9 = vld [vmem:[%s4863_s2 + $0x28] sm:$0xff] }
  0x70   : > { %445 = vadd.xlane.f32.xlu1 %v444_v46  ;;  %2537 = vmatpush3.bf16.msra.mxu0 %v2712_v3  ;;  %v2717_v46 = vld [vmem:[%s3333_s8 + $0x68] sm:$0xff]   ;;  %vm984_vm7 = vcmp.ge.s32.totalorder %v852_v6, %v3487_v60  ;;  %v855_v21 = vld [vmem:[%s4863_s2 + $0x38] sm:$0xff]  ;;  %vm985_vm11 = vcmp.ge.s32.totalorder %v853_v9, %v3487_v60  ;;  %v858_v26 = vld [vmem:[%s4863_s2 + $0x50] sm:$0xff]  ;;  %v4953_v37 = vmov 0 }
  0x71   : > { %442 = vadd.xlane.f32.xlu0 %v441_v51  ;;  %2606 = vmatpush3.bf16.msra.mxu1 %v2712_v3  ;;  %v2719_v51 = vld [vmem:[%s3333_s8 + $0x70] sm:$0xff]   ;;  %v3493_v3 = vstv %s996_s12  ;;  %v857_v27 = vld [vmem:[%s4863_s2 + $0x48] sm:$0xff]  ;;  %v859_v39 = vld [vmem:[%s4863_s2 + $0x58] sm:$0xff]  ;;  %s4700_s8 = sshll.u32 %s3112_s21, 11  ;;  %s2259_s12 = sshll.u32 %s4556_s17, 4  ;;  %s4711_s12 = int_to_ptr.vmem [resolvable:$true] %s2259_s12 }
  0x72   : > { %2538 = vmatprep.subr.bf16.mxu0 %v2713_v15  ;;  %2599 = vmatprep.subr.bf16.mxu1 %v2713_v15  ;;  %vm999_vm2 = vcmp.lt.s32.totalorder %v849_v58, %v3493_v3  ;;  %vm1000_vm3 = vcmp.lt.s32.totalorder %v850_v61, %v3493_v3  ;;  %v854_v15 = vld [vmem:[%s4863_s2 + $0x30] sm:$0xff]  ;;  %vm1002_vm8 = vcmp.lt.s32.totalorder %v852_v6, %v3493_v3  ;;  %v861_v42 = vld [vmem:[%s4863_s2 + $0x68] sm:$0xff]  ;;  %s4708_s6 = scalar_lea.hbm %s4864_s3, %s4700_s8  ;;  %s2974_s21 = scalar_lea.vmem %s4711_s12, 2048 }
  0x73   : > { %vm3515_vm6 = vmand %vm981_vm0, %vm999_vm2  ;;  %vm1003_vm9 = vcmp.lt.s32.totalorder %v853_v9, %v3493_v3  ;;  %vm1004_vm12 = vcmp.lt.s32.totalorder %v854_v15, %v3493_v3  ;;  %vm1005_vm13 = vcmp.lt.s32.totalorder %v855_v21, %v3493_v3  ;;  %vm986_vm15 = vcmp.ge.s32.totalorder %v854_v15, %v3487_v60  ;;  %v3560_v34 = vld [vmem:[%s4863_s2 + $0x70] sm:$0xff]  ;;  %p2975_p11 = scmp.ne.s32.totalorder %s4711_s12, %s2974_s21  ;;  %p2981_p3 = scmp.lt.s32.totalorder %s4711_s12, %s2979_s7 }
  0x74   : > { %427 = vadd.xlane.f32.xlu1 %v426_v59  ;;  %2539 = vmatpush3.bf16.msra.mxu0 %v2714_v24  ;;  %v3129_v59 = vmov 0   ;;  %v4947_v17 = vsel %vm3515_vm6, 4294967295, %v4946_v17  ;;  %vm3530_vm10 = vmand %vm982_vm1, %vm1000_vm3  ;;  %vm987_vm3 = vcmp.ge.s32.totalorder %v855_v21, %v3487_v60  ;;  %p2982_p6 = scmp.lt.s32.totalorder %s2980_s23, %s2974_s21 }
  0x75   : > { %424 = vadd.xlane.f32.xlu0 %v423_v4  ;;  %2607 = vmatpush3.bf16.msra.mxu1 %v2714_v24  ;;  %v851_v4 = vld [vmem:[%s4863_s2 + $0x18] sm:$0xff]  ;;  %4948 = vst [vmem:[#allocation20_spill] sm:$0xff] %v4947_v17  ;;  %v856_v24 = vld [vmem:[%s4863_s2 + $0x40] sm:$0xff]  ;;  %vm3566_vm2 = vmand %vm984_vm7, %vm1002_vm8  ;;  %p2976_p4 = pnand %p2975_p11, %p5154_p13 }
  0x76   : > { %2540 = vmatprep.subr.bf16.mxu0 %v2715_v32  ;;  %2600 = vmatprep.subr.bf16.mxu1 %v2715_v32  ;;  %vm983_vm4 = vcmp.ge.s32.totalorder %v851_v4, %v3487_v60  ;;  %vm1001_vm5 = vcmp.lt.s32.totalorder %v851_v4, %v3493_v3  ;;  %v4954_v37 = vsel %vm3566_vm2, 4294967295, %v4953_v37  ;;  %vm3578_vm1 = vmand %vm985_vm11, %vm1003_vm9  ;;  %vm988_vm7 = vcmp.ge.s32.totalorder %v856_v24, %v3487_v60  ;;  %p2983_p8 = por %p2982_p6, %p2981_p3 }
  0x77   : > { %2706 = vset.pattern.permute.xlu1 %v3129_v59  ;;  %2705 = vset.pattern.permute.xlu0 %v3129_v59  ;;  %vm3547_vm14 = vmand %vm983_vm4, %vm1001_vm5  ;;  %vm990_vm11 = vcmp.ge.s32.totalorder %v858_v26, %v3487_v60  ;;  %vm4964_vm0 = vcmp.lt.s32.totalorder %v856_v24, %v3493_v3  ;;  %p2977_p1 = pneg %p2976_p4 }
  0x78   : > { %451 = vadd.xlane.f32.xlu1 %v450_v16  ;;  %2541 = vmatpush3.bf16.msra.mxu0 %v2716_v45  ;;  %v848_v16 = vld [vmem:[%s4863_s2] sm:$0xff]  ;;  %vm3595_vm9 = vmand %vm986_vm15, %vm1004_vm12 }
  0x79   : > { %448 = vadd.xlane.f32.xlu0 %v447_v25  ;;  %2608 = vmatpush3.bf16.msra.mxu1 %v2716_v45  ;;  %v4958_v45 = vmov 0  ;;  %vm3611_vm12 = vmand %vm987_vm3, %vm1005_vm13  ;;  %vm980_vm4 = vcmp.ge.s32.totalorder %v848_v16, %v3487_v60  ;;  %vm4968_vm13 = vcmp.lt.s32.totalorder %v858_v26, %v3493_v3  ;;  %p2984_p0 = pnand %p2983_p8, %p2977_p1 }
  0x7a   : > { %2542 = vmatprep.subr.bf16.mxu0 %v2717_v46  ;;  %2601 = vmatprep.subr.bf16.mxu1 %v2717_v46  ;;  %v4959_v45 = vsel %vm3595_vm9, 4294967295, %v4958_v45  ;;  %v3605_v46 = vld [vmem:[%s4863_s2 + $0x78] sm:$0xff]  ;;  %vm3622_vm8 = vmand %vm988_vm7, %vm4964_vm0  ;;  %vm991_vm0 = vcmp.ge.s32.totalorder %v859_v39, %v3487_v60  ;;  %vm4975_vm7 = vcmp.lt.s32.totalorder %v848_v16, %v3493_v3 }
  0x7b   : > { %4960 = vst [vmem:[#allocation22_spill] sm:$0xff] %v4959_v45  ;;  %vm3629_vm3 = vmand %vm990_vm11, %vm4968_vm13  ;;  %vm993_vm11 = vcmp.ge.s32.totalorder %v861_v42, %v3487_v60  ;;  %vm4979_vm13 = vcmp.lt.s32.totalorder %v857_v27, %v3493_v3 }
  0x7c   : > { %433 = vadd.xlane.f32.xlu1 %v432_v33  ;;  %2543 = vmatpush3.bf16.msra.mxu0 %v2718_v50  ;;  %v860_v33 = vld [vmem:[%s4863_s2 + $0x60] sm:$0xff] }
  0x7d   : > { %430 = vadd.xlane.f32.xlu0 %v429_v38  ;;  %2609 = vmatpush3.bf16.msra.mxu1 %v2718_v50  ;;  %v4955_v38 = vmov 0  ;;  %vm992_vm15 = vcmp.ge.s32.totalorder %v860_v33, %v3487_v60  ;;  %vm4971_vm5 = vcmp.lt.s32.totalorder %v860_v33, %v3493_v3 }
  0x7e   : > { %2544 = vmatprep.subr.bf16.mxu0 %v2719_v51  ;;  %2602 = vmatprep.subr.bf16.mxu1 %v2719_v51  ;;  %v4956_v38 = vsel %vm3578_vm1, 4294967295, %v4955_v38  ;;  %vm3636_vm9 = vmand %vm992_vm15, %vm4971_vm5  ;;  %v4972_v51 = vmov 0  ;;  %vm4983_vm5 = vcmp.lt.s32.totalorder %v859_v39, %v3493_v3 }
  0x7f   : > { %4957 = vst [vmem:[#allocation21_spill] sm:$0xff] %v4956_v38  ;;  %v4973_v51 = vsel %vm3636_vm9, 4294967295, %v4972_v51  ;;  %vm3643_vm1 = vmand %vm980_vm4, %vm4975_vm7  ;;  %vm4986_vm4 = vcmp.lt.s32.totalorder %v861_v42, %v3493_v3 }
  0x80   : > { %457 = vadd.xlane.f32.xlu1 %v456_v47  ;;  %2545 = vmatpush3.bf16.msra.mxu0 %v2720_v52  ;;  %v4961_v47 = vmov 0  ;;  %4974 = vst [vmem:[#allocation25_spill] sm:$0xff] %v4973_v51  ;;  %vm3656_vm15 = vmand %vm991_vm0, %vm4983_vm5 }
  0x81   : > { %454 = vadd.xlane.f32.xlu0 %v453_v48  ;;  %2610 = vmatpush3.bf16.msra.mxu1 %v2720_v52  ;;  %v4962_v47 = vsel %vm3611_vm12, 4294967295, %v4961_v47  ;;  %v4965_v48 = vmov 0  ;;  %vm989_vm12 = vcmp.ge.s32.totalorder %v857_v27, %v3487_v60  ;;  %v4976_v52 = vmov 0  ;;  %vm3662_vm7 = vmand %vm993_vm11, %vm4986_vm4 }
  0x82   : > { %2546 = vmatprep.subr.bf16.mxu0 %v2721_v53  ;;  %2603 = vmatprep.subr.bf16.mxu1 %v2721_v53  ;;  %4963 = vst [vmem:[#allocation23_spill] sm:$0xff] %v4962_v47  ;;  %v4966_v48 = vsel %vm3622_vm8, 4294967295, %v4965_v48  ;;  %v4977_v52 = vsel %vm3643_vm1, 4294967295, %v4976_v52  ;;  %vm3650_vm2 = vmand %vm989_vm12, %vm4979_vm13  ;;  %v4980_v53 = vmov 0  ;;  %vm4902_vm12 = vcmask 7168  }
  0x83   : > { %4967 = vst [vmem:[#allocation24_spill] sm:$0xff] %v4966_v48  ;;  %4978 = vst [vmem:[#allocation26_spill] sm:$0xff] %v4977_v52  ;;  %v4981_v53 = vsel %vm3650_vm2, 4294967295, %v4980_v53 }
  0x84   : > { %2547 = vmatpush3.bf16.msra.mxu0 %v2722_v55  ;;  %4982 = vst [vmem:[#allocation27_spill] sm:$0xff] %v4981_v53 }
  0x85   : > { %2611 = vmatpush3.bf16.msra.mxu1 %v2722_v55 }
  0x91   : > { %872 = vperm.xlu1 %2706, %v849_v58   ;;  %v4987_v58 = vmov 0 }
  0x92   : > { %v4988_v58 = vsel %vm3662_vm7, 4294967295, %v4987_v58 }
  0x93   : > { %4989 = vst [vmem:[#allocation28_spill] sm:$0xff] %v4988_v58 }
  0x95   : > { %875 = vperm.xlu1 %2706, %v850_v61  }
  0x97   : > { %869 = vperm.xlu0 %2705, %v848_v16  }
  0x99   : > { %878 = vperm.xlu1 %2706, %v851_v4  }
  0x9b   : > { %896 = vperm.xlu0 %2705, %v857_v27  }
  0x9d   : > { %881 = vperm.xlu1 %2706, %v852_v6  }
  0x9f   : > { %902 = vperm.xlu0 %2705, %v859_v39  }
  0xa1   : > { %884 = vperm.xlu1 %2706, %v853_v9  }
  0xa3   : > { %908 = vperm.xlu0 %2705, %v861_v42  }
  0xa5   : > { %887 = vperm.xlu1 %2706, %v854_v15  }
  0xa7   : > { %914 = vperm.xlu0 %2705, %v3605_v46  }
  0xa9   : > { %890 = vperm.xlu1 %2706, %v855_v21  }
  0xad   : > { %893 = vperm.xlu1 %2706, %v856_v24  }
  0xb1   : > { %899 = vperm.xlu1 %2706, %v858_v26  }
  0xb5   : > { %905 = vperm.xlu1 %2706, %v860_v33  }
  0xb9   : > { %911 = vperm.xlu1 %2706, %v3560_v34  }
  0xf1   : > { %v437_v59 = vpop.xlane.xlu1 %436 }
  0xf2   : > { %v467_v61 = vmax.f32 %v437_v59, 1e-24  ;;  %v413_v4 = vpop.xlane.xlu0 %412 }
  0xf3   : > { %v459_v6 = vmax.f32 %v413_v4, 1e-24 }
  0xf4   : > { %2723 = vrsqrt.f32 %v467_v61 }
  0xf5   : > { %v440_v16 = vpop.xlane.xlu1 %439  ;;  %2725 = vrsqrt.f32 %v459_v6 }
  0xf6   : > { %v468_v27 = vmax.f32 %v440_v16, 1e-24  ;;  %v416_v39 = vpop.xlane.xlu0 %415 }
  0xf7   : > { %v460_v42 = vmax.f32 %v416_v39, 1e-24 }
  0xf8   : > { %2727 = vrsqrt.f32 %v468_v27 }
  0xf9   : > { %2729 = vrsqrt.f32 %v460_v42  ;;  %v422_v9 = vpop.xlane.xlu1 %421 }
  0xfa   : > { %v462_v15 = vmax.f32 %v422_v9, 1e-24  ;;  %v419_v21 = vpop.xlane.xlu0 %418 }
  0xfb   : > { %v461_v24 = vmax.f32 %v419_v21, 1e-24 }
  0xfc   : > { %2731 = vrsqrt.f32 %v462_v15 }
  0xfd   : > { %2733 = vrsqrt.f32 %v461_v24  ;;  %v446_v26 = vpop.xlane.xlu1 %445 }
  0xfe   : > { %v2724_v33 = vpop.eup %2723  ;;  %v470_v47 = vmax.f32 %v446_v26, 1e-24  ;;  %v443_v59 = vpop.xlane.xlu0 %442 }
  0xff   : > { %v469_v45 = vmax.f32 %v443_v59, 1e-24  ;;  %v2726_v4 = vpop.eup %2725  ;;  %v508_v6 = vmul.f32 %v2724_v33, %v3341_v1  ;;  %v507_v16 = vmul.f32 %v2724_v33, %v3339_v0 }
 0x100   : > { %2735 = vrsqrt.f32 %v470_v47  ;;  %v492_v15 = vmul.f32 %v2726_v4, %v3349_v5 }
 0x101   : > { %2737 = vrsqrt.f32 %v469_v45  ;;  %v428_v61 = vpop.xlane.xlu1 %427  ;;  %v491_v45 = vmul.f32 %v2726_v4, %v3343_v2 }
 0x102   : > { %v2728_v27 = vpop.eup %2727  ;;  %v464_v39 = vmax.f32 %v428_v61, 1e-24  ;;  %v425_v42 = vpop.xlane.xlu0 %424 }
 0x103   : > { %v2730_v9 = vpop.eup %2729  ;;  %v463_v21 = vmax.f32 %v425_v42, 1e-24  ;;  %v510_v24 = vmul.f32 %v2728_v27, %v3355_v8  ;;  %v509_v26 = vmul.f32 %v2728_v27, %v3353_v7 }
 0x104   : > { %2739 = vrsqrt.f32 %v464_v39  ;;  %v494_v47 = vmul.f32 %v2730_v9, %v3365_v13  ;;  %v493_v1 = vmul.f32 %v2730_v9, %v3363_v12 }
 0x105   : > { %2741 = vrsqrt.f32 %v463_v21  ;;  %v452_v0 = vpop.xlane.xlu1 %451  ;;  %v532_v33 = vpack.c.bf16 %v510_v24, %v508_v6  ;;  %v531_v59 = vpack.c.bf16 %v509_v26, %v507_v16 }
 0x106   : > { %v2732_v61 = vpop.eup %2731  ;;  %v472_v58 = vmax.f32 %v452_v0, 1e-24  ;;  %v449_v42 = vpop.xlane.xlu0 %448  ;;  %v524_v51 = vpack.c.bf16 %v494_v47, %v492_v15  ;;  %v523_v5 = vpack.c.bf16 %v493_v1, %v491_v45 }
 0x107   : > { %v2734_v38 = vpop.eup %2733  ;;  %v471_v8 = vmax.f32 %v449_v42, 1e-24  ;;  %812 = vmatprep.mubr.bf16.mxu1 %v532_v33  ;;  %v498_v7 = vmul.f32 %v2732_v61, %v3373_v18  ;;  %v497_v4 = vmul.f32 %v2732_v61, %v3367_v14 }
 0x108   : > { %2743 = vrsqrt.f32 %v472_v58  ;;  %780 = vmatprep.mubr.bf16.mxu0 %v524_v51  ;;  %813 = vmatmul.mubr.bf16.vlgmr.msra.gmra.mrb[0].mxu1 %v531_v59  ;;  %v496_v2 = vmul.f32 %v2734_v38, %v3377_v20  ;;  %v495_v13 = vmul.f32 %v2734_v38, %v3375_v19 }
 0x109   : > { %2745 = vrsqrt.f32 %v471_v8  ;;  %781 = vmatmul.mubr.bf16.vlgmr.msra.gmra.mrb[0].mxu0 %v523_v5  ;;  %v434_v12 = vpop.xlane.xlu1 %433 }
 0x10a   : > { %v2736_v6 = vpop.eup %2735  ;;  %v466_v16 = vmax.f32 %v434_v12, 1e-24  ;;  %v431_v27 = vpop.xlane.xlu0 %430  ;;  %v526_v39 = vpack.c.bf16 %v498_v7, %v496_v2  ;;  %v525_v38 = vpack.c.bf16 %v497_v4, %v495_v13 }
 0x10b   : > { %v2738_v9 = vpop.eup %2737  ;;  %v465_v21 = vmax.f32 %v431_v27, 1e-24  ;;  %v514_v18 = vmul.f32 %v2736_v6, %v3389_v29  ;;  %v513_v51 = vmul.f32 %v2736_v6, %v3387_v28 }
 0x10c   : > { %2747 = vrsqrt.f32 %v466_v16  ;;  %788 = vmatprep.mubr.bf16.mxu0 %v526_v39  ;;  %v512_v20 = vmul.f32 %v2738_v9, %v3393_v31  ;;  %v511_v58 = vmul.f32 %v2738_v9, %v3391_v30  ;;  %v864_v9 = vlaneseq }
 0x10d   : > { %2749 = vrsqrt.f32 %v465_v21  ;;  %v458_v19 = vpop.xlane.xlu1 %457 }
 0x10e   : > { %v2740_v14 = vpop.eup %2739  ;;  %v474_v15 = vmax.f32 %v458_v19, 1e-24  ;;  %v455_v24 = vpop.xlane.xlu0 %454  ;;  %v534_v26 = vpack.c.bf16 %v514_v18, %v512_v20  ;;  %v533_v47 = vpack.c.bf16 %v513_v51, %v511_v58  ;;  %v865_v18 = vand.u32 127, %v864_v9 }
 0x10f   : > { %v2742_v45 = vpop.eup %2741  ;;  %v473_v1 = vmax.f32 %v455_v24, 1e-24  ;;  %v502_v29 = vmul.f32 %v2740_v14, %v3401_v36  ;;  %v501_v31 = vmul.f32 %v2740_v14, %v3399_v35 }
 0x110   : > { %2751 = vrsqrt.f32 %v474_v15  ;;  %820 = vmatprep.mubr.bf16.mxu1 %v534_v26  ;;  %v500_v28 = vmul.f32 %v2742_v45, %v3409_v41  ;;  %v499_v30 = vmul.f32 %v2742_v45, %v3407_v40  ;;  %v3729_v19 = vadd.s32 %v3487_v60, %v865_v18 }
 0x111   : > { %2753 = vrsqrt.f32 %v473_v1  ;;  %789 = vmatmul.mubr.bf16.gmra.mrb[4].mxu0 %v525_v38  ;;  %821 = vmatmul.mubr.bf16.gmra.mrb[4].mxu1 %v533_v47 }
 0x112   : > { %v2744_v0 = vpop.eup %2743  ;;  %v528_v33 = vpack.c.bf16 %v502_v29, %v500_v28  ;;  %v527_v41 = vpack.c.bf16 %v501_v31, %v499_v30 }
 0x113   : > { %v2746_v59 = vpop.eup %2745  ;;  %v518_v61 = vmul.f32 %v2744_v0, %v3414_v44  ;;  %v517_v42 = vmul.f32 %v2744_v0, %v3412_v43 }
 0x114   : > { %796 = vmatprep.mubr.bf16.mxu0 %v528_v33  ;;  %v516_v36 = vmul.f32 %v2746_v59, %v3428_v54  ;;  %v515_v5 = vmul.f32 %v2746_v59, %v3421_v49 }
 0x116   : > { %v2748_v8 = vpop.eup %2747  ;;  %v536_v7 = vpack.c.bf16 %v518_v61, %v516_v36  ;;  %v535_v2 = vpack.c.bf16 %v517_v42, %v515_v5  ;;  %v870_v51 = vpop.permute.xlu0 %869 }
 0x117   : > { %v2750_v12 = vpop.eup %2749  ;;  %v506_v40 = vmul.f32 %v2748_v8, %v3433_v57  ;;  %v505_v43 = vmul.f32 %v2748_v8, %v3431_v56  ;;  %v3130_v56 = vmov -1e+30   ;;  %vm916_vm0 = vcmp.eq.s32.totalorder %v3729_v19, %v870_v51 }
 0x118   : > { %828 = vmatprep.mubr.bf16.mxu1 %v536_v7  ;;  %v504_v35 = vmul.f32 %v2750_v12, %v3442_v63  ;;  %v503_v44 = vmul.f32 %v2750_v12, %v3440_v62  ;;  %556 = vst.msk [vmem:[#allocation3] sm:$0xff] %vm4902_vm12, %v3130_v56  ;;  %557 = vst.msk [vmem:[#allocation3 + $0x8] sm:$0xff] %vm4902_vm12, %v3130_v56  ;;  %v873_v62 = vpop.permute.xlu1 %872 }
 0x119   : > { %797 = vmatmul.mubr.bf16.gmra.mrb[8].mxu0 %v527_v41  ;;  %829 = vmatmul.mubr.bf16.gmra.mrb[8].mxu1 %v535_v2  ;;  %558 = vst.msk [vmem:[#allocation3 + $0x10] sm:$0xff] %vm4902_vm12, %v3130_v56  ;;  %559 = vst.msk [vmem:[#allocation3 + $0x18] sm:$0xff] %vm4902_vm12, %v3130_v56  ;;  %vm917_vm13 = vcmp.eq.s32.totalorder %v3729_v19, %v873_v62 }
 0x11a   : > { %v2752_v13 = vpop.eup %2751  ;;  %v530_v54 = vpack.c.bf16 %v506_v40, %v504_v35  ;;  %v529_v27 = vpack.c.bf16 %v505_v43, %v503_v44  ;;  %560 = vst.msk [vmem:[#allocation3 + $0x20] sm:$0xff] %vm4902_vm12, %v3130_v56  ;;  %561 = vst.msk [vmem:[#allocation3 + $0x28] sm:$0xff] %vm4902_vm12, %v3130_v56  ;;  %v897_v44 = vpop.permute.xlu0 %896 }
 0x11b   : > { %v2754_v4 = vpop.eup %2753  ;;  %v522_v49 = vmul.f32 %v2752_v13, %v3451_v11  ;;  %v521_v6 = vmul.f32 %v2752_v13, %v3449_v10  ;;  %562 = vst.msk [vmem:[#allocation3 + $0x30] sm:$0xff] %vm4902_vm12, %v3130_v56  ;;  %563 = vst.msk [vmem:[#allocation3 + $0x38] sm:$0xff] %vm4902_vm12, %v3130_v56  ;;  %vm925_vm5 = vcmp.eq.s32.totalorder %v3729_v19, %v897_v44 }
 0x11c   : > { %804 = vmatprep.mubr.bf16.mxu0 %v530_v54  ;;  %v520_v16 = vmul.f32 %v2754_v4, %v3460_v23  ;;  %v519_v57 = vmul.f32 %v2754_v4, %v3458_v22  ;;  %564 = vst.msk [vmem:[#allocation3 + $0x40] sm:$0xff] %vm4902_vm12, %v3130_v56  ;;  %565 = vst.msk [vmem:[#allocation3 + $0x48] sm:$0xff] %vm4902_vm12, %v3130_v56  ;;  %v3716_v10 = vpop.permute.xlu1 %875 }
 0x11d   : > { %566 = vst.msk [vmem:[#allocation3 + $0x50] sm:$0xff] %vm4902_vm12, %v3130_v56  ;;  %567 = vst.msk [vmem:[#allocation3 + $0x58] sm:$0xff] %vm4902_vm12, %v3130_v56  ;;  %vm918_vm4 = vcmp.eq.s32.totalorder %v3729_v19, %v3716_v10 }
 0x11e   : > { %v538_v63 = vpack.c.bf16 %v522_v49, %v520_v16  ;;  %v537_v39 = vpack.c.bf16 %v521_v6, %v519_v57  ;;  %568 = vst.msk [vmem:[#allocation3 + $0x60] sm:$0xff] %vm4902_vm12, %v3130_v56  ;;  %569 = vst.msk [vmem:[#allocation3 + $0x68] sm:$0xff] %vm4902_vm12, %v3130_v56 }
 0x11f   : > { %570 = vst.msk [vmem:[#allocation3 + $0x70] sm:$0xff] %vm4902_vm12, %v3130_v56  ;;  %571 = vst.msk [vmem:[#allocation3 + $0x78] sm:$0xff] %vm4902_vm12, %v3130_v56 }
 0x120   : > { %836 = vmatprep.mubr.bf16.mxu1 %v538_v63  ;;  %v3718_v11 = vpop.permute.xlu1 %878 }
 0x121   : > { %805 = vmatmul.mubr.bf16.gmra.mrb[12].mxu0 %v529_v27  ;;  %837 = vmatmul.mubr.bf16.gmra.mrb[12].mxu1 %v537_v39 }
 0x124   : > { %v3720_v22 = vpop.permute.xlu1 %881 }
 0x128   : > { %v3722_v23 = vpop.permute.xlu1 %884 }
 0x12c   : > { %v3724_v21 = vpop.permute.xlu1 %887 }
 0x130   : > { %v3726_v20 = vpop.permute.xlu1 %890 }
 0x134   : > { %v894_v0 = vpop.permute.xlu1 %893 }
 0x135   : > { %vm924_vm11 = vcmp.eq.s32.totalorder %v3729_v19, %v894_v0  ;;  %v3131_v0 = vmov 0.0  }
 0x136   : > { %588 = vst.msk [vmem:[#allocation5] sm:$0xff] %vm4902_vm12, %v3131_v0  ;;  %572 = vst.msk [vmem:[#allocation4] sm:$0xff] %vm4902_vm12, %v3131_v0 }
 0x137   : > { %573 = vst.msk [vmem:[#allocation4 + $0x8] sm:$0xff] %vm4902_vm12, %v3131_v0  ;;  %574 = vst.msk [vmem:[#allocation4 + $0x10] sm:$0xff] %vm4902_vm12, %v3131_v0 }
 0x138   : > { %575 = vst.msk [vmem:[#allocation4 + $0x18] sm:$0xff] %vm4902_vm12, %v3131_v0  ;;  %576 = vst.msk [vmem:[#allocation4 + $0x20] sm:$0xff] %vm4902_vm12, %v3131_v0 }
 0x139   : > { %577 = vst.msk [vmem:[#allocation4 + $0x28] sm:$0xff] %vm4902_vm12, %v3131_v0  ;;  %578 = vst.msk [vmem:[#allocation4 + $0x30] sm:$0xff] %vm4902_vm12, %v3131_v0 }
 0x13a   : > { %579 = vst.msk [vmem:[#allocation4 + $0x38] sm:$0xff] %vm4902_vm12, %v3131_v0  ;;  %580 = vst.msk [vmem:[#allocation4 + $0x40] sm:$0xff] %vm4902_vm12, %v3131_v0 }
 0x13b   : > { %581 = vst.msk [vmem:[#allocation4 + $0x48] sm:$0xff] %vm4902_vm12, %v3131_v0  ;;  %582 = vst.msk [vmem:[#allocation4 + $0x50] sm:$0xff] %vm4902_vm12, %v3131_v0 }
 0x13c   : > { %583 = vst.msk [vmem:[#allocation4 + $0x58] sm:$0xff] %vm4902_vm12, %v3131_v0  ;;  %584 = vst.msk [vmem:[#allocation4 + $0x60] sm:$0xff] %vm4902_vm12, %v3131_v0 }
 0x13d   : > { %585 = vst.msk [vmem:[#allocation4 + $0x68] sm:$0xff] %vm4902_vm12, %v3131_v0  ;;  %586 = vst.msk [vmem:[#allocation4 + $0x70] sm:$0xff] %vm4902_vm12, %v3131_v0 }
 0x13e   : > { %587 = vst.msk [vmem:[#allocation4 + $0x78] sm:$0xff] %vm4902_vm12, %v3131_v0  ;;  %589 = vst.msk [vmem:[#allocation5 + $0x8] sm:$0xff] %vm4902_vm12, %v3131_v0 }
 0x13f   : > { %590 = vst.msk [vmem:[#allocation5 + $0x10] sm:$0xff] %vm4902_vm12, %v3131_v0  ;;  %591 = vst.msk [vmem:[#allocation5 + $0x18] sm:$0xff] %vm4902_vm12, %v3131_v0 }
 0x140   : > { %592 = vst.msk [vmem:[#allocation5 + $0x20] sm:$0xff] %vm4902_vm12, %v3131_v0  ;;  %593 = vst.msk [vmem:[#allocation5 + $0x28] sm:$0xff] %vm4902_vm12, %v3131_v0 }
 0x141   : > { %594 = vst.msk [vmem:[#allocation5 + $0x30] sm:$0xff] %vm4902_vm12, %v3131_v0  ;;  %595 = vst.msk [vmem:[#allocation5 + $0x38] sm:$0xff] %vm4902_vm12, %v3131_v0 }
 0x142   : > { %596 = vst.msk [vmem:[#allocation5 + $0x40] sm:$0xff] %vm4902_vm12, %v3131_v0  ;;  %597 = vst.msk [vmem:[#allocation5 + $0x48] sm:$0xff] %vm4902_vm12, %v3131_v0 }
 0x143   : > { %598 = vst.msk [vmem:[#allocation5 + $0x50] sm:$0xff] %vm4902_vm12, %v3131_v0  ;;  %599 = vst.msk [vmem:[#allocation5 + $0x58] sm:$0xff] %vm4902_vm12, %v3131_v0 }
 0x144   : > { %600 = vst.msk [vmem:[#allocation5 + $0x60] sm:$0xff] %vm4902_vm12, %v3131_v0  ;;  %601 = vst.msk [vmem:[#allocation5 + $0x68] sm:$0xff] %vm4902_vm12, %v3131_v0 }
 0x145   : > { %602 = vst.msk [vmem:[#allocation5 + $0x70] sm:$0xff] %vm4902_vm12, %v3131_v0  ;;  %603 = vst.msk [vmem:[#allocation5 + $0x78] sm:$0xff] %vm4902_vm12, %v3131_v0 }
 0x1db   : > { %v2572_v58 = vpop.f32.mrb[0].mxu1 }
 0x1dc   : > { %v2548_v38 = vpop.f32.mrb[0].mxu0  ;;  %v2573_v14 = vpop.f32.mrb[1].mxu1 }
 0x1dd   : > { %v2549_v15 = vpop.f32.mrb[1].mxu0  ;;  %v3731_v24 = vadd.f32 %v2573_v14, %v2572_v58  ;;  %v2575_v26 = vpop.f32.mrb[2].mxu1 }
 0x1de   : > { %v3734_v47 = vadd.f32 %v2549_v15, %v2548_v38  ;;  %v2551_v45 = vpop.f32.mrb[2].mxu0  ;;  %v2576_v1 = vpop.f32.mrb[3].mxu1 }
 0x1df   : > { %v2552_v29 = vpop.f32.mrb[3].mxu0  ;;  %v3736_v28 = vadd.f32 %v2576_v1, %v2575_v26  ;;  %v940_v12 = vsel %vm924_vm11, %v3731_v24, 0.0 }
 0x1e0   : > { %v3738_v30 = vadd.f32 %v2552_v29, %v2551_v45  ;;  %1046 = vmax.xlane.f32.xlu0 %v3734_v47  ;;  %v932_v31 = vsel %vm916_vm0, %v3734_v47, 0.0  ;;  %vm919_vm0 = vcmp.eq.s32.totalorder %v3729_v19, %v3718_v11 }
 0x1e1   : > { %948 = vadd.xlane.f32.xlu1 %v932_v31  ;;  %v941_v4 = vsel %vm925_vm5, %v3736_v28, 0.0  ;;  %vm920_vm5 = vcmp.eq.s32.totalorder %v3729_v19, %v3720_v22 }
 0x1e2   : > { %v933_v43 = vsel %vm917_vm13, %v3738_v30, 0.0 }
 0x1e4   : > { %1062 = vmax.xlane.f32.xlu0 %v3731_v24  ;;  %v2554_v33 = vpop.f32.mrb[4].mxu0  ;;  %v2578_v59 = vpop.f32.mrb[4].mxu1 }
 0x1e5   : > { %v2555_v61 = vpop.f32.mrb[5].mxu0  ;;  %v2579_v42 = vpop.f32.mrb[5].mxu1  ;;  %1048 = vmax.xlane.f32.xlu1 %v3738_v30 }
 0x1e6   : > { %v3744_v36 = vadd.f32 %v2555_v61, %v2554_v33  ;;  %v3746_v5 = vadd.f32 %v2579_v42, %v2578_v59  ;;  %v2557_v41 = vpop.f32.mrb[6].mxu0  ;;  %v2581_v8 = vpop.f32.mrb[6].mxu1 }
 0x1e7   : > { %v2558_v7 = vpop.f32.mrb[7].mxu0  ;;  %v2582_v2 = vpop.f32.mrb[7].mxu1 }
 0x1e8   : > { %4990 = vst [vmem:[#allocation29_spill] sm:$0xff] %v3744_v36  ;;  %4991 = vst [vmem:[#allocation30_spill] sm:$0xff] %v3746_v5  ;;  %v3750_v40 = vadd.f32 %v2558_v7, %v2557_v41  ;;  %v3752_v35 = vadd.f32 %v2582_v2, %v2581_v8  ;;  %964 = vadd.xlane.f32.xlu0 %v940_v12  ;;  %v934_v31 = vsel %vm918_vm4, %v3744_v36, 0.0  ;;  %v900_v61 = vpop.permute.xlu1 %899  ;;  %v903_v42 = vpop.permute.xlu0 %902 }
 0x1e9   : > { %1064 = vmax.xlane.f32.xlu1 %v3736_v28  ;;  %vm926_vm11 = vcmp.eq.s32.totalorder %v3729_v19, %v900_v61  ;;  %vm927_vm13 = vcmp.eq.s32.totalorder %v3729_v19, %v903_v42  ;;  %vm921_vm4 = vcmp.eq.s32.totalorder %v3729_v19, %v3722_v23 }
 0x1ea   : > { %4992 = vst [vmem:[#allocation31_spill] sm:$0xff] %v3750_v40  ;;  %4993 = vst [vmem:[#allocation32_spill] sm:$0xff] %v3752_v35  ;;  %v935_v59 = vsel %vm919_vm0, %v3750_v40, 0.0  ;;  %v942_v41 = vsel %vm926_vm11, %v3746_v5, 0.0  ;;  %v943_v8 = vsel %vm927_vm13, %v3752_v35, 0.0  ;;  %vm922_vm13 = vcmp.eq.s32.totalorder %v3729_v19, %v3724_v21 }
 0x1ec   : > { %950 = vadd.xlane.f32.xlu0 %v933_v43  ;;  %v2560_v13 = vpop.f32.mrb[8].mxu0  ;;  %v2584_v54 = vpop.f32.mrb[8].mxu1 }
 0x1ed   : > { %v2561_v49 = vpop.f32.mrb[9].mxu0  ;;  %v2585_v6 = vpop.f32.mrb[9].mxu1  ;;  %966 = vadd.xlane.f32.xlu1 %v941_v4 }
 0x1ee   : > { %v3759_v16 = vadd.f32 %v2561_v49, %v2560_v13  ;;  %v3761_v57 = vadd.f32 %v2585_v6, %v2584_v54  ;;  %v2563_v27 = vpop.f32.mrb[10].mxu0  ;;  %v2587_v63 = vpop.f32.mrb[10].mxu1  ;;  %v3852_v49 = vld [vmem:[#allocation3] sm:$0xff] }
 0x1ef   : > { %v2564_v39 = vpop.f32.mrb[11].mxu0  ;;  %v2588_v56 = vpop.f32.mrb[11].mxu1  ;;  %5002 = vst [vmem:[#allocation41_spill] sm:$0xff] %v3852_v49 }
 0x1f0   : > { %4994 = vst [vmem:[#allocation33_spill] sm:$0xff] %v3759_v16  ;;  %4995 = vst [vmem:[#allocation34_spill] sm:$0xff] %v3761_v57  ;;  %v3763_v62 = vadd.f32 %v2564_v39, %v2563_v27  ;;  %v3765_v9 = vadd.f32 %v2588_v56, %v2587_v63  ;;  %1050 = vmax.xlane.f32.xlu0 %v3744_v36  ;;  %v936_v11 = vsel %vm920_vm5, %v3759_v16, 0.0  ;;  %v906_v2 = vpop.permute.xlu1 %905  ;;  %v909_v12 = vpop.permute.xlu0 %908 }
 0x1f1   : > { %1052 = vmax.xlane.f32.xlu1 %v3750_v40  ;;  %vm928_vm0 = vcmp.eq.s32.totalorder %v3729_v19, %v906_v2  ;;  %vm929_vm11 = vcmp.eq.s32.totalorder %v3729_v19, %v909_v12  ;;  %vm923_vm5 = vcmp.eq.s32.totalorder %v3729_v19, %v3726_v20 }
 0x1f2   : > { %4996 = vst [vmem:[#allocation35_spill] sm:$0xff] %v3763_v62  ;;  %4997 = vst [vmem:[#allocation36_spill] sm:$0xff] %v3765_v9  ;;  %v937_v7 = vsel %vm921_vm4, %v3763_v62, 0.0  ;;  %v944_v44 = vsel %vm928_vm0, %v3761_v57, 0.0  ;;  %v945_v22 = vsel %vm929_vm11, %v3765_v9, 0.0 }
 0x1f4   : > { %1066 = vmax.xlane.f32.xlu0 %v3746_v5  ;;  %v2566_v18 = vpop.f32.mrb[12].mxu0  ;;  %v2590_v51 = vpop.f32.mrb[12].mxu1 }
 0x1f5   : > { %v2567_v58 = vpop.f32.mrb[13].mxu0  ;;  %v2591_v38 = vpop.f32.mrb[13].mxu1  ;;  %1068 = vmax.xlane.f32.xlu1 %v3752_v35 }
 0x1f6   : > { %v3771_v14 = vadd.f32 %v2567_v58, %v2566_v18  ;;  %v3773_v15 = vadd.f32 %v2591_v38, %v2590_v51  ;;  %v2569_v26 = vpop.f32.mrb[14].mxu0  ;;  %v2593_v45 = vpop.f32.mrb[14].mxu1  ;;  %v3861_v18 = vld [vmem:[#allocation3 + $0x40] sm:$0xff]  ;;  %v3867_v38 = vld [vmem:[#allocation3 + $0x8] sm:$0xff] }
 0x1f7   : > { %v2570_v1 = vpop.f32.mrb[15].mxu0  ;;  %v2594_v29 = vpop.f32.mrb[15].mxu1  ;;  %5004 = vst [vmem:[#allocation43_spill] sm:$0xff] %v3861_v18  ;;  %5005 = vst [vmem:[#allocation44_spill] sm:$0xff] %v3867_v38 }
 0x1f8   : > { %4998 = vst [vmem:[#allocation37_spill] sm:$0xff] %v3771_v14  ;;  %4999 = vst [vmem:[#allocation38_spill] sm:$0xff] %v3773_v15  ;;  %v3812_v10 = vadd.f32 %v2570_v1, %v2569_v26  ;;  %v3814_v33 = vadd.f32 %v2594_v29, %v2593_v45  ;;  %952 = vadd.xlane.f32.xlu0 %v934_v31  ;;  %v912_v23 = vpop.permute.xlu1 %911  ;;  %v938_v43 = vsel %vm922_vm13, %v3771_v14, 0.0  ;;  %v915_v13 = vpop.permute.xlu0 %914 }
 0x1f9   : > { %954 = vadd.xlane.f32.xlu1 %v935_v59  ;;  %vm930_vm4 = vcmp.eq.s32.totalorder %v3729_v19, %v912_v23  ;;  %vm931_vm0 = vcmp.eq.s32.totalorder %v3729_v19, %v915_v13 }
 0x1fa   : > { %5000 = vst [vmem:[#allocation39_spill] sm:$0xff] %v3812_v10  ;;  %5001 = vst [vmem:[#allocation40_spill] sm:$0xff] %v3814_v33  ;;  %v939_v54 = vsel %vm923_vm5, %v3812_v10, 0.0  ;;  %v946_v4 = vsel %vm930_vm4, %v3773_v15, 0.0  ;;  %v947_v21 = vsel %vm931_vm0, %v3814_v33, 0.0 }
 0x1fc   : > { %968 = vadd.xlane.f32.xlu0 %v942_v41 }
 0x1fd   : > { %970 = vadd.xlane.f32.xlu1 %v943_v8 }
 0x200   : > { %1054 = vmax.xlane.f32.xlu0 %v3759_v16 }
 0x201   : > { %1056 = vmax.xlane.f32.xlu1 %v3763_v62 }
 0x204   : > { %1070 = vmax.xlane.f32.xlu0 %v3761_v57 }
 0x205   : > { %1072 = vmax.xlane.f32.xlu1 %v3765_v9  ;;  %v4268_v9 = vld [vmem:[#allocation3 + $0x30] sm:$0xff] }
 0x206   : > { %5043 = vst [vmem:[#allocation63_spill] sm:$0xff] %v4268_v9 }
 0x208   : > { %956 = vadd.xlane.f32.xlu0 %v936_v11  ;;  %v3890_v11 = vld [vmem:[#allocation3 + $0x48] sm:$0xff] }
 0x209   : > { %958 = vadd.xlane.f32.xlu1 %v937_v7  ;;  %5008 = vst [vmem:[#allocation47_spill] sm:$0xff] %v3890_v11 }
 0x20c   : > { %972 = vadd.xlane.f32.xlu0 %v944_v44 }
 0x20d   : > { %974 = vadd.xlane.f32.xlu1 %v945_v22 }
 0x210   : > { %1058 = vmax.xlane.f32.xlu0 %v3771_v14 }
 0x211   : > { %1060 = vmax.xlane.f32.xlu1 %v3812_v10 }
 0x214   : > { %1074 = vmax.xlane.f32.xlu0 %v3773_v15 }
 0x215   : > { %1076 = vmax.xlane.f32.xlu1 %v3814_v33 }
 0x218   : > { %960 = vadd.xlane.f32.xlu0 %v938_v43 }
 0x219   : > { %962 = vadd.xlane.f32.xlu1 %v939_v54 }
 0x21c   : > { %976 = vadd.xlane.f32.xlu0 %v946_v4 }
 0x21d   : > { %978 = vadd.xlane.f32.xlu1 %v947_v21 }
 0x26d   : > { %v1047_v6 = vpop.xlane.xlu0 %1046 }
 0x26e   : > { %v1078_v27 = vmul.f32 30.0, %v1047_v6  ;;  %v949_v20 = vpop.xlane.xlu1 %948 }
 0x26f   : > { %v3854_v63 = vclamps-f32 %v949_v20, 0.9999999  ;;  %v1638_v4 = vmul.f32 30.0, %v949_v20 }
 0x270   : > { %v3857_v39 = vmax.f32 %v3852_v49, %v1078_v27 }
 0x271   : > { %v1382_v56 = vmul.f32 %v3854_v63, %v3854_v63  ;;  %v1063_v19 = vpop.xlane.xlu0 %1062  ;;  %v1366_v49 = vmul.f32 0.87758255, %v3854_v63 }
 0x272   : > { %5003 = vst [vmem:[#allocation42_spill] sm:$0xff] %v3857_v39  ;;  %1815 = vst.msk [vmem:[#allocation3] sm:$0xff] %vm4902_vm12, %v3857_v39  ;;  %v1086_v58 = vmul.f32 30.0, %v1063_v19  ;;  %v1049_v26 = vpop.xlane.xlu1 %1048  ;;  %1176 = vperm.xlu0 %2705, %v3857_v39  }
 0x273   : > { %v1398_v45 = vsub.f32 1.0, %v1382_v56  ;;  %v1079_v1 = vmul.f32 30.0, %v1049_v26 }
 0x274   : > { %v3871_v29 = vmax.f32 %v3861_v18, %v1086_v58 }
 0x275   : > { %v1414_v31 = vmax.f32 %v1398_v45, 0.0  ;;  %v3874_v0 = vmax.f32 %v3867_v38, %v1079_v1  ;;  %v3876_v59 = vpop.xlane.xlu0 %964 }
 0x276   : > { %5006 = vst [vmem:[#allocation45_spill] sm:$0xff] %v3871_v29  ;;  %1823 = vst.msk [vmem:[#allocation3 + $0x40] sm:$0xff] %vm4902_vm12, %v3871_v29  ;;  %v3883_v42 = vclamps-f32 %v3876_v59, 0.9999999  ;;  %v1065_v41 = vpop.xlane.xlu1 %1064  ;;  %1216 = vperm.xlu1 %2706, %v3871_v29  }
 0x277   : > { %5007 = vst [vmem:[#allocation46_spill] sm:$0xff] %v3874_v0  ;;  %2755 = vrsqrt.f32 %v1414_v31  ;;  %1816 = vst.msk [vmem:[#allocation3 + $0x8] sm:$0xff] %vm4902_vm12, %v3874_v0  ;;  %v1087_v2 = vmul.f32 30.0, %v1065_v41  ;;  %v1654_v41 = vsub.f32 %v1638_v4, %v3857_v39  ;;  %vm1432_vm11 = vcmp.eq.f32.partialorder %v1414_v31, inf }
 0x278   : > { %v1390_v7 = vmul.f32 %v3883_v42, %v3883_v42  ;;  %vm1434_vm13 = vcmp.eq.f32.partialorder %v1414_v31, 0.0  ;;  %v1435_v61 = vand.u32 2147483648, %v1414_v31 }
 0x279   : > { %v951_v12 = vpop.xlane.xlu0 %950  ;;  %v3900_v43 = vmax.f32 %v3890_v11, %v1087_v2  ;;  %v1898_v45 = vld [vmem:[#allocation3] sm:$0xff]  ;;  %v3933_v11 = vld [vmem:[#allocation3 + $0x50] sm:$0xff] }
 0x27a   : > { %v3894_v44 = vclamps-f32 %v951_v12, 0.9999999  ;;  %v3896_v22 = vpop.xlane.xlu1 %966  ;;  %1181 = vperm.xlu1 %2706, %v3874_v0   ;;  %v1406_v23 = vsub.f32 1.0, %v1390_v7  ;;  %v3920_v7 = vld [vmem:[#allocation3 + $0x10] sm:$0xff]  ;;  %5014 = vst [vmem:[#allocation53_spill] sm:$0xff] %v3933_v11 }
 0x27b   : > { %5009 = vst [vmem:[#allocation48_spill] sm:$0xff] %v3900_v43  ;;  %v3903_v13 = vclamps-f32 %v3896_v22, 0.9999999  ;;  %1824 = vst.msk [vmem:[#allocation3 + $0x48] sm:$0xff] %vm4902_vm12, %v3900_v43  ;;  %1221 = vperm.xlu0 %2705, %v3900_v43  }
 0x27c   : > { %v1383_v54 = vmul.f32 %v3894_v44, %v3894_v44  ;;  %v3907_v21 = vmax.f32 %v1406_v23, 0.0  ;;  %5010 = vst [vmem:[#allocation49_spill] sm:$0xff] %v3920_v7  ;;  %v3922_v23 = vld [vmem:[#allocation3 + $0x18] sm:$0xff]  ;;  %v1367_v10 = vmul.f32 0.87758255, %v3894_v44 }
 0x27d   : > { %v1051_v27 = vpop.xlane.xlu0 %1050  ;;  %v1391_v19 = vmul.f32 %v3903_v13, %v3903_v13  ;;  %5011 = vst [vmem:[#allocation50_spill] sm:$0xff] %v3922_v23 }
 0x27e   : > { %v1399_v56 = vsub.f32 1.0, %v1383_v54  ;;  %v1053_v58 = vpop.xlane.xlu1 %1052  ;;  %2757 = vrsqrt.f32 %v3907_v21  ;;  %v1080_v2 = vmul.f32 30.0, %v1051_v27  ;;  %vm1488_vm5 = vcmp.eq.f32.partialorder %v3907_v21, inf  ;;  %v1899_v33 = vld [vmem:[#allocation3 + $0x8] sm:$0xff] }
 0x27f   : > { %v1407_v20 = vsub.f32 1.0, %v1391_v19  ;;  %v1081_v6 = vmul.f32 30.0, %v1053_v58  ;;  %1916 = vperm.xlu0 %2705, %v1898_v45   ;;  %vm1490_vm4 = vcmp.eq.f32.partialorder %v3907_v21, 0.0 }
 0x280   : > { %v3917_v26 = vmax.f32 %v1399_v56, 0.0  ;;  %v3928_v4 = vmax.f32 %v3920_v7, %v1080_v2 }
 0x281   : > { %v2756_v1 = vpop.eup %2755  ;;  %v1067_v54 = vpop.xlane.xlu0 %1066  ;;  %v3925_v56 = vmax.f32 %v1407_v20, 0.0  ;;  %v3931_v27 = vmax.f32 %v3922_v23, %v1081_v6 }
 0x282   : > { %v1431_v8 = vmul.f32 %v2756_v1, %v1414_v31  ;;  %v1069_v51 = vpop.xlane.xlu1 %1068  ;;  %2759 = vrsqrt.f32 %v3917_v26  ;;  %5012 = vst [vmem:[#allocation51_spill] sm:$0xff] %v3928_v4  ;;  %v1088_v58 = vmul.f32 30.0, %v1067_v54  ;;  %v1670_v1 = vmul.f32 1.442695, %v1654_v41  ;;  %1817 = vst.msk [vmem:[#allocation3 + $0x10] sm:$0xff] %vm4902_vm12, %v3928_v4  ;;  %1186 = vperm.xlu1 %2706, %v3928_v4  }
 0x283   : > { %5013 = vst [vmem:[#allocation52_spill] sm:$0xff] %v3931_v27  ;;  %2761 = vrsqrt.f32 %v3925_v56  ;;  %1818 = vst.msk [vmem:[#allocation3 + $0x18] sm:$0xff] %vm4902_vm12, %v3931_v27  ;;  %1191 = vperm.xlu0 %2705, %v3931_v27   ;;  %v1089_v6 = vmul.f32 30.0, %v1069_v51  ;;  %v3958_v54 = vmul.f32 30.0, %v3876_v59  ;;  %vm1439_vm0 = vcmp.eq.f32.partialorder %v3917_v26, inf }
 0x284   : > { %v1433_v19 = vsel %vm1432_vm11, %v1414_v31, %v1431_v8  ;;  %v3945_v8 = vld [vmem:[#allocation3 + $0x58] sm:$0xff]  ;;  %v3952_v63 = vmax.f32 %v3933_v11, %v1088_v58  ;;  %2763 = vpow2.f32 %v1670_v1  ;;  %v3962_v31 = vmul.f32 30.0, %v951_v12  ;;  %v1831_v58 = vld [vmem:[#allocation5] sm:$0xff] }
 0x285   : > { %v1436_v45 = vsel %vm1434_vm13, %v1435_v61, %v1433_v19  ;;  %v3936_v38 = vpop.xlane.xlu0 %952  ;;  %5015 = vst [vmem:[#allocation54_spill] sm:$0xff] %v3945_v8  ;;  %v3969_v51 = vmax.f32 %v3945_v8, %v1089_v6  ;;  %v1491_v1 = vand.u32 2147483648, %v3907_v21  ;;  %v1374_v8 = vmul.f32 0.87758255, %v3883_v42 }
 0x286   : > { %v1542_v20 = vmul.f32 0.47942555, %v1436_v45  ;;  %5016 = vst [vmem:[#allocation55_spill] sm:$0xff] %v3952_v63  ;;  %v3955_v41 = vclamps-f32 %v3936_v38, 0.9999999  ;;  %v3960_v19 = vpop.xlane.xlu1 %954  ;;  %1825 = vst.msk [vmem:[#allocation3 + $0x50] sm:$0xff] %vm4902_vm12, %v3952_v63  ;;  %1226 = vperm.xlu1 %2706, %v3952_v63   ;;  %v1662_v18 = vsub.f32 %v3958_v54, %v3871_v29 }
 0x287   : > { %5017 = vst [vmem:[#allocation56_spill] sm:$0xff] %v3969_v51  ;;  %1826 = vst.msk [vmem:[#allocation3 + $0x58] sm:$0xff] %vm4902_vm12, %v3969_v51  ;;  %v3985_v6 = vclamps-f32 %v3960_v19, 0.9999999  ;;  %1231 = vperm.xlu0 %2705, %v3969_v51   ;;  %v1442_v42 = vand.u32 2147483648, %v3917_v26  ;;  %vm1441_vm11 = vcmp.eq.f32.partialorder %v3917_v26, 0.0 }
 0x288   : > { %v1558_v2 = vsub.f32 %v1366_v49, %v1542_v20  ;;  %v2758_v45 = vpop.eup %2757  ;;  %v1384_v12 = vmul.f32 %v3955_v41, %v3955_v41  ;;  %vm1495_vm13 = vcmp.eq.f32.partialorder %v3925_v56, inf  ;;  %v1839_v54 = vld [vmem:[#allocation5 + $0x40] sm:$0xff] }
 0x289   : > { %v1487_v59 = vmul.f32 %v2758_v45, %v3907_v21 }
 0x28a   : > { %v3971_v49 = vmul.f32 30.0, %v1558_v2  ;;  %v1400_v11 = vsub.f32 1.0, %v1384_v12  ;;  %1921 = vperm.xlu1 %2706, %v1899_v33   ;;  %v1647_v12 = vmul.f32 30.0, %v3896_v22 }
 0x28b   : > { %v1489_v61 = vsel %vm1488_vm5, %v3907_v21, %v1487_v59  ;;  %v1655_v21 = vsub.f32 %v3962_v31, %v3874_v0  ;;  %vm1497_vm5 = vcmp.eq.f32.partialorder %v3925_v56, 0.0 }
 0x28c   : > { %v1847_v45 = vsel %vm3643_vm1, %v3971_v49, 0.0  ;;  %v2760_v23 = vpop.eup %2759  ;;  %v1492_v7 = vsel %vm1490_vm4, %v1491_v1, %v1489_v61  ;;  %v3999_v14 = vmax.f32 %v1400_v11, 0.0 }
 0x28d   : > { %v1863_v20 = vadd.f32 %v1847_v45, %v1831_v58  ;;  %v1550_v15 = vmul.f32 0.47942555, %v1492_v7  ;;  %v1438_v2 = vmul.f32 %v2760_v23, %v3917_v26  ;;  %v2762_v52 = vpop.eup %2761  ;;  %v1385_v7 = vmul.f32 %v3985_v6, %v3985_v6 }
 0x28e   : > { %v1494_v33 = vmul.f32 %v2762_v52, %v3925_v56  ;;  %v1498_v23 = vand.u32 2147483648, %v3925_v56  ;;  %2765 = vrsqrt.f32 %v3999_v14  ;;  %v1375_v52 = vmul.f32 0.87758255, %v3903_v13  ;;  %v1832_v13 = vld [vmem:[#allocation5 + $0x8] sm:$0xff]  ;;  %v1909_v36 = vld [vmem:[#allocation3 + $0x58] sm:$0xff] }
 0x28f   : > { %1879 = vst.msk [vmem:[#allocation5] sm:$0xff] %vm4902_vm12, %v1863_v20  ;;  %v1566_v61 = vsub.f32 %v1374_v8, %v1550_v15  ;;  %v1440_v44 = vsel %vm1439_vm0, %v3917_v26, %v1438_v2  ;;  %v969_v15 = vpop.xlane.xlu0 %968  ;;  %v4018_v8 = vpop.eup %2763  ;;  %v1401_v1 = vsub.f32 1.0, %v1385_v7  ;;  %v1672_v22 = vmul.f32 1.442695, %v1655_v21  ;;  %v2915_v20 = vld [vmem:[%s4863_s2 + $0x70] sm:$0xff] }
 0x290   : > { %v1443_v11 = vsel %vm1441_vm11, %v1442_v42, %v1440_v44  ;;  %v1496_v59 = vsel %vm1495_vm13, %v3925_v56, %v1494_v33  ;;  %v1686_v56 = vmul.f32 1.442695, %v1662_v18  ;;  %vm994_vm4 = vcmp.ge.s32.totalorder %v2915_v20, %v3487_v60 }
 0x291   : > { %v4014_v58 = vmul.f32 30.0, %v1566_v61  ;;  %v1543_v31 = vmul.f32 0.47942555, %v1443_v11  ;;  %v1499_v26 = vsel %vm1497_vm5, %v1498_v23, %v1496_v59  ;;  %v971_v61 = vpop.xlane.xlu1 %970  ;;  %v4027_v33 = vmax.f32 %v1401_v1, 0.0 }
 0x292   : > { %v1551_v42 = vmul.f32 0.47942555, %v1499_v26  ;;  %v4029_v11 = vclamps-f32 %v969_v15, 0.9999999  ;;  %v4033_v59 = vmul.f32 30.0, %v969_v15  ;;  %v1663_v15 = vsub.f32 %v1647_v12, %v3900_v43 }
 0x293   : > { %v1855_v2 = vsel %vm3622_vm8, %v4014_v58, 0.0  ;;  %v1559_v45 = vsub.f32 %v1367_v10, %v1543_v31  ;;  %v1640_v10 = vmul.f32 30.0, %v3936_v38  ;;  %2767 = vrsqrt.f32 %v4027_v33 }
 0x294   : > { %v1871_v44 = vadd.f32 %v1855_v2, %v1839_v54  ;;  %v1567_v7 = vsub.f32 %v1375_v52, %v1551_v42  ;;  %v1840_v54 = vld [vmem:[#allocation5 + $0x48] sm:$0xff]  ;;  %v1055_v52 = vpop.xlane.xlu0 %1054  ;;  %2769 = vpow2.f32 %v1686_v56  ;;  %v1392_v26 = vmul.f32 %v4029_v11, %v4029_v11 }
 0x295   : > { %v4031_v23 = vmul.f32 30.0, %v1559_v45  ;;  %2771 = vpow2.f32 %v1672_v22  ;;  %v1057_v45 = vpop.xlane.xlu1 %1056  ;;  %v1688_v22 = vmul.f32 1.442695, %v1663_v15  ;;  %vm1446_vm11 = vcmp.eq.f32.partialorder %v3999_v14, inf }
 0x296   : > { %1887 = vst.msk [vmem:[#allocation5 + $0x40] sm:$0xff] %vm4902_vm12, %v1871_v44  ;;  %v4047_v31 = vmul.f32 30.0, %v1567_v7  ;;  %v1656_v44 = vsub.f32 %v1640_v10, %v3928_v4  ;;  %v4063_v7 = vclamps-f32 %v971_v61, 0.9999999  ;;  %v1449_v12 = vand.u32 2147483648, %v3999_v14 }
 0x297   : > { %v1848_v21 = vsel %vm3515_vm6, %v4031_v23, 0.0  ;;  %v4074_v10 = vmul.f32 30.0, %v971_v61  ;;  %vm5018_vm13 = vcmp.lt.s32.totalorder %v3560_v34, %v3493_v3  ;;  %v1083_v61 = vmul.f32 30.0, %v1057_v45 }
 0x298   : > { %v1864_v38 = vadd.f32 %v1848_v21, %v1832_v13  ;;  %v1856_v2 = vsel %vm3650_vm2, %v4047_v31, 0.0  ;;  %v2766_v42 = vpop.eup %2765  ;;  %v1408_v13 = vsub.f32 1.0, %v1392_v26  ;;  %v1368_v21 = vmul.f32 0.87758255, %v3955_v41  ;;  %vm4081_vm5 = vmand %vm994_vm4, %vm5018_vm13 }
 0x299   : > { %v1872_v56 = vadd.f32 %v1856_v2, %v1840_v54  ;;  %v1445_v1 = vmul.f32 %v2766_v42, %v3999_v14  ;;  %v1393_v54 = vmul.f32 %v4063_v7, %v4063_v7  ;;  %v1082_v26 = vmul.f32 30.0, %v1055_v52  ;;  %v4089_v2 = vld [vmem:[#allocation3 + $0x28] sm:$0xff]  ;;  %v1071_v42 = vpop.xlane.xlu0 %1070 }
 0x29a   : > { %1880 = vst.msk [vmem:[#allocation5 + $0x8] sm:$0xff] %vm4902_vm12, %v1864_v38  ;;  %v4070_v18 = vmax.f32 %v1408_v13, 0.0  ;;  %v4087_v38 = vld [vmem:[#allocation3 + $0x20] sm:$0xff]  ;;  %5022 = vst [vmem:[#allocation58_spill] sm:$0xff] %v4089_v2  ;;  %vm5023_vm0 = vcmp.lt.s32.totalorder %v3605_v46, %v3493_v3  ;;  %vm5024_vm4 = vcmp.ge.s32.totalorder %v3605_v46, %v3487_v60  ;;  %v1674_v52 = vmul.f32 1.442695, %v1656_v44  ;;  %v1073_v60 = vpop.xlane.xlu1 %1072 }
 0x29b   : > { %1888 = vst.msk [vmem:[#allocation5 + $0x48] sm:$0xff] %vm4902_vm12, %v1872_v56  ;;  %v1447_v15 = vsel %vm1446_vm11, %v3999_v14, %v1445_v1  ;;  %vm1448_vm12 = vcmp.eq.f32.partialorder %v3999_v14, 0.0  ;;  %5021 = vst [vmem:[#allocation57_spill] sm:$0xff] %v4087_v38  ;;  %v5027_v14 = vsub.f32 %v3971_v49, %v3857_v39  ;;  %vm1453_vm11 = vcmp.eq.f32.partialorder %v4027_v33, inf  ;;  %v4107_v13 = vld [vmem:[#allocation3 + $0x60] sm:$0xff] }
 0x29c   : > { %vm4097_vm13 = vmand %vm5024_vm4, %vm5023_vm0  ;;  %v1450_v1 = vsel %vm1448_vm12, %v1449_v12, %v1447_v15  ;;  %2773 = vrsqrt.f32 %v4070_v18  ;;  %v1641_v3 = vmul.f32 30.0, %v3960_v19  ;;  %v1409_v56 = vsub.f32 1.0, %v1393_v54  ;;  %5028 = vst [vmem:[#allocation59_spill] sm:$0xff] %v4107_v13 }
 0x29d   : > { %v1606_v20 = vmul.f32 1.442695, %v5027_v14  ;;  %v1544_v45 = vmul.f32 0.47942555, %v1450_v1  ;;  %v2768_v46 = vpop.eup %2767  ;;  %v4112_v49 = vmax.f32 %v4087_v38, %v1082_v26  ;;  %v4115_v12 = vmax.f32 %v4089_v2, %v1083_v61 }
 0x29e   : > { %v1090_v44 = vmul.f32 30.0, %v1071_v42  ;;  %v1452_v14 = vmul.f32 %v2768_v46, %v4027_v33  ;;  %v1456_v19 = vand.u32 2147483648, %v4027_v33  ;;  %v4119_v54 = vmax.f32 %v1409_v56, 0.0  ;;  %v4121_v1 = vpop.eup %2769 }
 0x29f   : > { %5029 = vst [vmem:[#allocation60_spill] sm:$0xff] %v4112_v49  ;;  %5030 = vst [vmem:[#allocation61_spill] sm:$0xff] %v4115_v12  ;;  %v1560_v15 = vsub.f32 %v1368_v21, %v1544_v45  ;;  %vm5031_vm12 = vcmask 7168   ;;  %v1091_v61 = vmul.f32 30.0, %v1073_v60  ;;  %1196 = vperm.xlu1 %2706, %v4112_v49   ;;  %1201 = vperm.xlu0 %2705, %v4115_v12   ;;  %v4136_v42 = vpop.eup %2771  ;;  %v1833_v45 = vld [vmem:[#allocation5 + $0x10] sm:$0xff]  ;;  %vm1455_vm4 = vcmp.eq.f32.partialorder %v4027_v33, 0.0 }
 0x2a0   : > { %1819 = vst.msk [vmem:[#allocation3 + $0x20] sm:$0xff] %vm5031_vm12, %v4112_v49  ;;  %vm5032_vm0 = vmmov %vm5031_vm12  ;;  %v4132_v21 = vmax.f32 %v4107_v13, %v1090_v44  ;;  %v1454_v46 = vsel %vm1453_vm11, %v4027_v33, %v1452_v14  ;;  %2775 = vrsqrt.f32 %v4119_v54  ;;  %v4145_v44 = vld [vmem:[#allocation3 + $0x68] sm:$0xff]  ;;  %v5034_v60 = vsub.f32 %v4014_v58, %v3871_v29 }
 0x2a1   : > { %1820 = vst.msk [vmem:[#allocation3 + $0x28] sm:$0xff] %vm5032_vm0, %v4115_v12  ;;  %v4138_v56 = vmul.f32 30.0, %v1560_v15  ;;  %5033 = vst [vmem:[#allocation62_spill] sm:$0xff] %v4145_v44  ;;  %2777 = vpow2.f32 %v1688_v22  ;;  %v1457_v17 = vsel %vm1455_vm4, %v1456_v19, %v1454_v46  ;;  %v1657_v53 = vsub.f32 %v1641_v3, %v3931_v27  ;;  %v957_v15 = vpop.xlane.xlu0 %956 }
 0x2a2   : > { %v1622_v26 = vmul.f32 1.442695, %v5034_v60  ;;  %vm5035_vm12 = vmmov %vm5032_vm0  ;;  %v1369_v2 = vmul.f32 0.87758255, %v3985_v6  ;;  %v1545_v38 = vmul.f32 0.47942555, %v1457_v17  ;;  %2779 = vpow2.f32 %v1606_v20 }
 0x2a3   : > { %1827 = vst.msk [vmem:[#allocation3 + $0x60] sm:$0xff] %vm5035_vm12, %v4132_v21  ;;  %v1849_v33 = vsel %vm3530_vm10, %v4138_v56, 0.0  ;;  %v4162_v3 = vmax.f32 %v4145_v44, %v1091_v61  ;;  %1236 = vperm.xlu1 %2706, %v4132_v21   ;;  %2781 = vpow2.f32 %v1674_v52  ;;  %v4165_v46 = vclamps-f32 %v957_v15, 0.9999999  ;;  %vm5036_vm11 = vmmov %vm5032_vm0  ;;  %v959_v61 = vpop.xlane.xlu1 %958  ;;  %v1834_v52 = vld [vmem:[#allocation5 + $0x18] sm:$0xff] }
 0x2a4   : > { %v1865_v58 = vadd.f32 %v1849_v33, %v1833_v45  ;;  %v1561_v19 = vsub.f32 %v1369_v2, %v1545_v38  ;;  %2783 = vpow2.f32 %v1622_v26  ;;  %v1676_v6 = vmul.f32 1.442695, %v1657_v53  ;;  %v1900_v45 = vld [vmem:[#allocation3 + $0x10] sm:$0xff]  ;;  %v1901_v17 = vld [vmem:[#allocation3 + $0x18] sm:$0xff] }
 0x2a5   : > { %1828 = vst.msk [vmem:[#allocation3 + $0x68] sm:$0xff] %vm5032_vm0, %v4162_v3  ;;  %v4172_v20 = vmul.f32 30.0, %v957_v15  ;;  %1241 = vperm.xlu0 %2705, %v4162_v3   ;;  %v5037_v38 = vsub.f32 %v4031_v23, %v3874_v0  ;;  %vm1502_vm4 = vcmp.eq.f32.partialorder %v4070_v18, inf  ;;  %vm1504_vm12 = vcmp.eq.f32.partialorder %v4070_v18, 0.0  ;;  %v973_v13 = vpop.xlane.xlu0 %972 }
 0x2a6   : > { %v2774_v60 = vpop.eup %2773  ;;  %1881 = vst.msk [vmem:[#allocation5 + $0x10] sm:$0xff] %vm5036_vm11, %v1865_v58  ;;  %v4178_v26 = vmul.f32 30.0, %v1561_v19  ;;  %v1505_v15 = vand.u32 2147483648, %v4070_v18  ;;  %v1386_v33 = vmul.f32 %v4165_v46, %v4165_v46  ;;  %2785 = vpow2.f32 %v1676_v6  ;;  %vm5038_vm11 = vmmov %vm5032_vm0 }
 0x2a7   : > { %v1608_v2 = vmul.f32 1.442695, %v5037_v38  ;;  %v1501_v53 = vmul.f32 %v2774_v60, %v4070_v18  ;;  %1926 = vperm.xlu1 %2706, %v1900_v45   ;;  %v4194_v38 = vclamps-f32 %v959_v61, 0.9999999  ;;  %v1376_v45 = vmul.f32 0.87758255, %v4029_v11 }
 0x2a8   : > { %v1850_v19 = vsel %vm3547_vm14, %v4178_v26, 0.0  ;;  %v1402_v44 = vsub.f32 1.0, %v1386_v33  ;;  %vm1509_vm0 = vcmp.eq.f32.partialorder %v4119_v54, inf }
 0x2a9   : > { %v1503_v60 = vsel %vm1502_vm4, %v4070_v18, %v1501_v53  ;;  %v1866_v22 = vadd.f32 %v1850_v19, %v1834_v52  ;;  %1931 = vperm.xlu0 %2705, %v1901_v17   ;;  %2787 = vpow2.f32 %v1608_v2  ;;  %v1387_v48 = vmul.f32 %v4194_v38, %v4194_v38  ;;  %v975_v53 = vpop.xlane.xlu1 %974 }
 0x2aa   : > { %v1506_v14 = vsel %vm1504_vm12, %v1505_v15, %v1503_v60  ;;  %v2776_v58 = vpop.eup %2775  ;;  %v4204_v6 = vmax.f32 %v1402_v44, 0.0  ;;  %v4206_v52 = vmul.f32 30.0, %v959_v61  ;;  %v1512_v2 = vand.u32 2147483648, %v4119_v54  ;;  %vm5042_vm12 = vmmov %vm5038_vm11 }
 0x2ab   : > { %v1552_v23 = vmul.f32 0.47942555, %v1506_v14  ;;  %v4199_v0 = vpop.eup %2777  ;;  %1882 = vst.msk [vmem:[#allocation5 + $0x18] sm:$0xff] %vm5038_vm11, %v1866_v22  ;;  %v1508_v18 = vmul.f32 %v2776_v58, %v4119_v54  ;;  %v1403_v11 = vsub.f32 1.0, %v1387_v48  ;;  %v4209_v14 = vclamps-f32 %v973_v13, 0.9999999 }
 0x2ac   : > { %v4211_v15 = vpop.eup %2779  ;;  %vm1511_vm4 = vcmp.eq.f32.partialorder %v4119_v54, 0.0  ;;  %2789 = vrsqrt.f32 %v4204_v6  ;;  %v5039_v44 = vsub.f32 %v4047_v31, %v3900_v43  ;;  %v1841_v58 = vld [vmem:[#allocation5 + $0x50] sm:$0xff]  ;;  %v5040_v48 = vsub.f32 %v4033_v59, %v3952_v63  ;;  %v1842_v31 = vld [vmem:[#allocation5 + $0x58] sm:$0xff] }
 0x2ad   : > { %v1568_v17 = vsub.f32 %v1376_v45, %v1552_v23  ;;  %v1510_v33 = vsel %vm1509_vm0, %v4119_v54, %v1508_v18  ;;  %v4216_v22 = vpop.eup %2781  ;;  %v1377_v54 = vmul.f32 0.87758255, %v4063_v7  ;;  %v4229_v39 = vmax.f32 %v1403_v11, 0.0 }
 0x2ae   : > { %v1624_v61 = vmul.f32 1.442695, %v5039_v44  ;;  %v1690_v19 = vmul.f32 1.442695, %v5040_v48  ;;  %v1513_v60 = vsel %vm1511_vm4, %v1512_v2, %v1510_v33  ;;  %v4226_v45 = vpop.eup %2783  ;;  %v1394_v59 = vmul.f32 %v4209_v14, %v4209_v14  ;;  %v1059_v33 = vpop.xlane.xlu0 %1058 }
 0x2af   : > { %v4221_v23 = vmul.f32 30.0, %v1568_v17  ;;  %v1553_v18 = vmul.f32 0.47942555, %v1513_v60  ;;  %v4240_v2 = vmul.f32 30.0, %v973_v13  ;;  %2791 = vrsqrt.f32 %v4229_v39  ;;  %v1061_v60 = vpop.xlane.xlu1 %1060 }
 0x2b0   : > { %2793 = vpow2.f32 %v1624_v61  ;;  %v5041_v11 = vsub.f32 %v4074_v10, %v3969_v51  ;;  %v4246_v29 = vpop.eup %2785  ;;  %v1410_v13 = vsub.f32 1.0, %v1394_v59  ;;  %v4257_v61 = vmul.f32 30.0, %v975_v53 }
 0x2b1   : > { %v1857_v17 = vsel %vm3629_vm3, %v4221_v23, 0.0  ;;  %v1569_v44 = vsub.f32 %v1377_v54, %v1553_v18  ;;  %v4253_v54 = vclamps-f32 %v975_v53, 0.9999999  ;;  %2795 = vpow2.f32 %v1690_v19  ;;  %v4270_v53 = vld [vmem:[#allocation3 + $0x38] sm:$0xff] }
 0x2b2   : > { %v1873_v7 = vadd.f32 %v1857_v17, %v1841_v58  ;;  %v1692_v48 = vmul.f32 1.442695, %v5041_v11  ;;  %v1084_v10 = vmul.f32 30.0, %v1059_v33  ;;  %v1085_v59 = vmul.f32 30.0, %v1061_v60  ;;  %5044 = vst [vmem:[#allocation64_spill] sm:$0xff] %v4270_v53  ;;  %v1075_v19 = vpop.xlane.xlu0 %1074 }
 0x2b3   : > { %v4249_v43 = vmul.f32 30.0, %v1569_v44  ;;  %v4255_v18 = vpop.eup %2787  ;;  %v4264_v44 = vmax.f32 %v1410_v13, 0.0  ;;  %v1395_v58 = vmul.f32 %v4253_v54, %v4253_v54  ;;  %v5045_v17 = vsub.f32 %v4138_v56, %v3928_v4  ;;  %v1077_v60 = vpop.xlane.xlu1 %1076 }
 0x2b4   : > { %1889 = vst.msk [vmem:[#allocation5 + $0x50] sm:$0xff] %vm5042_vm12, %v1873_v7  ;;  %2797 = vpow2.f32 %v1692_v48  ;;  %vm1460_vm0 = vcmp.eq.f32.partialorder %v4204_v6, inf  ;;  %v1463_v13 = vand.u32 2147483648, %v4204_v6  ;;  %v4283_v62 = vmax.f32 %v4268_v9, %v1084_v10  ;;  %vm5046_vm12 = vmmov %vm5038_vm11 }
 0x2b5   : > { %v1858_v7 = vsel %vm3656_vm15, %v4249_v43, 0.0  ;;  %2799 = vrsqrt.f32 %v4264_v44  ;;  %v1610_v57 = vmul.f32 1.442695, %v5045_v17  ;;  %v4286_v16 = vmax.f32 %v4270_v53, %v1085_v59  ;;  %v4300_v59 = vld [vmem:[#allocation3 + $0x70] sm:$0xff] }
 0x2b6   : > { %v1874_v11 = vadd.f32 %v1858_v7, %v1842_v31  ;;  %v2790_v33 = vpop.eup %2789  ;;  %v1411_v31 = vsub.f32 1.0, %v1395_v58  ;;  %vm1462_vm4 = vcmp.eq.f32.partialorder %v4204_v6, 0.0  ;;  %1821 = vst.msk [vmem:[#allocation3 + $0x30] sm:$0xff] %vm5046_vm12, %v4283_v62  ;;  %5047 = vst [vmem:[#allocation65_spill] sm:$0xff] %v4300_v59  ;;  %1206 = vperm.xlu1 %2706, %v4283_v62   ;;  %v961_v10 = vpop.xlane.xlu0 %960  ;;  %v1470_v7 = vand.u32 2147483648, %v4229_v39 }
 0x2b7   : > { %v1459_v48 = vmul.f32 %v2790_v33, %v4204_v6  ;;  %1822 = vst.msk [vmem:[#allocation3 + $0x38] sm:$0xff] %vm5038_vm11, %v4286_v16  ;;  %1211 = vperm.xlu0 %2705, %v4286_v16   ;;  %vm5051_vm12 = vmmov %vm5038_vm11 }
 0x2b8   : > { %1890 = vst.msk [vmem:[#allocation5 + $0x58] sm:$0xff] %vm5038_vm11, %v1874_v11  ;;  %v4290_v17 = vmax.f32 %v1411_v31, 0.0  ;;  %v1092_v11 = vmul.f32 30.0, %v1075_v19 }
 0x2b9   : > { %v1461_v56 = vsel %vm1460_vm0, %v4204_v6, %v1459_v48  ;;  %v2792_v58 = vpop.eup %2791  ;;  %v1093_v6 = vmul.f32 30.0, %v1077_v60  ;;  %v1370_v48 = vmul.f32 0.87758255, %v4165_v46  ;;  %v5049_v60 = vsub.f32 %v4178_v26, %v3931_v27 }
 0x2ba   : > { %v1464_v33 = vsel %vm1462_vm4, %v1463_v13, %v1461_v56  ;;  %v4304_v19 = vpop.eup %2793  ;;  %v1466_v13 = vmul.f32 %v2792_v58, %v4229_v39  ;;  %2801 = vrsqrt.f32 %v4290_v17  ;;  %v4309_v56 = vld [vmem:[#allocation3 + $0x78] sm:$0xff]  ;;  %vm1467_vm0 = vcmp.eq.f32.partialorder %v4229_v39, inf }
 0x2bb   : > { %v1546_v31 = vmul.f32 0.47942555, %v1464_v33  ;;  %5048 = vst [vmem:[#allocation66_spill] sm:$0xff] %v4309_v56  ;;  %2803 = vpow2.f32 %v1610_v57  ;;  %v1612_v4 = vmul.f32 1.442695, %v5049_v60  ;;  %v4316_v53 = vpop.eup %2795  ;;  %vm1469_vm4 = vcmp.eq.f32.partialorder %v4229_v39, 0.0 }
 0x2bc   : > { %v1468_v33 = vsel %vm1467_vm0, %v4229_v39, %v1466_v13  ;;  %v4321_v58 = vmax.f32 %v4300_v59, %v1092_v11  ;;  %v5050_v57 = vsub.f32 %v4172_v20, %v4112_v49  ;;  %v4327_v60 = vmax.f32 %v4309_v56, %v1093_v6  ;;  %v963_v56 = vpop.xlane.xlu1 %962  ;;  %v1906_v59 = vld [vmem:[#allocation3 + $0x40] sm:$0xff] }
 0x2bd   : > { %v1562_v46 = vsub.f32 %v1370_v48, %v1546_v31  ;;  %v1471_v26 = vsel %vm1469_vm4, %v1470_v7, %v1468_v33  ;;  %v4329_v27 = vclamps-f32 %v961_v10, 0.9999999  ;;  %v1835_v48 = vld [vmem:[#allocation5 + $0x20] sm:$0xff]  ;;  %v1371_v13 = vmul.f32 0.87758255, %v4194_v38 }
 0x2be   : > { %v1678_v9 = vmul.f32 1.442695, %v5050_v57  ;;  %v4331_v35 = vpop.eup %2797  ;;  %v1547_v39 = vmul.f32 0.47942555, %v1471_v26  ;;  %1829 = vst.msk [vmem:[#allocation3 + $0x70] sm:$0xff] %vm5051_vm12, %v4321_v58  ;;  %1246 = vperm.xlu1 %2706, %v4321_v58   ;;  %2805 = vpow2.f32 %v1612_v4  ;;  %v4345_v6 = vmul.f32 30.0, %v961_v10  ;;  %1251 = vperm.xlu0 %2705, %v4327_v60  }
 0x2bf   : > { %v1578_v31 = vmul.f32 30.0, %v1562_v46  ;;  %v2800_v20 = vpop.eup %2799  ;;  %1830 = vst.msk [vmem:[#allocation3 + $0x78] sm:$0xff] %vm5038_vm11, %v4327_v60  ;;  %v1388_v38 = vmul.f32 %v4329_v27, %v4329_v27  ;;  %vm5052_vm0 = vnez %v4954_v37  ;;  %vm1516_vm4 = vcmp.eq.f32.partialorder %v4264_v44, inf  ;;  %v1836_v10 = vld [vmem:[#allocation5 + $0x28] sm:$0xff] }
 0x2c0   : > { %v1563_v57 = vsub.f32 %v1371_v13, %v1547_v39  ;;  %v1515_v4 = vmul.f32 %v2800_v20, %v4264_v44  ;;  %v1519_v7 = vand.u32 2147483648, %v4264_v44  ;;  %vm1518_vm12 = vcmp.eq.f32.partialorder %v4264_v44, 0.0  ;;  %v1907_v13 = vld [vmem:[#allocation3 + $0x48] sm:$0xff] }
 0x2c1   : > { %v1594_v46 = vsub.f32 %v1578_v31, %v4112_v49  ;;  %v1851_v33 = vsel %vm5052_vm0, %v1578_v31, 0.0  ;;  %v1404_v11 = vsub.f32 1.0, %v1388_v38  ;;  %2807 = vpow2.f32 %v1678_v9 }
 0x2c2   : > { %v1867_v26 = vadd.f32 %v1851_v33, %v1835_v48  ;;  %v1579_v5 = vmul.f32 30.0, %v1563_v57  ;;  %v1517_v40 = vsel %vm1516_vm4, %v4264_v44, %v1515_v4  ;;  %1956 = vperm.xlu1 %2706, %v1906_v59   ;;  %v1378_v48 = vmul.f32 0.87758255, %v4209_v14  ;;  %1961 = vperm.xlu0 %2705, %v1907_v13   ;;  %v5053_v57 = vld [vmem:[#allocation21_spill] sm:$0xff]  ;;  %v1902_v13 = vld [vmem:[#allocation3 + $0x20] sm:$0xff] }
 0x2c3   : > { %v1520_v39 = vsel %vm1518_vm12, %v1519_v7, %v1517_v40  ;;  %v4360_v20 = vmax.f32 %v1404_v11, 0.0  ;;  %vm5054_vm4 = vnez %v5053_v57  ;;  %v4365_v49 = vclamps-f32 %v963_v56, 0.9999999 }
 0x2c4   : > { %1883 = vst.msk [vmem:[#allocation5 + $0x20] sm:$0xff] %vm5038_vm11, %v1867_v26  ;;  %v2802_v38 = vpop.eup %2801  ;;  %v1595_v33 = vsub.f32 %v1579_v5, %v4115_v12  ;;  %v1852_v44 = vsel %vm5054_vm4, %v1579_v5, 0.0  ;;  %v1554_v4 = vmul.f32 0.47942555, %v1520_v39  ;;  %v5055_v9 = vsub.f32 %v4221_v23, %v3952_v63  ;;  %v977_v39 = vpop.xlane.xlu0 %976 }
 0x2c5   : > { %v4367_v59 = vpop.eup %2803  ;;  %v5056_v40 = vsub.f32 %v4206_v52, %v4115_v12  ;;  %v1868_v11 = vadd.f32 %v1852_v44, %v1836_v10  ;;  %v1522_v7 = vmul.f32 %v2802_v38, %v4290_v17  ;;  %vm1523_vm12 = vcmp.eq.f32.partialorder %v4290_v17, inf  ;;  %v1843_v38 = vld [vmem:[#allocation5 + $0x60] sm:$0xff] }
 0x2c6   : > { %v1626_v26 = vmul.f32 1.442695, %v5055_v9  ;;  %v1570_v31 = vsub.f32 %v1378_v48, %v1554_v4  ;;  %v1526_v5 = vand.u32 2147483648, %v4290_v17  ;;  %2809 = vrsqrt.f32 %v4360_v20  ;;  %1936 = vperm.xlu1 %2706, %v1902_v13   ;;  %1971 = vperm.xlu0 %2705, %v1909_v36  }
 0x2c7   : > { %v1680_v14 = vmul.f32 1.442695, %v5056_v40  ;;  %v5057_v23 = vsub.f32 %v4249_v43, %v3969_v51  ;;  %1884 = vst.msk [vmem:[#allocation5 + $0x28] sm:$0xff] %vm5038_vm11, %v1868_v11  ;;  %v1379_v52 = vmul.f32 0.87758255, %v4253_v54  ;;  %v1524_v10 = vsel %vm1523_vm12, %v4290_v17, %v1522_v7  ;;  %v1908_v54 = vld [vmem:[#allocation3 + $0x50] sm:$0xff] }
 0x2c8   : > { %vm1525_vm2 = vcmp.eq.f32.partialorder %v4290_v17, 0.0  ;;  %v1614_v48 = vmul.f32 1.442695, %v1594_v46  ;;  %v1586_v44 = vmul.f32 30.0, %v1570_v31  ;;  %v1389_v40 = vmul.f32 %v4365_v49, %v4365_v49  ;;  %v4388_v13 = vpop.eup %2805  ;;  %v1844_v51 = vld [vmem:[#allocation5 + $0x68] sm:$0xff] }
 0x2c9   : > { %v1628_v9 = vmul.f32 1.442695, %v5057_v23  ;;  %v1527_v4 = vsel %vm1525_vm2, %v1526_v5, %v1524_v10  ;;  %2811 = vpow2.f32 %v1626_v26  ;;  %v4390_v23 = vmul.f32 30.0, %v963_v56  ;;  %v979_v5 = vpop.xlane.xlu1 %978  ;;  %v1903_v10 = vld [vmem:[#allocation3 + $0x28] sm:$0xff]  ;;  %vm5060_vm2 = vmmov %vm5038_vm11 }
 0x2ca   : > { %v1555_v43 = vmul.f32 0.47942555, %v1527_v4  ;;  %v4392_v11 = vclamps-f32 %v977_v39, 0.9999999  ;;  %v1602_v7 = vsub.f32 %v1586_v44, %v4132_v21  ;;  %v1859_v36 = vsel %vm3636_vm9, %v1586_v44, 0.0  ;;  %1966 = vperm.xlu1 %2706, %v1908_v54   ;;  %1941 = vperm.xlu0 %2705, %v1903_v10   ;;  %vm5063_vm11 = vmmov %vm5060_vm2 }
 0x2cb   : > { %v1405_v46 = vsub.f32 1.0, %v1389_v40  ;;  %v4397_v31 = vmul.f32 30.0, %v977_v39  ;;  %2813 = vpow2.f32 %v1680_v14  ;;  %v1875_v12 = vadd.f32 %v1859_v36, %v1843_v38  ;;  %v4407_v40 = vpop.eup %2807 }
 0x2cc   : > { %v1571_v26 = vsub.f32 %v1379_v52, %v1555_v43  ;;  %v1616_v4 = vmul.f32 1.442695, %v1595_v33  ;;  %v1396_v44 = vmul.f32 %v4392_v11, %v4392_v11  ;;  %2815 = vpow2.f32 %v1628_v9  ;;  %v1910_v43 = vld [vmem:[#allocation3 + $0x60] sm:$0xff]  ;;  %v1911_v9 = vld [vmem:[#allocation3 + $0x68] sm:$0xff] }
 0x2cd   : > { %v4401_v63 = vmax.f32 %v1405_v46, 0.0  ;;  %v5059_v14 = vsub.f32 %v4240_v2, %v4132_v21  ;;  %1891 = vst.msk [vmem:[#allocation5 + $0x60] sm:$0xff] %vm5060_vm2, %v1875_v12  ;;  %v4413_v33 = vclamps-f32 %v979_v5, 0.9999999  ;;  %2817 = vpow2.f32 %v1614_v48 }
 0x2ce   : > { %v1587_v38 = vmul.f32 30.0, %v1571_v26  ;;  %v1630_v54 = vmul.f32 1.442695, %v1602_v7  ;;  %v5061_v36 = vsub.f32 %v4257_v61, %v4162_v3  ;;  %v4418_v10 = vmul.f32 30.0, %v979_v5  ;;  %1976 = vperm.xlu1 %2706, %v1910_v43   ;;  %1981 = vperm.xlu0 %2705, %v1911_v9  }
 0x2cf   : > { %v1694_v52 = vmul.f32 1.442695, %v5059_v14  ;;  %2819 = vrsqrt.f32 %v4401_v63  ;;  %v1412_v12 = vsub.f32 1.0, %v1396_v44  ;;  %vm1474_vm12 = vcmp.eq.f32.partialorder %v4360_v20, inf  ;;  %v1912_v44 = vld [vmem:[#allocation3 + $0x70] sm:$0xff] }
 0x2d0   : > { %v1696_v46 = vmul.f32 1.442695, %v5061_v36  ;;  %v1603_v39 = vsub.f32 %v1587_v38, %v4162_v3  ;;  %v1860_v14 = vsel %vm3662_vm7, %v1587_v38, 0.0  ;;  %v2810_v26 = vpop.eup %2809  ;;  %2821 = vpow2.f32 %v1616_v4  ;;  %v1904_v38 = vld [vmem:[#allocation3 + $0x30] sm:$0xff] }
 0x2d1   : > { %v1876_v48 = vadd.f32 %v1860_v14, %v1844_v51  ;;  %v1477_v61 = vand.u32 2147483648, %v4360_v20  ;;  %v1473_v5 = vmul.f32 %v2810_v26, %v4360_v20  ;;  %v4427_v43 = vmax.f32 %v1412_v12, 0.0  ;;  %v1905_v51 = vld [vmem:[#allocation3 + $0x38] sm:$0xff] }
 0x2d2   : > { %v1632_v7 = vmul.f32 1.442695, %v1603_v39  ;;  %v1397_v36 = vmul.f32 %v4413_v33, %v4413_v33  ;;  %2823 = vpow2.f32 %v1630_v54  ;;  %1946 = vperm.xlu1 %2706, %v1904_v38   ;;  %vm1476_vm2 = vcmp.eq.f32.partialorder %v4360_v20, 0.0  ;;  %1951 = vperm.xlu0 %2705, %v1905_v51   ;;  %v1913_v39 = vld [vmem:[#allocation3 + $0x78] sm:$0xff] }
 0x2d3   : > { %1892 = vst.msk [vmem:[#allocation5 + $0x68] sm:$0xff] %vm5063_vm11, %v1876_v48  ;;  %v2812_v9 = vpop.eup %2811  ;;  %v1475_v14 = vsel %vm1474_vm12, %v4360_v20, %v1473_v5  ;;  %v1372_v48 = vmul.f32 0.87758255, %v4329_v27  ;;  %vm1481_vm12 = vcmp.eq.f32.partialorder %v4401_v63, inf  ;;  %v2123_v20 = vld [vmem:[#allocation5 + $0x8] sm:$0xff] }
 0x2d4   : > { %2825 = vpow2.f32 %v1632_v7  ;;  %v1478_v54 = vsel %vm1476_vm2, %v1477_v61, %v1475_v14  ;;  %v1413_v12 = vsub.f32 1.0, %v1397_v36  ;;  %v1484_v36 = vand.u32 2147483648, %v4401_v63 }
 0x2d5   : > { %2827 = vrsqrt.f32 %v4427_v43  ;;  %v4443_v26 = vpop.eup %2813  ;;  %v1548_v38 = vmul.f32 0.47942555, %v1478_v54  ;;  %v1373_v54 = vmul.f32 0.87758255, %v4365_v49  ;;  %vm1483_vm2 = vcmp.eq.f32.partialorder %v4401_v63, 0.0 }
 0x2d6   : > { %2829 = vpow2.f32 %v1694_v52  ;;  %v4446_v7 = vmax.f32 %v1413_v12, 0.0  ;;  %1986 = vperm.xlu1 %2706, %v1912_v44   ;;  %v2816_v5 = vpop.eup %2815  ;;  %1991 = vperm.xlu0 %2705, %v1913_v39   ;;  %v1837_v52 = vld [vmem:[#allocation5 + $0x30] sm:$0xff]  ;;  %v2122_v12 = vld [vmem:[#allocation5] sm:$0xff] }
 0x2d7   : > { %2831 = vpow2.f32 %v1696_v46  ;;  %v1564_v61 = vsub.f32 %v1372_v48, %v1548_v38  ;;  %v2818_v51 = vpop.eup %2817  ;;  %v5064_v46 = vsub.f32 %v4345_v6, %v4283_v62  ;;  %v1704_v48 = vsub.f32 %v4367_v59, %v4216_v22 }
 0x2d8   : > { %2833 = vrsqrt.f32 %v4446_v7  ;;  %v1712_v59 = vsub.f32 %v2812_v9, %v4316_v53  ;;  %v1713_v53 = vsub.f32 %v2816_v5, %v4331_v35  ;;  %v1706_v32 = vsub.f32 %v2818_v51, %v4407_v40 }
 0x2d9   : > { %v2820_v27 = vpop.eup %2819  ;;  %v1580_v14 = vmul.f32 30.0, %v1564_v61  ;;  %v1682_v44 = vmul.f32 1.442695, %v5064_v46  ;;  %v1705_v61 = vsub.f32 %v4388_v13, %v4246_v29  ;;  %v5065_v46 = vld [vmem:[#allocation22_spill] sm:$0xff]  ;;  %v4469_v22 = vsel %vm3530_vm10, %v1704_v48, 0.0 }
 0x2da   : > { %v2822_v39 = vpop.eup %2821  ;;  %v1480_v38 = vmul.f32 %v2820_v27, %v4401_v63  ;;  %2140 = vperm.xlu1 %2706, %v2122_v12   ;;  %vm5066_vm11 = vnez %v5065_v46  ;;  %2145 = vperm.xlu0 %2705, %v2123_v20   ;;  %v2124_v20 = vld [vmem:[#allocation5 + $0x10] sm:$0xff]  ;;  %v4480_v25 = vsel %vm3629_vm3, %v1712_v59, 0.0  ;;  %vm5067_vm10 = vcmask 7168  }
 0x2db   : > { %v1596_v6 = vsub.f32 %v1580_v14, %v4283_v62  ;;  %v1853_v49 = vsel %vm5066_vm11, %v1580_v14, 0.0  ;;  %v4476_v29 = vsel %vm3547_vm14, %v1705_v61, 0.0  ;;  %2835 = vpow2.f32 %v1682_v44 }
 0x2dc   : > { %v2824_v27 = vpop.eup %2823  ;;  %v1869_v4 = vadd.f32 %v1853_v49, %v1837_v52  ;;  %v1482_v12 = vsel %vm1481_vm12, %v4401_v63, %v1480_v38  ;;  %vm1530_vm12 = vcmp.eq.f32.partialorder %v4427_v43, inf  ;;  %v4489_v50 = vsel %vm3656_vm15, %v1713_v53, 0.0 }
 0x2dd   : > { %v1618_v56 = vmul.f32 1.442695, %v1596_v6  ;;  %v1485_v14 = vsel %vm1483_vm2, %v1484_v36, %v1482_v12  ;;  %v1707_v35 = vsub.f32 %v2822_v39, %v4443_v26  ;;  %v4495_v48 = vsel %vm5052_vm0, %v1706_v32, 0.0  ;;  %v1838_v26 = vld [vmem:[#allocation5 + $0x38] sm:$0xff]  ;;  %v1845_v32 = vld [vmem:[#allocation5 + $0x70] sm:$0xff] }
 0x2de   : > { %v2826_v13 = vpop.eup %2825  ;;  %1885 = vst.msk [vmem:[#allocation5 + $0x30] sm:$0xff] %vm5067_vm10, %v1869_v4  ;;  %v1549_v52 = vmul.f32 0.47942555, %v1485_v14  ;;  %2150 = vperm.xlu1 %2706, %v2124_v20   ;;  %v1533_v4 = vand.u32 2147483648, %v4427_v43  ;;  %vm1532_vm14 = vcmp.eq.f32.partialorder %v4427_v43, 0.0  ;;  %v5068_v6 = vsub.f32 %v4390_v23, %v4286_v16  ;;  %v5069_v12 = vld [vmem:[#allocation23_spill] sm:$0xff] }
 0x2df   : > { %v2828_v9 = vpop.eup %2827  ;;  %2837 = vpow2.f32 %v1618_v56  ;;  %v4501_v55 = vsel %vm5054_vm4, %v1707_v35, 0.0  ;;  %vm5070_vm3 = vnez %v5069_v12  ;;  %vm1537_vm15 = vcmp.eq.f32.partialorder %v4446_v7, inf }
 0x2e0   : > { %v2830_v63 = vpop.eup %2829  ;;  %v1529_v36 = vmul.f32 %v2828_v9, %v4427_v43  ;;  %v1565_v44 = vsub.f32 %v1373_v54, %v1549_v52  ;;  %v1380_v54 = vmul.f32 0.87758255, %v4392_v11  ;;  %v1684_v49 = vmul.f32 1.442695, %v5068_v6 }
 0x2e1   : > { %v2832_v5 = vpop.eup %2831  ;;  %v1714_v38 = vsub.f32 %v2824_v27, %v2830_v63  ;;  %v1540_v17 = vand.u32 2147483648, %v4446_v7  ;;  %v1381_v9 = vmul.f32 0.87758255, %v4413_v33  ;;  %v1158_v33 = vmul.f32 30.0, %v3734_v47 }
 0x2e2   : > { %v1531_v40 = vsel %vm1530_vm12, %v4427_v43, %v1529_v36  ;;  %v1715_v56 = vsub.f32 %v2826_v13, %v2832_v5  ;;  %v2834_v51 = vpop.eup %2833  ;;  %v1581_v39 = vmul.f32 30.0, %v1565_v44  ;;  %2839 = vpow2.f32 %v1684_v49 }
 0x2e3   : > { %v1534_v61 = vsel %vm1532_vm14, %v1533_v4, %v1531_v40  ;;  %v4506_v37 = vsel %vm3636_vm9, %v1714_v38, 0.0  ;;  %v1536_v57 = vmul.f32 %v2834_v51, %v4446_v7  ;;  %vm1539_vm9 = vcmp.eq.f32.partialorder %v4446_v7, 0.0 }
 0x2e4   : > { %v1556_v43 = vmul.f32 0.47942555, %v1534_v61  ;;  %v4514_v59 = vsel %vm3662_vm7, %v1715_v56, 0.0  ;;  %v1597_v27 = vsub.f32 %v1581_v39, %v4286_v16  ;;  %v1854_v11 = vsel %vm5070_vm3, %v1581_v39, 0.0  ;;  %vm5071_vm7 = vmmov %vm5067_vm10  ;;  %v1846_v39 = vld [vmem:[#allocation5 + $0x78] sm:$0xff] }
 0x2e5   : > { %v1870_v13 = vadd.f32 %v1854_v11, %v1838_v26  ;;  %v1538_v23 = vsel %vm1537_vm15, %v4446_v7, %v1536_v57  ;;  %v2836_v63 = vpop.eup %2835  ;;  %v5072_v36 = vsub.f32 %v4397_v31, %v4321_v58  ;;  %v5073_v31 = vsub.f32 %v4418_v10, %v4327_v60  ;;  %vm5074_vm0 = vmmov %vm5071_vm7 }
 0x2e6   : > { %v1572_v14 = vsub.f32 %v1380_v54, %v1556_v43  ;;  %v1620_v20 = vmul.f32 1.442695, %v1597_v27  ;;  %v1541_v53 = vsel %vm1539_vm9, %v1540_v17, %v1538_v23  ;;  %v1166_v43 = vmul.f32 30.0, %v3731_v24  ;;  %vm5075_vm4 = vmmov %vm5074_vm0 }
 0x2e7   : > { %1886 = vst.msk [vmem:[#allocation5 + $0x38] sm:$0xff] %vm5071_vm7, %v1870_v13  ;;  %v1557_v52 = vmul.f32 0.47942555, %v1541_v53  ;;  %v1698_v35 = vmul.f32 1.442695, %v5072_v36  ;;  %v1159_v23 = vmul.f32 30.0, %v3738_v30  ;;  %vm5126_vm2 = vmmov %vm5074_vm0 }
 0x2e8   : > { %v1588_v2 = vmul.f32 30.0, %v1572_v14  ;;  %2841 = vpow2.f32 %v1620_v20  ;;  %v1700_v54 = vmul.f32 1.442695, %v5073_v31  ;;  %v1167_v24 = vmul.f32 30.0, %v3736_v28  ;;  %vm5127_vm10 = vmmov %vm5074_vm0 }
 0x2e9   : > { %v2838_v5 = vpop.eup %2837  ;;  %v1573_v7 = vsub.f32 %v1381_v9, %v1557_v52  ;;  %2843 = vpow2.f32 %v1698_v35  ;;  %vm5128_vm12 = vmmov %vm5074_vm0 }
 0x2ea   : > { %v1604_v44 = vsub.f32 %v1588_v2, %v4321_v58  ;;  %v1861_v4 = vsel %vm4081_vm5, %v1588_v2, 0.0  ;;  %v1708_v38 = vsub.f32 %v2838_v5, %v2836_v63  ;;  %vm5139_vm14 = vmmov %vm5074_vm0 }
 0x2eb   : > { %v1877_v40 = vadd.f32 %v1861_v4, %v1845_v32  ;;  %v1589_v51 = vmul.f32 30.0, %v1573_v7  ;;  %vm5141_vm15 = vmmov %vm5074_vm0 }
 0x2ec   : > { %v1634_v56 = vmul.f32 1.442695, %v1604_v44  ;;  %v4537_v61 = vsel %vm5066_vm11, %v1708_v38, 0.0  ;;  %v2840_v46 = vpop.eup %2839  ;;  %vm5124_vm11 = vmmov %vm5074_vm0 }
 0x2ed   : > { %1893 = vst.msk [vmem:[#allocation5 + $0x70] sm:$0xff] %vm5074_vm0, %v1877_v40  ;;  %v1605_v6 = vsub.f32 %v1589_v51, %v4327_v60  ;;  %v1862_v47 = vsel %vm4097_vm13, %v1589_v51, 0.0  ;;  %v5076_v40 = vld [vmem:[#allocation29_spill] sm:$0xff]  ;;  %v5077_v51 = vld [vmem:[#allocation31_spill] sm:$0xff]  ;;  %vm5146_vm9 = vmmov %vm5074_vm0 }
 0x2ee   : > { %2845 = vpow2.f32 %v1634_v56  ;;  %v1878_v57 = vadd.f32 %v1862_v47, %v1846_v39  ;;  %v1160_v56 = vmul.f32 30.0, %v5076_v40  ;;  %v5082_v40 = vld [vmem:[#allocation34_spill] sm:$0xff]  ;;  %vm5151_vm7 = vmmov %vm5074_vm0 }
 0x2ef   : > { %v1636_v27 = vmul.f32 1.442695, %v1605_v6  ;;  %2847 = vpow2.f32 %v1700_v54 }
 0x2f0   : > { %1894 = vst.msk [vmem:[#allocation5 + $0x78] sm:$0xff] %vm5075_vm4, %v1878_v57  ;;  %v5078_v57 = vld [vmem:[#allocation30_spill] sm:$0xff]  ;;  %vm5152_vm4 = vmmov %vm5074_vm0 }
 0x2f1   : > { %v1177_v26 = vpop.permute.xlu0 %1176  ;;  %2849 = vpow2.f32 %v1636_v27  ;;  %v1168_v27 = vmul.f32 30.0, %v5078_v57 }
 0x2f2   : > { %v1254_v49 = vsub.f32 %v1158_v33, %v1177_v26  ;;  %v2842_v13 = vpop.eup %2841  ;;  %v1161_v33 = vmul.f32 30.0, %v5077_v51 }
 0x2f3   : > { %v1709_v53 = vsub.f32 %v2842_v13, %v2840_v46  ;;  %v2844_v52 = vpop.eup %2843 }
 0x2f4   : > { %v1270_v17 = vmul.f32 1.442695, %v1254_v49 }
 0x2f5   : > { %v1217_v11 = vpop.permute.xlu1 %1216  ;;  %v4549_v9 = vsel %vm5070_vm3, %v1709_v53, 0.0  ;;  %vm5140_vm3 = vmmov %vm5074_vm0 }
 0x2f6   : > { %v1262_v10 = vsub.f32 %v1166_v43, %v1217_v11 }
 0x2f8   : > { %v1286_v14 = vmul.f32 1.442695, %v1262_v10  ;;  %v2846_v36 = vpop.eup %2845  ;;  %v5079_v10 = vld [vmem:[#allocation32_spill] sm:$0xff] }
 0x2f9   : > { %v1182_v20 = vpop.permute.xlu1 %1181  ;;  %v1716_v5 = vsub.f32 %v2846_v36, %v2844_v52  ;;  %v2848_v44 = vpop.eup %2847  ;;  %v1169_v46 = vmul.f32 30.0, %v5079_v10 }
 0x2fa   : > { %2851 = vpow2.f32 %v1286_v14  ;;  %v1255_v2 = vsub.f32 %v1159_v23, %v1182_v20  ;;  %v1222_v63 = vpop.permute.xlu0 %1221 }
 0x2fb   : > { %2853 = vpow2.f32 %v1270_v17  ;;  %v1263_v35 = vsub.f32 %v1167_v24, %v1222_v63  ;;  %v4553_v4 = vsel %vm4081_vm5, %v1716_v5, 0.0  ;;  %v2850_v38 = vpop.eup %2849  ;;  %v5080_v63 = vld [vmem:[#allocation33_spill] sm:$0xff]  ;;  %vm5116_vm5 = vmmov %vm5074_vm0 }
 0x2fc   : > { %v1272_v32 = vmul.f32 1.442695, %v1255_v2  ;;  %v1717_v28 = vsub.f32 %v2850_v38, %v2848_v44  ;;  %v1162_v36 = vmul.f32 30.0, %v5080_v63 }
 0x2fd   : > { %v1288_v30 = vmul.f32 1.442695, %v1263_v35  ;;  %v5081_v35 = vld [vmem:[#allocation35_spill] sm:$0xff] }
 0x2fe   : > { %2855 = vpow2.f32 %v1272_v32  ;;  %v1917_v7 = vpop.permute.xlu0 %1916  ;;  %v4563_v26 = vsel %vm4097_vm13, %v1717_v28, 0.0  ;;  %v1163_v5 = vmul.f32 30.0, %v5081_v35  ;;  %vm5120_vm13 = vmmov %vm5074_vm0 }
 0x2ff   : > { %2857 = vpow2.f32 %v1288_v30  ;;  %1994 = vst [vmem:[%s4556_s17] sm:$0xff] %v1917_v7 }
 0x301   : > { %v1187_v41 = vpop.permute.xlu1 %1186 }
 0x302   : > { %v1192_v31 = vpop.permute.xlu0 %1191  ;;  %v1256_v54 = vsub.f32 %v1160_v56, %v1187_v41  ;;  %v1170_v56 = vmul.f32 30.0, %v5082_v40 }
 0x303   : > { %v1257_v6 = vsub.f32 %v1161_v33, %v1192_v31 }
 0x304   : > { %v2852_v12 = vpop.eup %2851  ;;  %v1274_v47 = vmul.f32 1.442695, %v1256_v54 }
 0x305   : > { %v2854_v39 = vpop.eup %2853  ;;  %1318 = vadd.xlane.f32.xlu0 %v2852_v12  ;;  %v1276_v43 = vmul.f32 1.442695, %v1257_v6  ;;  %v1227_v11 = vpop.permute.xlu1 %1226 }
 0x306   : > { %1302 = vadd.xlane.f32.xlu1 %v2854_v39  ;;  %2859 = vpow2.f32 %v1274_v47  ;;  %v1264_v34 = vsub.f32 %v1168_v27, %v1227_v11  ;;  %v1232_v17 = vpop.permute.xlu0 %1231  ;;  %v5083_v39 = vld [vmem:[#allocation36_spill] sm:$0xff] }
 0x307   : > { %2861 = vpow2.f32 %v1276_v43  ;;  %v1265_v14 = vsub.f32 %v1169_v46, %v1232_v17  ;;  %v1171_v41 = vmul.f32 30.0, %v5083_v39  ;;  %v5084_v46 = vld [vmem:[#allocation37_spill] sm:$0xff]  ;;  %v5085_v17 = vld [vmem:[#allocation39_spill] sm:$0xff] }
 0x308   : > { %v2856_v49 = vpop.eup %2855  ;;  %v1290_v23 = vmul.f32 1.442695, %v1264_v34  ;;  %v1164_v34 = vmul.f32 30.0, %v5084_v46 }
 0x309   : > { %1304 = vadd.xlane.f32.xlu0 %v2856_v49  ;;  %v2858_v13 = vpop.eup %2857  ;;  %v1292_v20 = vmul.f32 1.442695, %v1265_v14  ;;  %v1922_v53 = vpop.permute.xlu1 %1921 }
 0x30a   : > { %1320 = vadd.xlane.f32.xlu1 %v2858_v13  ;;  %2863 = vpow2.f32 %v1290_v23  ;;  %1995 = vst [vmem:[%s4556_s17 + $0x8] sm:$0xff] %v1922_v53  ;;  %v1165_v13 = vmul.f32 30.0, %v5085_v17  ;;  %v2125_v17 = vld [vmem:[#allocation5 + $0x18] sm:$0xff] }
 0x30b   : > { %2865 = vpow2.f32 %v1292_v20 }
 0x310   : > { %v2860_v2 = vpop.eup %2859 }
 0x311   : > { %v2862_v24 = vpop.eup %2861  ;;  %1306 = vadd.xlane.f32.xlu0 %v2860_v2 }
 0x312   : > { %1308 = vadd.xlane.f32.xlu1 %v2862_v24 }
 0x314   : > { %v2864_v52 = vpop.eup %2863 }
 0x315   : > { %v2866_v32 = vpop.eup %2865  ;;  %1322 = vadd.xlane.f32.xlu0 %v2864_v52  ;;  %v5086_v52 = vld [vmem:[#allocation38_spill] sm:$0xff] }
 0x316   : > { %1324 = vadd.xlane.f32.xlu1 %v2866_v32  ;;  %v1172_v32 = vmul.f32 30.0, %v5086_v52  ;;  %v2133_v52 = vld [vmem:[#allocation5 + $0x58] sm:$0xff] }
 0x31e   : > { %v1197_v30 = vpop.permute.xlu1 %1196  ;;  %v1202_v44 = vpop.permute.xlu0 %1201 }
 0x31f   : > { %v1258_v7 = vsub.f32 %v1162_v36, %v1197_v30  ;;  %v1259_v38 = vsub.f32 %v1163_v5, %v1202_v44  ;;  %v5087_v36 = vld [vmem:[#allocation40_spill] sm:$0xff] }
 0x320   : > { %v1173_v35 = vmul.f32 30.0, %v5087_v36  ;;  %v5089_v36 = vld [vmem:[#allocation45_spill] sm:$0xff] }
 0x321   : > { %v1278_v28 = vmul.f32 1.442695, %v1258_v7  ;;  %v1280_v12 = vmul.f32 1.442695, %v1259_v38 }
 0x322   : > { %v1237_v51 = vpop.permute.xlu1 %1236 }
 0x323   : > { %2867 = vpow2.f32 %v1278_v28  ;;  %v1266_v33 = vsub.f32 %v1170_v56, %v1237_v51 }
 0x324   : > { %2869 = vpow2.f32 %v1280_v12  ;;  %v1242_v31 = vpop.permute.xlu0 %1241 }
 0x325   : > { %v1294_v54 = vmul.f32 1.442695, %v1266_v33  ;;  %v1267_v6 = vsub.f32 %v1171_v41, %v1242_v31 }
 0x326   : > { %v1927_v49 = vpop.permute.xlu1 %1926 }
 0x327   : > { %2871 = vpow2.f32 %v1294_v54  ;;  %v1296_v47 = vmul.f32 1.442695, %v1267_v6  ;;  %1996 = vst [vmem:[%s4556_s17 + $0x10] sm:$0xff] %v1927_v49 }
 0x328   : > { %v1932_v43 = vpop.permute.xlu0 %1931 }
 0x329   : > { %2873 = vpow2.f32 %v1296_v47  ;;  %1997 = vst [vmem:[%s4556_s17 + $0x18] sm:$0xff] %v1932_v43 }
 0x32d   : > { %v2868_v57 = vpop.eup %2867 }
 0x32e   : > { %v2870_v27 = vpop.eup %2869  ;;  %1310 = vadd.xlane.f32.xlu0 %v2868_v57 }
 0x32f   : > { %1312 = vadd.xlane.f32.xlu1 %v2870_v27 }
 0x331   : > { %v2872_v11 = vpop.eup %2871 }
 0x332   : > { %1326 = vadd.xlane.f32.xlu0 %v2872_v11 }
 0x333   : > { %v2874_v10 = vpop.eup %2873 }
 0x334   : > { %1328 = vadd.xlane.f32.xlu1 %v2874_v10 }
 0x335   : > { %v1207_v14 = vpop.permute.xlu1 %1206 }
 0x336   : > { %v1212_v23 = vpop.permute.xlu0 %1211  ;;  %v1260_v20 = vsub.f32 %v1164_v34, %v1207_v14  ;;  %v2126_v34 = vld [vmem:[#allocation5 + $0x20] sm:$0xff]  ;;  %v2127_v14 = vld [vmem:[#allocation5 + $0x28] sm:$0xff] }
 0x337   : > { %v1261_v53 = vsub.f32 %v1165_v13, %v1212_v23  ;;  %v2128_v13 = vld [vmem:[#allocation5 + $0x30] sm:$0xff]  ;;  %v2130_v23 = vld [vmem:[#allocation5 + $0x40] sm:$0xff] }
 0x338   : > { %v1282_v2 = vmul.f32 1.442695, %v1260_v20  ;;  %v2129_v20 = vld [vmem:[#allocation5 + $0x38] sm:$0xff] }
 0x339   : > { %v1284_v24 = vmul.f32 1.442695, %v1261_v53  ;;  %v2132_v53 = vld [vmem:[#allocation5 + $0x50] sm:$0xff] }
 0x33a   : > { %2875 = vpow2.f32 %v1282_v2  ;;  %v2131_v2 = vld [vmem:[#allocation5 + $0x48] sm:$0xff] }
 0x33b   : > { %2877 = vpow2.f32 %v1284_v24  ;;  %v2134_v24 = vld [vmem:[#allocation5 + $0x60] sm:$0xff] }
 0x33d   : > { %v1247_v63 = vpop.permute.xlu1 %1246  ;;  %v1252_v30 = vpop.permute.xlu0 %1251 }
 0x33e   : > { %v1268_v5 = vsub.f32 %v1172_v32, %v1247_v63  ;;  %v1269_v44 = vsub.f32 %v1173_v35, %v1252_v30  ;;  %v2135_v32 = vld [vmem:[#allocation5 + $0x68] sm:$0xff]  ;;  %v5088_v63 = vld [vmem:[#allocation43_spill] sm:$0xff] }
 0x33f   : > { %v5090_v35 = vsub.f32 %v5088_v63, %v5089_v36  ;;  %v5091_v30 = vld [vmem:[#allocation41_spill] sm:$0xff]  ;;  %v5109_v63 = vsub.f32 %v4226_v45, %v4121_v1 }
 0x340   : > { %v1298_v7 = vmul.f32 1.442695, %v1268_v5  ;;  %v1300_v38 = vmul.f32 1.442695, %v1269_v44  ;;  %v5092_v44 = vld [vmem:[#allocation42_spill] sm:$0xff] }
 0x341   : > { %v1957_v28 = vpop.permute.xlu1 %1956  ;;  %v1962_v12 = vpop.permute.xlu0 %1961  ;;  %v1142_v5 = vmul.f32 1.442695, %v5090_v35  ;;  %v1726_v35 = vsel %vm3622_vm8, %v5109_v63, 0.0  ;;  %vm5119_vm8 = vmmov %vm5074_vm0 }
 0x342   : > { %2879 = vpow2.f32 %v1298_v7  ;;  %2002 = vst [vmem:[%s4556_s17 + $0x40] sm:$0xff] %v1957_v28  ;;  %2003 = vst [vmem:[%s4556_s17 + $0x48] sm:$0xff] %v1962_v12  ;;  %v5093_v7 = vsub.f32 %v5091_v30, %v5092_v44  ;;  %v5094_v28 = vld [vmem:[#allocation44_spill] sm:$0xff]  ;;  %v5095_v12 = vld [vmem:[#allocation46_spill] sm:$0xff] }
 0x343   : > { %2881 = vpow2.f32 %v1300_v38  ;;  %v5111_v30 = vld [vmem:[#allocation54_spill] sm:$0xff]  ;;  %v5112_v44 = vld [vmem:[#allocation56_spill] sm:$0xff] }
 0x344   : > { %v2876_v51 = vpop.eup %2875  ;;  %v1126_v38 = vmul.f32 1.442695, %v5093_v7  ;;  %2883 = vpow2.f32 %v1142_v5  ;;  %v5113_v7 = vsub.f32 %v5111_v30, %v5112_v44 }
 0x345   : > { %v1937_v40 = vpop.permute.xlu1 %1936  ;;  %v1972_v56 = vpop.permute.xlu0 %1971  ;;  %1314 = vadd.xlane.f32.xlu0 %v2876_v51  ;;  %v5097_v51 = vld [vmem:[#allocation47_spill] sm:$0xff] }
 0x346   : > { %1998 = vst [vmem:[%s4556_s17 + $0x20] sm:$0xff] %v1937_v40  ;;  %2005 = vst [vmem:[%s4556_s17 + $0x58] sm:$0xff] %v1972_v56  ;;  %v2878_v33 = vpop.eup %2877  ;;  %v5096_v40 = vsub.f32 %v5094_v28, %v5095_v12  ;;  %2885 = vpow2.f32 %v1126_v38  ;;  %v1148_v38 = vmul.f32 1.442695, %v5113_v7 }
 0x347   : > { %1316 = vadd.xlane.f32.xlu1 %v2878_v33  ;;  %v5098_v33 = vld [vmem:[#allocation48_spill] sm:$0xff] }
 0x348   : > { %v1128_v56 = vmul.f32 1.442695, %v5096_v40 }
 0x349   : > { %v1967_v39 = vpop.permute.xlu1 %1966  ;;  %v1942_v41 = vpop.permute.xlu0 %1941 }
 0x34a   : > { %2004 = vst [vmem:[%s4556_s17 + $0x50] sm:$0xff] %v1967_v39  ;;  %1999 = vst [vmem:[%s4556_s17 + $0x28] sm:$0xff] %v1942_v41  ;;  %v5099_v39 = vsub.f32 %v5097_v51, %v5098_v33  ;;  %2887 = vpow2.f32 %v1128_v56  ;;  %v1743_v56 = vld [vmem:[#allocation4 + $0x48] sm:$0xff] }
 0x34c   : > { %v2880_v31 = vpop.eup %2879  ;;  %v1144_v41 = vmul.f32 1.442695, %v5099_v39  ;;  %v5114_v39 = vsub.f32 %v4211_v15, %v4018_v8  ;;  %v5121_v15 = vsub.f32 %v4304_v19, %v4199_v0 }
 0x34d   : > { %v2882_v54 = vpop.eup %2881  ;;  %1330 = vadd.xlane.f32.xlu0 %v2880_v31  ;;  %v1977_v6 = vpop.permute.xlu1 %1976 }
 0x34e   : > { %2006 = vst [vmem:[%s4556_s17 + $0x60] sm:$0xff] %v1977_v6  ;;  %1332 = vadd.xlane.f32.xlu1 %v2882_v54  ;;  %v1982_v49 = vpop.permute.xlu0 %1981  ;;  %2889 = vpow2.f32 %v1144_v41  ;;  %v2884_v31 = vpop.eup %2883  ;;  %v1742_v54 = vld [vmem:[#allocation4 + $0x40] sm:$0xff]  ;;  %v5100_v6 = vld [vmem:[#allocation49_spill] sm:$0xff]  ;;  %v1718_v1 = vsel %vm3643_vm1, %v5114_v39, 0.0  ;;  %v5132_v39 = vld [vmem:[#allocation58_spill] sm:$0xff] }
 0x34f   : > { %2007 = vst [vmem:[%s4556_s17 + $0x68] sm:$0xff] %v1982_v49  ;;  %v5101_v49 = vld [vmem:[#allocation51_spill] sm:$0xff]  ;;  %v5133_v41 = vld [vmem:[#allocation61_spill] sm:$0xff] }
 0x351   : > { %v1947_v47 = vpop.permute.xlu1 %1946 }
 0x352   : > { %2000 = vst [vmem:[%s4556_s17 + $0x30] sm:$0xff] %v1947_v47  ;;  %v1952_v43 = vpop.permute.xlu0 %1951  ;;  %v5102_v47 = vsub.f32 %v5100_v6, %v5101_v49 }
 0x353   : > { %2001 = vst [vmem:[%s4556_s17 + $0x38] sm:$0xff] %v1952_v43 }
 0x354   : > { %v1130_v43 = vmul.f32 1.442695, %v5102_v47 }
 0x355   : > { %v1987_v57 = vpop.permute.xlu1 %1986 }
 0x356   : > { %2008 = vst [vmem:[%s4556_s17 + $0x70] sm:$0xff] %v1987_v57  ;;  %v1992_v27 = vpop.permute.xlu0 %1991  ;;  %v2886_v57 = vpop.eup %2885  ;;  %2891 = vpow2.f32 %v1130_v43 }
 0x357   : > { %2009 = vst [vmem:[%s4556_s17 + $0x78] sm:$0xff] %v1992_v27  ;;  %v5103_v27 = vld [vmem:[#allocation50_spill] sm:$0xff] }
 0x359   : > { %v2141_v11 = vpop.permute.xlu1 %2140 }
 0x35a   : > { %2218 = vst [vmem:[%s4591_s9] sm:$0xff] %v2141_v11  ;;  %v2146_v10 = vpop.permute.xlu0 %2145  ;;  %v5104_v11 = vld [vmem:[#allocation52_spill] sm:$0xff] }
 0x35b   : > { %2219 = vst [vmem:[%s4591_s9 + $0x8] sm:$0xff] %v2146_v10  ;;  %v5105_v10 = vsub.f32 %v5103_v27, %v5104_v11  ;;  %v5122_v27 = vld [vmem:[#allocation27_spill] sm:$0xff] }
 0x35c   : > { %vm5123_vm1 = vnez %v5122_v27  ;;  %v1738_v27 = vld [vmem:[#allocation4 + $0x20] sm:$0xff] }
 0x35d   : > { %v2151_v46 = vpop.permute.xlu1 %2150  ;;  %v1727_v11 = vsel %vm5123_vm1, %v5121_v15, 0.0 }
 0x35e   : > { %2220 = vst [vmem:[%s4591_s9 + $0x10] sm:$0xff] %v2151_v46  ;;  %v1132_v46 = vmul.f32 1.442695, %v5105_v10 }
 0x35f   : > { %2160 = vperm.xlu1 %2706, %v2126_v34   ;;  %v1734_v34 = vld [vmem:[#allocation4] sm:$0xff] }
 0x360   : > { %2893 = vpow2.f32 %v1132_v46 }
 0x363   : > { %2155 = vperm.xlu0 %2705, %v2125_v17   ;;  %2170 = vperm.xlu1 %2706, %v2128_v13   ;;  %v1758_v17 = vmul.f32 %v2884_v31, %v1742_v54  ;;  %v2888_v13 = vpop.eup %2887  ;;  %v5117_v54 = vsub.f32 %v4255_v18, %v4136_v42  ;;  %v1736_v18 = vld [vmem:[#allocation4 + $0x10] sm:$0xff] }
 0x364   : > { %v2890_v5 = vpop.eup %2889 }
 0x365   : > { %v1719_v49 = vsel %vm3515_vm6, %v5117_v54, 0.0  ;;  %v1759_v47 = vmul.f32 %v2890_v5, %v1743_v56  ;;  %v2892_v42 = vpop.eup %2891  ;;  %vm5125_vm6 = vmmov %vm5074_vm0 }
 0x367   : > { %2165 = vperm.xlu0 %2705, %v2127_v14   ;;  %2180 = vperm.xlu1 %2706, %v2130_v23   ;;  %v1735_v23 = vld [vmem:[#allocation4 + $0x8] sm:$0xff] }
 0x368   : > { %v1751_v40 = vmul.f32 %v2888_v13, %v1735_v23  ;;  %v1752_v13 = vmul.f32 %v2892_v42, %v1736_v18 }
 0x36a   : > { %v2894_v46 = vpop.eup %2893 }
 0x36b   : > { %2175 = vperm.xlu0 %2705, %v2129_v20   ;;  %2190 = vperm.xlu1 %2706, %v2132_v53   ;;  %v5106_v53 = vld [vmem:[#allocation53_spill] sm:$0xff] }
 0x36f   : > { %2185 = vperm.xlu0 %2705, %v2131_v2   ;;  %2200 = vperm.xlu1 %2706, %v2134_v24   ;;  %v5107_v2 = vld [vmem:[#allocation55_spill] sm:$0xff] }
 0x370   : > { %v5108_v24 = vsub.f32 %v5106_v53, %v5107_v2  ;;  %v1744_v53 = vld [vmem:[#allocation4 + $0x50] sm:$0xff] }
 0x373   : > { %2195 = vperm.xlu0 %2705, %v2133_v52   ;;  %v1146_v52 = vmul.f32 1.442695, %v5108_v24 }
 0x375   : > { %2895 = vpow2.f32 %v1146_v52 }
 0x376   : > { %2897 = vpow2.f32 %v1148_v38 }
 0x377   : > { %2205 = vperm.xlu0 %2705, %v2135_v32   ;;  %v1750_v32 = vmul.f32 %v2886_v57, %v1734_v34  ;;  %v1737_v34 = vld [vmem:[#allocation4 + $0x18] sm:$0xff] }
 0x392   : > { %v1319_v14 = vpop.xlane.xlu0 %1318 }
 0x393   : > { %v1774_v20 = vadd.f32 %v1758_v17, %v1319_v14  ;;  %v1303_v28 = vpop.xlane.xlu1 %1302  ;;  %v2896_v14 = vpop.eup %2895 }
 0x394   : > { %v1766_v51 = vadd.f32 %v1750_v32, %v1303_v28  ;;  %v2898_v24 = vpop.eup %2897  ;;  %v1745_v32 = vld [vmem:[#allocation4 + $0x58] sm:$0xff] }
 0x395   : > { %v1790_v12 = vadd.f32 %v1774_v20, %v1726_v35  ;;  %v1753_v20 = vmul.f32 %v2894_v46, %v1737_v34  ;;  %v1760_v35 = vmul.f32 %v2896_v14, %v1744_v53  ;;  %v1761_v44 = vmul.f32 %v2898_v24, %v1745_v32  ;;  %v1746_v34 = vld [vmem:[#allocation4 + $0x60] sm:$0xff] }
 0x396   : > { %v1305_v33 = vpop.xlane.xlu0 %1304  ;;  %v1782_v31 = vadd.f32 %v1766_v51, %v1718_v1  ;;  %v5134_v1 = vsub.f32 %v5132_v39, %v5133_v41 }
 0x397   : > { %1807 = vst.msk [vmem:[#allocation4 + $0x40] sm:$0xff] %vm5116_vm5, %v1790_v12  ;;  %v1767_v45 = vadd.f32 %v1751_v40, %v1305_v33  ;;  %v1321_v57 = vpop.xlane.xlu1 %1320  ;;  %vm5153_vm5 = vmmov %vm5074_vm0 }
 0x398   : > { %1799 = vst.msk [vmem:[#allocation4] sm:$0xff] %vm5119_vm8, %v1782_v31  ;;  %v1775_v8 = vadd.f32 %v1759_v47, %v1321_v57  ;;  %v5137_v47 = vld [vmem:[#allocation62_spill] sm:$0xff] }
 0x399   : > { %v1783_v43 = vadd.f32 %v1767_v45, %v1719_v49  ;;  %v1136_v45 = vmul.f32 1.442695, %v5134_v1 }
 0x39a   : > { %v1791_v10 = vadd.f32 %v1775_v8, %v1727_v11 }
 0x39b   : > { %1800 = vst.msk [vmem:[#allocation4 + $0x8] sm:$0xff] %vm5120_vm13, %v1783_v43  ;;  %v5138_v43 = vsub.f32 %v5137_v47, %v4162_v3  ;;  %v1747_v3 = vld [vmem:[#allocation4 + $0x68] sm:$0xff] }
 0x39c   : > { %1808 = vst.msk [vmem:[#allocation4 + $0x48] sm:$0xff] %vm5124_vm11, %v1791_v10  ;;  %v1739_v10 = vld [vmem:[#allocation4 + $0x28] sm:$0xff] }
 0x39d   : > { %v1152_v57 = vmul.f32 1.442695, %v5138_v43 }
 0x39e   : > { %v1307_v23 = vpop.xlane.xlu0 %1306  ;;  %v2018_v52 = vld [vmem:[#allocation4 + $0x40] sm:$0xff] }
 0x39f   : > { %v2010_v17 = vld [vmem:[#allocation4] sm:$0xff]  ;;  %v1768_v0 = vadd.f32 %v1752_v13, %v1307_v23  ;;  %v1309_v19 = vpop.xlane.xlu1 %1308 }
 0x3a0   : > { %2028 = vperm.xlu1 %2706, %v2010_v17   ;;  %v1769_v63 = vadd.f32 %v1753_v20, %v1309_v19 }
 0x3a1   : > { %v1784_v36 = vadd.f32 %v1768_v0, %v4469_v22  ;;  %v5129_v22 = vld [vmem:[#allocation57_spill] sm:$0xff] }
 0x3a2   : > { %v2011_v2 = vld [vmem:[#allocation4 + $0x8] sm:$0xff]  ;;  %v1785_v5 = vadd.f32 %v1769_v63, %v4476_v29  ;;  %v1323_v30 = vpop.xlane.xlu0 %1322  ;;  %v5130_v29 = vld [vmem:[#allocation60_spill] sm:$0xff] }
 0x3a3   : > { %2033 = vperm.xlu0 %2705, %v2011_v2   ;;  %v2019_v7 = vld [vmem:[#allocation4 + $0x48] sm:$0xff]  ;;  %1801 = vst.msk [vmem:[#allocation4 + $0x10] sm:$0xff] %vm5125_vm6, %v1784_v36  ;;  %v1776_v38 = vadd.f32 %v1760_v35, %v1323_v30  ;;  %v1325_v28 = vpop.xlane.xlu1 %1324  ;;  %v5131_v51 = vsub.f32 %v5129_v22, %v5130_v29  ;;  %v5142_v35 = vld [vmem:[#allocation63_spill] sm:$0xff]  ;;  %v1740_v29 = vld [vmem:[#allocation4 + $0x30] sm:$0xff] }
 0x3a4   : > { %2068 = vperm.xlu1 %2706, %v2018_v52   ;;  %1802 = vst.msk [vmem:[#allocation4 + $0x18] sm:$0xff] %vm5126_vm2, %v1785_v5  ;;  %v1777_v12 = vadd.f32 %v1761_v44, %v1325_v28 }
 0x3a5   : > { %v1792_v40 = vadd.f32 %v1776_v38, %v4480_v25  ;;  %v1134_v33 = vmul.f32 1.442695, %v5131_v51  ;;  %v5135_v25 = vld [vmem:[#allocation59_spill] sm:$0xff] }
 0x3a6   : > { %v1793_v56 = vadd.f32 %v1777_v12, %v4489_v50  ;;  %v5136_v50 = vsub.f32 %v5135_v25, %v4132_v21  ;;  %v5149_v12 = vld [vmem:[#allocation66_spill] sm:$0xff] }
 0x3a7   : > { %2073 = vperm.xlu0 %2705, %v2019_v7   ;;  %1809 = vst.msk [vmem:[#allocation4 + $0x50] sm:$0xff] %vm5127_vm10, %v1792_v40  ;;  %2899 = vpow2.f32 %v1134_v33  ;;  %v1741_v33 = vld [vmem:[#allocation4 + $0x38] sm:$0xff] }
 0x3a8   : > { %1810 = vst.msk [vmem:[#allocation4 + $0x58] sm:$0xff] %vm5128_vm12, %v1793_v56  ;;  %v1150_v6 = vmul.f32 1.442695, %v5136_v50  ;;  %2901 = vpow2.f32 %v1136_v45  ;;  %v1749_v50 = vld [vmem:[#allocation4 + $0x78] sm:$0xff] }
 0x3aa   : > { %v2012_v31 = vld [vmem:[#allocation4 + $0x10] sm:$0xff]  ;;  %2903 = vpow2.f32 %v1150_v6 }
 0x3ab   : > { %2038 = vperm.xlu1 %2706, %v2012_v31   ;;  %v2013_v54 = vld [vmem:[#allocation4 + $0x18] sm:$0xff]  ;;  %2905 = vpow2.f32 %v1152_v57 }
 0x3ac   : > { %2043 = vperm.xlu0 %2705, %v2013_v54   ;;  %v1748_v54 = vld [vmem:[#allocation4 + $0x70] sm:$0xff] }
 0x3ae   : > { %v2020_v49 = vld [vmem:[#allocation4 + $0x50] sm:$0xff] }
 0x3af   : > { %2078 = vperm.xlu1 %2706, %v2020_v49   ;;  %v2021_v8 = vld [vmem:[#allocation4 + $0x58] sm:$0xff] }
 0x3b0   : > { %2083 = vperm.xlu0 %2705, %v2021_v8  }
 0x3b1   : > { %v2900_v15 = vpop.eup %2899 }
 0x3b2   : > { %v2902_v11 = vpop.eup %2901  ;;  %v1754_v42 = vmul.f32 %v2900_v15, %v1738_v27 }
 0x3b3   : > { %v1755_v21 = vmul.f32 %v2902_v11, %v1739_v10 }
 0x3b4   : > { %v2904_v18 = vpop.eup %2903 }
 0x3b5   : > { %v2906_v14 = vpop.eup %2905  ;;  %v1762_v53 = vmul.f32 %v2904_v18, %v1746_v34 }
 0x3b6   : > { %v1763_v19 = vmul.f32 %v2906_v14, %v1747_v3 }
 0x3bb   : > { %v1311_v46 = vpop.xlane.xlu0 %1310 }
 0x3bc   : > { %v1770_v17 = vadd.f32 %v1754_v42, %v1311_v46  ;;  %v1313_v13 = vpop.xlane.xlu1 %1312 }
 0x3bd   : > { %v1771_v23 = vadd.f32 %v1755_v21, %v1313_v13  ;;  %v2136_v13 = vld [vmem:[#allocation5 + $0x70] sm:$0xff] }
 0x3be   : > { %v1786_v20 = vadd.f32 %v1770_v17, %v4495_v48  ;;  %v5143_v48 = vsub.f32 %v5142_v35, %v4283_v62  ;;  %v5150_v62 = vsub.f32 %v5149_v12, %v4327_v60 }
 0x3bf   : > { %v1787_v2 = vadd.f32 %v1771_v23, %v4501_v55  ;;  %v1327_v24 = vpop.xlane.xlu0 %1326  ;;  %v5144_v55 = vld [vmem:[#allocation64_spill] sm:$0xff]  ;;  %v2137_v23 = vld [vmem:[#allocation5 + $0x78] sm:$0xff] }
 0x3c0   : > { %1803 = vst.msk [vmem:[#allocation4 + $0x20] sm:$0xff] %vm5139_vm14, %v1786_v20  ;;  %v1778_v0 = vadd.f32 %v1762_v53, %v1327_v24  ;;  %v1138_v5 = vmul.f32 1.442695, %v5143_v48  ;;  %v5145_v30 = vsub.f32 %v5144_v55, %v4286_v16  ;;  %v1156_v40 = vmul.f32 1.442695, %v5150_v62 }
 0x3c1   : > { %1804 = vst.msk [vmem:[#allocation4 + $0x28] sm:$0xff] %vm5140_vm3, %v1787_v2  ;;  %v1329_v52 = vpop.xlane.xlu1 %1328 }
 0x3c2   : > { %v1794_v32 = vadd.f32 %v1778_v0, %v4506_v37  ;;  %v1779_v63 = vadd.f32 %v1763_v19, %v1329_v52  ;;  %v1140_v44 = vmul.f32 1.442695, %v5145_v30  ;;  %2907 = vpow2.f32 %v1138_v5  ;;  %v5147_v37 = vld [vmem:[#allocation65_spill] sm:$0xff] }
 0x3c3   : > { %v5148_v28 = vsub.f32 %v5147_v37, %v4321_v58 }
 0x3c4   : > { %1811 = vst.msk [vmem:[#allocation4 + $0x60] sm:$0xff] %vm5141_vm15, %v1794_v32  ;;  %v1795_v36 = vadd.f32 %v1779_v63, %v4514_v59  ;;  %2909 = vpow2.f32 %v1140_v44 }
 0x3c5   : > { %v1154_v59 = vmul.f32 1.442695, %v5148_v28 }
 0x3c6   : > { %1812 = vst.msk [vmem:[#allocation4 + $0x68] sm:$0xff] %vm5146_vm9, %v1795_v36 }
 0x3c7   : > { %v2014_v7 = vld [vmem:[#allocation4 + $0x20] sm:$0xff]  ;;  %2911 = vpow2.f32 %v1154_v59 }
 0x3c8   : > { %2048 = vperm.xlu1 %2706, %v2014_v7   ;;  %v2015_v38 = vld [vmem:[#allocation4 + $0x28] sm:$0xff]  ;;  %2913 = vpow2.f32 %v1156_v40 }
 0x3c9   : > { %2053 = vperm.xlu0 %2705, %v2015_v38  }
 0x3cb   : > { %v2022_v56 = vld [vmem:[#allocation4 + $0x60] sm:$0xff] }
 0x3cc   : > { %2088 = vperm.xlu1 %2706, %v2022_v56   ;;  %v2908_v22 = vpop.eup %2907 }
 0x3cd   : > { %v2023_v16 = vld [vmem:[#allocation4 + $0x68] sm:$0xff]  ;;  %v1756_v39 = vmul.f32 %v2908_v22, %v1740_v29 }
 0x3ce   : > { %2093 = vperm.xlu0 %2705, %v2023_v16   ;;  %v2910_v51 = vpop.eup %2909 }
 0x3cf   : > { %v1757_v1 = vmul.f32 %v2910_v51, %v1741_v33 }
 0x3d1   : > { %v2912_v45 = vpop.eup %2911 }
 0x3d2   : > { %v1315_v41 = vpop.xlane.xlu0 %1314  ;;  %v2914_v25 = vpop.eup %2913  ;;  %v1764_v47 = vmul.f32 %v2912_v45, %v1748_v54 }
 0x3d3   : > { %v1772_v58 = vadd.f32 %v1756_v39, %v1315_v41  ;;  %v1765_v57 = vmul.f32 %v2914_v25, %v1749_v50 }
 0x3d4   : > { %v1317_v31 = vpop.xlane.xlu1 %1316 }
 0x3d5   : > { %v1773_v60 = vadd.f32 %v1757_v1, %v1317_v31  ;;  %v1788_v6 = vadd.f32 %v1772_v58, %v4537_v61 }
 0x3d7   : > { %v1789_v49 = vadd.f32 %v1773_v60, %v4549_v9  ;;  %1805 = vst.msk [vmem:[#allocation4 + $0x30] sm:$0xff] %vm5151_vm7, %v1788_v6 }
 0x3d9   : > { %1806 = vst.msk [vmem:[#allocation4 + $0x38] sm:$0xff] %vm5074_vm0, %v1789_v49 }
 0x3da   : > { %v1331_v43 = vpop.xlane.xlu0 %1330 }
 0x3db   : > { %v1780_v8 = vadd.f32 %v1764_v47, %v1331_v43  ;;  %v1333_v15 = vpop.xlane.xlu1 %1332 }
 0x3dc   : > { %v1781_v27 = vadd.f32 %v1765_v57, %v1333_v15 }
 0x3dd   : > { %v1796_v11 = vadd.f32 %v1780_v8, %v4553_v4 }
 0x3de   : > { %v1797_v10 = vadd.f32 %v1781_v27, %v4563_v26  ;;  %v2016_v9 = vld [vmem:[#allocation4 + $0x30] sm:$0xff] }
 0x3df   : > { %1813 = vst.msk [vmem:[#allocation4 + $0x70] sm:$0xff] %vm5152_vm4, %v1796_v11  ;;  %v2161_v61 = vpop.permute.xlu1 %2160  ;;  %2058 = vperm.xlu1 %2706, %v2016_v9  }
 0x3e0   : > { %1814 = vst.msk [vmem:[#allocation4 + $0x78] sm:$0xff] %vm5153_vm5, %v1797_v10  ;;  %2222 = vst [vmem:[%s4591_s9 + $0x20] sm:$0xff] %v2161_v61  ;;  %v2017_v18 = vld [vmem:[#allocation4 + $0x38] sm:$0xff] }
 0x3e1   : > { %2063 = vperm.xlu0 %2705, %v2017_v18  }
 0x3e2   : > { %v2156_v42 = vpop.permute.xlu0 %2155 }
 0x3e3   : > { %2221 = vst [vmem:[%s4591_s9 + $0x18] sm:$0xff] %v2156_v42  ;;  %v2171_v46 = vpop.permute.xlu1 %2170 }
 0x3e4   : > { %2224 = vst [vmem:[%s4591_s9 + $0x30] sm:$0xff] %v2171_v46 }
 0x3e6   : > { %v2166_v4 = vpop.permute.xlu0 %2165  ;;  %v2024_v21 = vld [vmem:[#allocation4 + $0x70] sm:$0xff] }
 0x3e7   : > { %2223 = vst [vmem:[%s4591_s9 + $0x28] sm:$0xff] %v2166_v4  ;;  %v2181_v26 = vpop.permute.xlu1 %2180  ;;  %2098 = vperm.xlu1 %2706, %v2024_v21   ;;  %v2025_v34 = vld [vmem:[#allocation4 + $0x78] sm:$0xff] }
 0x3e8   : > { %2226 = vst [vmem:[%s4591_s9 + $0x40] sm:$0xff] %v2181_v26  ;;  %2103 = vperm.xlu0 %2705, %v2025_v34  }
 0x3ea   : > { %v2176_v17 = vpop.permute.xlu0 %2175 }
 0x3eb   : > { %2225 = vst [vmem:[%s4591_s9 + $0x38] sm:$0xff] %v2176_v17  ;;  %v2191_v14 = vpop.permute.xlu1 %2190  ;;  %2210 = vperm.xlu1 %2706, %v2136_v13  }
 0x3ec   : > { %2228 = vst [vmem:[%s4591_s9 + $0x50] sm:$0xff] %v2191_v14  ;;  %2215 = vperm.xlu0 %2705, %v2137_v23  }
 0x3ee   : > { %v2186_v3 = vpop.permute.xlu0 %2185 }
 0x3ef   : > { %2227 = vst [vmem:[%s4591_s9 + $0x48] sm:$0xff] %v2186_v3  ;;  %v2201_v20 = vpop.permute.xlu1 %2200 }
 0x3f0   : > { %2230 = vst [vmem:[%s4591_s9 + $0x60] sm:$0xff] %v2201_v20 }
 0x3f2   : > { %v2196_v53 = vpop.permute.xlu0 %2195 }
 0x3f3   : > { %2229 = vst [vmem:[%s4591_s9 + $0x58] sm:$0xff] %v2196_v53 }
 0x3f4   : > { %2987 = shalt.err (!%p2984_p0)
}
 0x3f5   : > { %s2988_s13 = scalar_lea.hbm %s4708_s6, 2048  ;;  %s2992_s27 = scalar_lea.hbm %s4864_s3, 4096 }
 0x3f6   : > { %p2989_p2 = scmp.ne.s32.totalorder %s4708_s6, %s2988_s13  ;;  %p2993_p5 = scmp.lt.u32.totalorder %s4708_s6, %s4864_s3 }
 0x3f7   : > { %p2994_p9 = scmp.lt.u32.totalorder %s2992_s27, %s2988_s13  ;;  %p2996_p11 = scmp.lt.u32.totalorder %s2988_s13, %s4708_s6 }
 0x3f8   : > { %p2990_p7 = pnand %p2989_p2, %p5154_p13 }
 0x3f9   : > { %p2995_p10 = por %p2994_p9, %p2993_p5 }
 0x3fa   : > { %p2991_p12 = pneg %p2990_p7 }
 0x3fb   : > { %p2997_p4 = por %p2996_p11, %p2995_p10 }
 0x3fd   : > { %p2998_p1 = pnand %p2997_p4, %p2991_p12 }
 0x3ff   : > { %3001 = shalt.err (!%p2998_p1)
}
 0x400   : > { %s3133_s21 = smov 128   ;;  %s3134_s7 = smov 8   ;;  %v2206_v2 = vpop.permute.xlu0 %2205 }
 0x401   : > { %2618 = dma.vmem_to_hbm [thread:$0]  (%p5154_p13), %s4711_s12, 2048, %s4708_s6, %s2235_s14, %s3133_s21, %s3133_s21, %s3134_s7  }
 0x402   : > { %2231 = vst [vmem:[%s4591_s9 + $0x68] sm:$0xff] %v2206_v2  ;;  %s4743_s23 = scalar_lea.vmem [#allocation12], %s3329_s26  ;;  %s2239_s16 = sand.u32 1, %s3198_s24  }
 0x403   : > { %s2276_s26 = sshll.u32 %s4743_s23, 4  ;;  %s4765_s14 = scalar_lea.hbm %s4865_s4, %s4700_s8  ;;  %s4767_s26 = int_to_ptr.vmem [resolvable:$true] %s2276_s26 }
 0x404   : > { %s2293_s13 = sshll.u32 %s4591_s9, 4  ;;  %s4772_s25 = scalar_lea.sflag [#allocation13], %s2239_s16  ;;  %s4807_s13 = int_to_ptr.vmem [resolvable:$true] %s2293_s13 }
 0x405   : > { %s3002_s24 = scalar_lea.vmem %s4767_s26, 2048  ;;  %s3135_s17 = smov [#allocation12]  }
 0x406   : > { %p3003_p3 = scmp.ne.s32.totalorder %s4767_s26, %s3002_s24  ;;  %s3006_s27 = sshll.u32 %s3135_s17, 4  ;;  %s3007_s27 = int_to_ptr.vmem [resolvable:$false] %s3006_s27 }
 0x407   : > { %s3008_s30 = scalar_lea.vmem %s3007_s27, 4096  ;;  %p3009_p0 = scmp.lt.s32.totalorder %s4767_s26, %s3007_s27 }
 0x408   : > { %p3004_p6 = pnand %p3003_p3, %p5154_p13  ;;  %p3010_p2 = scmp.lt.s32.totalorder %s3008_s30, %s3002_s24 }
 0x40a   : > { %p3005_p8 = pneg %p3004_p6  ;;  %p3011_p7 = por %p3010_p2, %p3009_p0 }
 0x40c   : > { %p3012_p12 = pnand %p3011_p7, %p3005_p8 }
 0x41f   : > { %v2029_v24 = vpop.permute.xlu1 %2028 }
 0x420   : > { %2106 = vst [vmem:[%s4743_s23] sm:$0xff] %v2029_v24 }
 0x422   : > { %v2034_v0 = vpop.permute.xlu0 %2033 }
 0x423   : > { %2107 = vst [vmem:[%s4743_s23 + $0x8] sm:$0xff] %v2034_v0  ;;  %v2069_v19 = vpop.permute.xlu1 %2068 }
 0x424   : > { %2114 = vst [vmem:[%s4743_s23 + $0x40] sm:$0xff] %v2069_v19 }
 0x426   : > { %v2074_v52 = vpop.permute.xlu0 %2073 }
 0x427   : > { %2115 = vst [vmem:[%s4743_s23 + $0x48] sm:$0xff] %v2074_v52 }
 0x42a   : > { %v2039_v32 = vpop.permute.xlu1 %2038 }
 0x42b   : > { %2108 = vst [vmem:[%s4743_s23 + $0x10] sm:$0xff] %v2039_v32  ;;  %v2044_v63 = vpop.permute.xlu0 %2043 }
 0x42c   : > { %2109 = vst [vmem:[%s4743_s23 + $0x18] sm:$0xff] %v2044_v63 }
 0x42e   : > { %v2079_v36 = vpop.permute.xlu1 %2078 }
 0x42f   : > { %2116 = vst [vmem:[%s4743_s23 + $0x50] sm:$0xff] %v2079_v36  ;;  %v2084_v35 = vpop.permute.xlu0 %2083 }
 0x430   : > { %2117 = vst [vmem:[%s4743_s23 + $0x58] sm:$0xff] %v2084_v35 }
 0x447   : > { %v2049_v48 = vpop.permute.xlu1 %2048 }
 0x448   : > { %2110 = vst [vmem:[%s4743_s23 + $0x20] sm:$0xff] %v2049_v48  ;;  %v2054_v5 = vpop.permute.xlu0 %2053 }
 0x449   : > { %2111 = vst [vmem:[%s4743_s23 + $0x28] sm:$0xff] %v2054_v5 }
 0x44b   : > { %v2089_v55 = vpop.permute.xlu1 %2088 }
 0x44c   : > { %2118 = vst [vmem:[%s4743_s23 + $0x60] sm:$0xff] %v2089_v55 }
 0x44d   : > { %v2094_v30 = vpop.permute.xlu0 %2093 }
 0x44e   : > { %2119 = vst [vmem:[%s4743_s23 + $0x68] sm:$0xff] %v2094_v30 }
 0x45e   : > { %v2059_v44 = vpop.permute.xlu1 %2058 }
 0x45f   : > { %2112 = vst [vmem:[%s4743_s23 + $0x30] sm:$0xff] %v2059_v44 }
 0x460   : > { %v2064_v7 = vpop.permute.xlu0 %2063 }
 0x461   : > { %2113 = vst [vmem:[%s4743_s23 + $0x38] sm:$0xff] %v2064_v7 }
 0x466   : > { %v2099_v38 = vpop.permute.xlu1 %2098 }
 0x467   : > { %2120 = vst [vmem:[%s4743_s23 + $0x70] sm:$0xff] %v2099_v38  ;;  %v2104_v37 = vpop.permute.xlu0 %2103 }
 0x468   : > { %2121 = vst [vmem:[%s4743_s23 + $0x78] sm:$0xff] %v2104_v37 }
 0x469   : > { %3015 = shalt.err (!%p3012_p12)
}
 0x46a   : > { %s3016_s15 = scalar_lea.hbm %s4765_s14, 2048  ;;  %s3020_s6 = scalar_lea.hbm %s4865_s4, 4096 }
 0x46b   : > { %p3017_p5 = scmp.ne.s32.totalorder %s4765_s14, %s3016_s15  ;;  %p3021_p11 = scmp.lt.u32.totalorder %s4765_s14, %s4865_s4 }
 0x46c   : > { %p3022_p4 = scmp.lt.u32.totalorder %s3020_s6, %s3016_s15  ;;  %p3024_p3 = scmp.lt.u32.totalorder %s3016_s15, %s4765_s14 }
 0x46d   : > { %p3018_p9 = pnand %p3017_p5, %p5154_p13 }
 0x46e   : > { %p3023_p1 = por %p3022_p4, %p3021_p11 }
 0x46f   : > { %p3019_p10 = pneg %p3018_p9 }
 0x470   : > { %p3025_p6 = por %p3024_p3, %p3023_p1 }
 0x472   : > { %p3026_p8 = pnand %p3025_p6, %p3019_p10 }
 0x474   : > { %3029 = shalt.err (!%p3026_p8)
}
 0x475   : > { %2619 = dma.vmem_to_hbm [thread:$0]  (%p5154_p13), %s4767_s26, 2048, %s4765_s14, %s4772_s25, %s3133_s21, %s3133_s21, %s3134_s7   ;;  %v2211_v28 = vpop.permute.xlu1 %2210  ;;  %v2216_v59 = vpop.permute.xlu0 %2215 }
 0x476   : > { %s4803_s30 = scalar_lea.hbm %s4866_s5, %s4700_s8  ;;  %2232 = vst [vmem:[%s4591_s9 + $0x70] sm:$0xff] %v2211_v28  ;;  %2233 = vst [vmem:[%s4591_s9 + $0x78] sm:$0xff] %v2216_v59  ;;  %s3030_s15 = scalar_lea.vmem %s4807_s13, 2048 }
 0x477   : > { %p3031_p0 = scmp.ne.s32.totalorder %s4807_s13, %s3030_s15  ;;  %s3136_s26 = smov [#allocation14]  }
 0x478   : > { %s3034_s14 = sshll.u32 %s3136_s26, 4  ;;  %s3035_s14 = int_to_ptr.vmem [resolvable:$false] %s3034_s14 }
 0x479   : > { %p3032_p2 = pnand %p3031_p0, %p5154_p13  ;;  %s3036_s23 = scalar_lea.vmem %s3035_s14, 4096 }
 0x47a   : > { %p3037_p12 = scmp.lt.s32.totalorder %s4807_s13, %s3035_s14  ;;  %p3038_p5 = scmp.lt.s32.totalorder %s3036_s23, %s3030_s15 }
 0x47b   : > { %p3033_p7 = pneg %p3032_p2 }
 0x47c   : > { %p3039_p9 = por %p3038_p5, %p3037_p12 }
 0x47e   : > { %p3040_p10 = pnand %p3039_p9, %p3033_p7 }
 0x480   : > { %3043 = shalt.err (!%p3040_p10)
}
 0x481   : > { %s3044_s9 = scalar_lea.hbm %s4803_s30, 2048  ;;  %s3048_s6 = scalar_lea.hbm %s4866_s5, 4096 }
 0x482   : > { %p3045_p11 = scmp.ne.s32.totalorder %s4803_s30, %s3044_s9  ;;  %p3049_p3 = scmp.lt.u32.totalorder %s4803_s30, %s4866_s5 }
 0x483   : > { %p3050_p6 = scmp.lt.u32.totalorder %s3048_s6, %s3044_s9  ;;  %p3052_p0 = scmp.lt.u32.totalorder %s3044_s9, %s4803_s30 }
 0x484   : > { %p3046_p4 = pnand %p3045_p11, %p5154_p13 }
 0x485   : > { %p3051_p8 = por %p3050_p6, %p3049_p3 }
 0x486   : > { %p3047_p1 = pneg %p3046_p4 }
 0x487   : > { %p3053_p2 = por %p3052_p0, %p3051_p8 }
 0x489   : > { %p3054_p7 = pnand %p3053_p2, %p3047_p1 }
 0x48b   : > { %3057 = shalt.err (!%p3054_p7)
}
 0x48c   : > { %2620 = dma.vmem_to_hbm [thread:$0]  (%p5154_p13), %s4807_s13, 2048, %s4803_s30, %s4772_s25, %s3133_s21, %s3133_s21, %s3134_s7  }
 0x48d PF: > { %s5155_s24 = sld [smem:[#allocation19_spill]]  ;;  %s2308_s27 = sand.u32 1, %s3100_s18  }
 0x48e   : > { %p5156_p12 = scmp.ne.s32.totalorder %s4937_s29, 0  ;;  %s2309_s15 = scalar_lea.sflag [#allocation8], %s2308_s27 }
 0x493   : > { %p5157_p5 = scmp.ge.s32.totalorder %s5155_s24, 2 }
 0x495   : > { %p2633_p9 = pnand %p5157_p5, %p5156_p12 }
 0x497   : > { %3091 = dma.done.wait (!%p2633_p9), %s2309_s15, 2048  }
 0x498   : > { %3093 = vsyncadd (!%p2633_p9), %s2309_s15, 4294965248  ;;  %s5158_s28 = sadd.s32 4294967294, %s5155_s24  }
 0x499   : > { %s2317_s26 = sand.u32 1, %s5158_s28  }
 0x49a   : > { %s2318_s14 = scalar_lea.sflag [#allocation13], %s2317_s26 }
 0x49b   : > { %3095 = dma.done.wait (!%p2633_p9), %s2318_s14, 4096  }
 0x49c   : > { %3097 = vsyncadd (!%p2633_p9), %s2318_s14, 4294963200  ;;  %s26_s23 = sadd.s32 1, %s5155_s24   ;;  %s5159_s18 = smov %s3104_s19 }
 0x49d   : > { %p23_p13 = scmp.ge.s32.totalorder %s26_s23, 4   ;;  %s5160_s19 = smov %s3108_s20 }
 0x49e   : > { %s5161_s20 = smov %s3287_s11  ;;  %s5162_s21 = smov %s3116_s22 }
 0x49f   : > { %s5163_s22 = smov %s5165_s10  ;;  %25 = sbr.rel (!%p23_p13) target bundleno = 9 (0x9), region = 126 }
 0x4a6   :  { %2332 = vsyncpa [#allocation7], 1 }
 0x4a7   :  { %2334 = vsyncpa [#allocation7 + $0x1], 1 }
 0x4a8   :  { %2335 = vsyncpa [#allocation10], 1 }
 0x4a9   :  { %2337 = vsyncpa [#allocation10 + $0x1], 1 }
 0x4aa   :  { %2338 = vsyncpa [#allocation8], 1 }
 0x4ab   :  { %2340 = vsyncpa [#allocation8 + $0x1], 1 }
 0x4ac   :  { %2341 = vsyncpa [#allocation13], 1 }
 0x4ad   :  { %2343 = vsyncpa [#allocation13 + $0x1], 1 }

</bundles_post_ra>
